<compile_context>
chip_gen: v7x
topology: tpu7x:2x2x1
jax: 0.10.0
libtpu: 0.0.40
codegen_flags: <defaults>
</compile_context>

<pallas_src>
import jax
import jax.numpy as jnp
import numpy as np
from jax.experimental import pallas as pl
from jax.experimental.pallas import tpu as pltpu


# ----------------------------------------------------------------------------
# Small helpers / capability probes
# ----------------------------------------------------------------------------
def _round_up(n, m):
    return ((n + m - 1) // m) * m


def _physical_vmem_bytes():
    """Per-core VMEM capacity; conservative 64 MiB (v7x) if the query fails."""
    try:
        return int(pltpu.get_tpu_info().vmem_capacity_bytes)
    except Exception:
        return 64 * 1024 * 1024


_PIPELINE_KW = None


def _weight_pipeline_kwargs():
    """BlockSpec kwargs for grid-resident (loop-invariant) operands.

    Uses pipeline_mode=pl.Buffered(1) (single VMEM buffer instead of the default
    double buffer) when this JAX/Mosaic build supports it, halving weight VMEM.
    Probed once with a tiny kernel; falls back to {} otherwise.
    """
    global _PIPELINE_KW
    if _PIPELINE_KW is not None:
        return _PIPELINE_KW
    try:
        kw = {"pipeline_mode": pl.Buffered(1)}

        def _probe(x_ref, o_ref):
            o_ref[...] = x_ref[...] * 2.0

        y = pl.pallas_call(
            _probe,
            out_shape=jax.ShapeDtypeStruct((8, 128), jnp.float32),
            grid=(2,),
            in_specs=[pl.BlockSpec((8, 128), lambda i: (0, 0), **kw)],
            out_specs=pl.BlockSpec((8, 128), lambda i: (0, 0)),
        )(jnp.ones((8, 128), jnp.float32))
        y = jax.block_until_ready(y)
        if not bool(jnp.all(y == 2.0)):
            raise ValueError("Buffered(1) probe produced wrong values")
        _PIPELINE_KW = kw
    except Exception:
        _PIPELINE_KW = {}
    return _PIPELINE_KW


_SMALL_K_OK = None


def _small_k_matmul_ok():
    """Whether a bf16 matmul with a tiny (unaligned) contracting dim lowers."""
    global _SMALL_K_OK
    if _SMALL_K_OK is not None:
        return _SMALL_K_OK
    try:
        def _probe(a_ref, b_ref, o_ref):
            o_ref[...] = jnp.dot(a_ref[...], b_ref[...],
                                 preferred_element_type=jnp.float32)

        a = jnp.ones((16, 4), jnp.bfloat16)
        b = jnp.ones((4, 128), jnp.bfloat16)
        y = pl.pallas_call(
            _probe, out_shape=jax.ShapeDtypeStruct((16, 128), jnp.float32))(a, b)
        y = jax.block_until_ready(y)
        _SMALL_K_OK = bool(jnp.allclose(np.asarray(y), 4.0))
    except Exception:
        _SMALL_K_OK = False
    return _SMALL_K_OK


def _layer0_in_dim(d_in):
    """Keep the layer-0 feature dim unpadded when small-K matmuls are supported."""
    if d_in % 128 == 0 or _small_k_matmul_ok():
        return d_in
    return _round_up(d_in, 128)


# ----------------------------------------------------------------------------
# VMEM-aware time-chunk selection
# ----------------------------------------------------------------------------
def _vmem_estimate(t_chunk, Bp, D0, Hp, Op, L, weight_buffers):
    """Rough VMEM bytes used by the fused kernel at a given chunk size."""
    Rc = t_chunk * Bp
    bf2, f4 = 2, 4
    w = D0 * 4 * Hp * bf2 + Hp * 4 * Hp * bf2 + 4 * Hp * f4            # layer 0
    w += (L - 1) * (2 * Hp * 4 * Hp * bf2 + 4 * Hp * f4)               # layers 1..L-1
    w += Hp * Op * f4 + Op * f4                                        # fc
    w *= weight_buffers                                                # 1 if Buffered(1)
    streamed = 2 * Rc * D0 * bf2 + 2 * Bp * Op * f4                    # x + out (2-buffered)
    scratch = Rc * 4 * Hp * f4 + Rc * Hp * bf2 + 2 * L * Bp * Hp * f4  # gih + act + h/c
    return w + streamed + scratch


def _select_time_chunk(T, Bp, D0, Hp, Op, L, weight_buffers, vmem_bytes,
                       frac=0.55, cap=128):
    def fits(tc):
        return _vmem_estimate(tc, Bp, D0, Hp, Op, L, weight_buffers) <= frac * vmem_bytes

    if T <= cap and fits(T):
        return T                       # whole sequence in one chunk: exact, no tail mask
    tc = (min(T, cap) // 16) * 16      # Rc = tc*Bp multiple of 256 when Bp >= 16
    while tc >= 16:
        if fits(tc):
            return tc
        tc -= 16
    tc = 8
    while tc > 1 and not fits(tc):
        tc //= 2
    return max(tc, 1)


def _pick_unroll(t_chunk):
    for u in (8, 4, 2):
        if t_chunk % u == 0:
            return u
    return 1


# ----------------------------------------------------------------------------
# Fused multi-layer LSTM + fc + sigmoid kernel
# ----------------------------------------------------------------------------
def _make_fused_lstm_kernel(num_layers, Bp, Hp, t_chunk, T_real, unroll):
    needs_mask = (T_real % t_chunk) != 0
    bf16 = jnp.bfloat16

    def kernel(*refs):
        # refs: x, (wih, whh, b) per layer, fc_w, fc_b | out | gih, act, h_scr, c_scr
        x_ref = refs[0]
        layer_refs = [tuple(refs[1 + 3 * l: 4 + 3 * l]) for l in range(num_layers)]
        fcw_ref = refs[1 + 3 * num_layers]
        fcb_ref = refs[2 + 3 * num_layers]
        out_ref = refs[3 + 3 * num_layers]
        gih_ref, act_ref, h_scr, c_scr = refs[4 + 3 * num_layers:]

        @pl.when(pl.program_id(0) == 0)
        def _init():
            h_scr[...] = jnp.zeros_like(h_scr)
            c_scr[...] = jnp.zeros_like(c_scr)

        chunk_base = pl.program_id(0) * t_chunk
        h = None
        for l in range(num_layers):
            wih_ref, whh_ref, b_ref = layer_refs[l]
            src_ref = x_ref if l == 0 else act_ref

            # Phase 1: input projection + bias for the whole chunk — one MXU matmul.
            gih_ref[...] = (
                jnp.dot(src_ref[...], wih_ref[...],
                        preferred_element_type=jnp.float32)
                + b_ref[...])

            write_act = l < num_layers - 1

            # Phase 2: recurrence over the chunk (sequential h/c dependence).
            def step(t, carry):
                h, c = carry
                row = pl.multiple_of(t * Bp, Bp)
                gates = gih_ref[pl.ds(row, Bp), :] + jnp.dot(
                    h.astype(bf16), whh_ref[...],
                    preferred_element_type=jnp.float32)
                # PyTorch gate order i, f, g, o; Hp % 128 == 0 -> lane-aligned slices.
                i = jax.nn.sigmoid(gates[:, 0 * Hp:1 * Hp])
                f = jax.nn.sigmoid(gates[:, 1 * Hp:2 * Hp])
                g = jnp.tanh(gates[:, 2 * Hp:3 * Hp])
                o = jax.nn.sigmoid(gates[:, 3 * Hp:4 * Hp])
                c_new = f * c + i * g
                h_new = o * jnp.tanh(c_new)
                if write_act:
                    act_ref[pl.ds(row, Bp), :] = h_new.astype(act_ref.dtype)
                if needs_mask:
                    # Freeze the state on padded tail timesteps of the last chunk.
                    valid = (chunk_base + t) < T_real
                    h_new = jnp.where(valid, h_new, h)
                    c_new = jnp.where(valid, c_new, c)
                return h_new, c_new

            h, c = jax.lax.fori_loop(0, t_chunk, step, (h_scr[l], c_scr[l]),
                                     unroll=unroll)
            h_scr[l] = h
            c_scr[l] = c

        # Fused fc + sigmoid on the last real timestep's hidden state.
        @pl.when(pl.program_id(0) == pl.num_programs(0) - 1)
        def _final():
            logits = jnp.dot(h, fcw_ref[...],
                             preferred_element_type=jnp.float32) + fcb_ref[...]
            out_ref[...] = jax.nn.sigmoid(logits)

    return kernel


def lstm_model_forward(x, kparams, output_size, *, t_chunk=None):
    """Eval-mode forward of LSTMModel.  x: (B, T, input_size) float32."""
    B, T, D = x.shape
    layers = kparams["lstm"]
    L = len(layers)
    Hp = layers[0]["w_hh_t"].shape[0]
    D0 = layers[0]["w_ih_t"].shape[0]      # layer-0 feature dim (possibly padded)
    Op = kparams["fc_w_t"].shape[1]
    Bp = _round_up(B, 16)                   # bf16 sublane-packing friendly batch pad

    wkw = _weight_pipeline_kwargs()
    weight_buffers = 1 if wkw else 2
    phys_vmem = _physical_vmem_bytes()
    if t_chunk is None:
        t_chunk = _select_time_chunk(T, Bp, D0, Hp, Op, L, weight_buffers, phys_vmem)
    n_chunks = (T + t_chunk - 1) // t_chunk
    T_pad = n_chunks * t_chunk
    Rc = t_chunk * Bp

    # Time-major, batch-padded (zeros), bf16; rows are (time, batch)-flattened.
    x_tm = jnp.transpose(x, (1, 0, 2)).astype(jnp.bfloat16)                 # (T, B, D)
    x_pad = jnp.zeros((T_pad, Bp, D0), jnp.bfloat16).at[:T, :B, :D].set(x_tm)
    x2d = x_pad.reshape(T_pad * Bp, D0)

    est = _vmem_estimate(t_chunk, Bp, D0, Hp, Op, L, weight_buffers)
    vmem_limit = min(int(0.85 * phys_vmem), max(int(1.5 * est), 16 * 1024 * 1024))

    const = lambda t: (0, 0)
    in_specs = [pl.BlockSpec((Rc, D0), lambda t: (t, 0))]                   # streamed x
    operands = [x2d]
    for l, layer in enumerate(layers):
        d_in = D0 if l == 0 else Hp
        in_specs += [
            pl.BlockSpec((d_in, 4 * Hp), const, **wkw),                     # W_ih (resident)
            pl.BlockSpec((Hp, 4 * Hp), const, **wkw),                       # W_hh (resident)
            pl.BlockSpec((1, 4 * Hp), const, **wkw),                        # bias  (resident)
        ]
        operands += [layer["w_ih_t"], layer["w_hh_t"], layer["b"]]
    in_specs += [pl.BlockSpec((Hp, Op), const, **wkw),
                 pl.BlockSpec((1, Op), const, **wkw)]
    operands += [kparams["fc_w_t"], kparams["fc_b"]]

    kernel = _make_fused_lstm_kernel(L, Bp, Hp, t_chunk, T, _pick_unroll(t_chunk))

    out_p = pl.pallas_call(
        kernel,
        out_shape=jax.ShapeDtypeStruct((Bp, Op), jnp.float32),
        grid=(n_chunks,),
        in_specs=in_specs,
        out_specs=pl.BlockSpec((Bp, Op), const),                            # resident output
        scratch_shapes=[
            pltpu.VMEM((Rc, 4 * Hp), jnp.float32),    # gate pre-activations (per chunk)
            pltpu.VMEM((Rc, Hp), jnp.bfloat16),       # inter-layer activations (per chunk)
            pltpu.VMEM((L, Bp, Hp), jnp.float32),     # persistent h per layer
            pltpu.VMEM((L, Bp, Hp), jnp.float32),     # persistent c per layer
        ],
        compiler_params=pltpu.CompilerParams(
            dimension_semantics=("arbitrary",),
            vmem_limit_bytes=vmem_limit,
        ),
    )(*operands)

    # nn.Dropout in eval mode == identity; strip batch/output padding.
    return out_p[:B, :output_size]


# ----------------------------------------------------------------------------
# Parameter init (PyTorch layout) + padding/layout preparation for the kernel
# ----------------------------------------------------------------------------
def init_params(key, input_size, hidden_size, num_layers, output_size):
    """PyTorch-style raw params: uniform(-1/sqrt(H), 1/sqrt(H)), gate order i,f,g,o."""
    params = {"lstm": []}
    k = 1.0 / np.sqrt(hidden_size)
    for layer in range(num_layers):
        d_in = input_size if layer == 0 else hidden_size
        key, k1, k2, k3, k4 = jax.random.split(key, 5)
        params["lstm"].append({
            "w_ih": jax.random.uniform(k1, (4 * hidden_size, d_in), jnp.float32, -k, k),
            "w_hh": jax.random.uniform(k2, (4 * hidden_size, hidden_size), jnp.float32, -k, k),
            "b_ih": jax.random.uniform(k3, (4 * hidden_size,), jnp.float32, -k, k),
            "b_hh": jax.random.uniform(k4, (4 * hidden_size,), jnp.float32, -k, k),
        })
    key, k1, k2 = jax.random.split(key, 3)
    params["fc_w"] = jax.random.uniform(k1, (output_size, hidden_size), jnp.float32, -k, k)
    params["fc_b"] = jax.random.uniform(k2, (output_size,), jnp.float32, -k, k)
    return params


def _pad_gate_weight(w, H, Hp, d_in, d_in_p):
    # w: (4H, d_in), gates stacked (i, f, g, o).  Pad each gate block to Hp and the
    # input dim to d_in_p (zeros), laid out as (d_in_p, 4*Hp) gate-major lane-aligned
    # column blocks.  Zero padding keeps the recurrence exact (padded units stay 0).
    w4 = w.reshape(4, H, d_in)
    w4p = jnp.zeros((4, Hp, d_in_p), w.dtype).at[:, :H, :d_in].set(w4)
    return jnp.transpose(w4p, (2, 0, 1)).reshape(d_in_p, 4 * Hp)


def _pad_gate_bias(b, H, Hp):
    b4 = b.reshape(4, H)
    return jnp.zeros((4, Hp), b.dtype).at[:, :H].set(b4).reshape(1, 4 * Hp)


def prepare_params(raw, compute_dtype=jnp.bfloat16):
    H = raw["lstm"][0]["w_hh"].shape[1]
    Hp = _round_up(H, 128)
    prepared = {"lstm": []}
    for li, layer in enumerate(raw["lstm"]):
        d_in = layer["w_ih"].shape[1]
        d_in_p = _layer0_in_dim(d_in) if li == 0 else Hp
        prepared["lstm"].append({
            "w_ih_t": _pad_gate_weight(layer["w_ih"], H, Hp, d_in, d_in_p).astype(compute_dtype),
            "w_hh_t": _pad_gate_weight(layer["w_hh"], H, Hp, H, Hp).astype(compute_dtype),
            "b": _pad_gate_bias(layer["b_ih"] + layer["b_hh"], H, Hp).astype(jnp.float32),
        })
    O = raw["fc_w"].shape[0]
    Op = _round_up(O, 128)
    prepared["fc_w_t"] = jnp.zeros((Hp, Op), jnp.float32).at[:H, :O].set(raw["fc_w"].T)
    prepared["fc_b"] = jnp.zeros((1, Op), jnp.float32).at[0, :O].set(raw["fc_b"])
    return prepared


# ----------------------------------------------------------------------------
# Pure-JAX f32 reference (same semantics as the PyTorch module, eval mode)
# ----------------------------------------------------------------------------
def reference_forward(x, raw):
    B, T, _ = x.shape
    h_seq = jnp.transpose(x, (1, 0, 2))
    for layer in raw["lstm"]:
        H = layer["w_hh"].shape[1]
        wih_t = layer["w_ih"].T
        whh_t = layer["w_hh"].T
        b = (layer["b_ih"] + layer["b_hh"])[None, :]
        h = jnp.zeros((B, H), jnp.float32)
        c = jnp.zeros((B, H), jnp.float32)
        outs = []
        for t in range(T):
            gates = h_seq[t] @ wih_t + h @ whh_t + b
            i = jax.nn.sigmoid(gates[:, 0 * H:1 * H])
            f = jax.nn.sigmoid(gates[:, 1 * H:2 * H])
            g = jnp.tanh(gates[:, 2 * H:3 * H])
            o = jax.nn.sigmoid(gates[:, 3 * H:4 * H])
            c = f * c + i * g
            h = o * jnp.tanh(c)
            outs.append(h)
        h_seq = jnp.stack(outs, axis=0)
    return jax.nn.sigmoid(h_seq[-1] @ raw["fc_w"].T + raw["fc_b"][None, :])


# ----------------------------------------------------------------------------
if __name__ == "__main__":
    batch, seq, input_size = 2, 8, 4
    hidden_size, num_layers, output_size = 32, 2, 1

    key = jax.random.PRNGKey(0)
    key, kx = jax.random.split(key)
    x = jax.random.normal(kx, (batch, seq, input_size), jnp.float32)

    raw_params = init_params(key, input_size, hidden_size, num_layers, output_size)
    kparams = prepare_params(raw_params)

    out = jax.block_until_ready(lstm_model_forward(x, kparams, output_size))
    ref = jax.block_until_ready(reference_forward(x, raw_params))

    # bf16 matmul path -> slightly looser tolerance than the pure-f32 reference.
    np.testing.assert_allclose(np.asarray(out), np.asarray(ref), rtol=3e-2, atol=3e-2)
    assert out.shape == (batch, output_size)

    # Also exercise the multi-chunk + ragged-tail (masked padded timesteps) path.
    out_mc = jax.block_until_ready(
        lstm_model_forward(x, kparams, output_size, t_chunk=3))
    np.testing.assert_allclose(np.asarray(out_mc), np.asarray(ref), rtol=3e-2, atol=3e-2)

    print("KERNEL_OK")
</pallas_src>

<mosaic_0001>
module attributes {stable_mosaic.version = 11 : i64} {
  func.func @_probe(%arg0: memref<16x4xbf16, #tpu.memory_space<vmem>>, %arg1: memref<4x128xbf16, #tpu.memory_space<vmem>>, %arg2: memref<16x128xf32, #tpu.memory_space<vmem>>) attributes {dimension_semantics = [], scalar_prefetch = 0 : i64, scratch_operands = 0 : i64, tpu.core_type = #tpu.core_type<tc>} {
    %c0 = arith.constant 0 : index
    %c0_0 = arith.constant 0 : index
    %0 = vector.load %arg0[%c0, %c0_0] : memref<16x4xbf16, #tpu.memory_space<vmem>>, vector<16x4xbf16>
    %c0_1 = arith.constant 0 : index
    %c0_2 = arith.constant 0 : index
    %1 = vector.load %arg1[%c0_1, %c0_2] : memref<4x128xbf16, #tpu.memory_space<vmem>>, vector<4x128xbf16>
    %cst = arith.constant dense<0.000000e+00> : vector<16x128xf32>
    %2 = tpu.matmul %0, %1, %cst {dimension_numbers = #tpu.dot_dimension_numbers<[1], [0], [0], [1], [0, 0, 1, 1], [], []>} : vector<16x4xbf16>, vector<4x128xbf16>, vector<16x128xf32> -> vector<16x128xf32>
    %c0_3 = arith.constant 0 : index
    %c0_4 = arith.constant 0 : index
    %3 = vector.load %arg2[%c0_3, %c0_4] : memref<16x128xf32, #tpu.memory_space<vmem>>, vector<16x128xf32>
    tpu.vector_store %arg2[%c0_3, %c0_4], %2 {strides = array<i32>} : memref<16x128xf32, #tpu.memory_space<vmem>>, vector<16x128xf32>,
    return
  }
}

module attributes {stable_mosaic.version = 11 : i64} {
  func.func @_probe(%arg0: i32, %arg1: memref<8x128xf32, #tpu.memory_space<vmem>>, %arg2: memref<8x128xf32, #tpu.memory_space<vmem>>) attributes {dimension_semantics = [#tpu.dimension_semantics<arbitrary>], iteration_bounds = array<i64: 2>, scalar_prefetch = 0 : i64, scratch_operands = 0 : i64, tpu.core_type = #tpu.core_type<tc>, window_params = [{pipeline_mode = #tpu.pipeline_mode<synchronous>, transform_indices = @transform_0, window_bounds = array<i64: 8, 128>}, {pipeline_mode = #tpu.pipeline_mode<synchronous>, transform_indices = @transform_1, window_bounds = array<i64: 8, 128>}]} {
    %c0 = arith.constant 0 : index
    %c0_0 = arith.constant 0 : index
    %0 = vector.load %arg1[%c0, %c0_0] : memref<8x128xf32, #tpu.memory_space<vmem>>, vector<8x128xf32>
    %cst = arith.constant 2.000000e+00 : f32
    %1 = vector.broadcast %cst : f32 to vector<8x128xf32>
    %2 = arith.mulf %0, %1 : vector<8x128xf32>
    %c0_1 = arith.constant 0 : index
    %c0_2 = arith.constant 0 : index
    %3 = vector.load %arg2[%c0_1, %c0_2] : memref<8x128xf32, #tpu.memory_space<vmem>>, vector<8x128xf32>
    tpu.vector_store %arg2[%c0_1, %c0_2], %2 {strides = array<i32>} : memref<8x128xf32, #tpu.memory_space<vmem>>, vector<8x128xf32>,
    return
  }
  func.func @transform_0(%arg0: i32) -> (i32, i32) {
    %c0_i32 = arith.constant 0 : i32
    %c0_i32_0 = arith.constant 0 : i32
    %c0_i32_1 = arith.constant 0 : i32
    return %c0_i32, %c0_i32_0 : i32, i32
  }
  func.func @transform_1(%arg0: i32) -> (i32, i32) {
    %c0_i32 = arith.constant 0 : i32
    %c0_i32_0 = arith.constant 0 : i32
    %c0_i32_1 = arith.constant 0 : i32
    return %c0_i32, %c0_i32_0 : i32, i32
  }
}

module attributes {stable_mosaic.version = 11 : i64} {
  func.func @kernel(%arg0: i32, %arg1: memref<128x128xbf16, #tpu.memory_space<vmem>>, %arg2: memref<128x512xbf16, #tpu.memory_space<vmem>>, %arg3: memref<128x512xbf16, #tpu.memory_space<vmem>>, %arg4: memref<1x512xf32, #tpu.memory_space<vmem>>, %arg5: memref<128x512xbf16, #tpu.memory_space<vmem>>, %arg6: memref<128x512xbf16, #tpu.memory_space<vmem>>, %arg7: memref<1x512xf32, #tpu.memory_space<vmem>>, %arg8: memref<128x128xf32, #tpu.memory_space<vmem>>, %arg9: memref<1x128xf32, #tpu.memory_space<vmem>>, %arg10: memref<16x128xf32, #tpu.memory_space<vmem>>, %arg11: memref<128x512xf32, #tpu.memory_space<vmem>>, %arg12: memref<128x128xbf16, #tpu.memory_space<vmem>>, %arg13: memref<2x16x128xf32, #tpu.memory_space<vmem>>, %arg14: memref<2x16x128xf32, #tpu.memory_space<vmem>>) attributes {dimension_semantics = [#tpu.dimension_semantics<arbitrary>], iteration_bounds = array<i64: 1>, scalar_prefetch = 0 : i64, scratch_operands = 4 : i64, tpu.core_type = #tpu.core_type<tc>, window_params = [{transform_indices = @transform_0, window_bounds = array<i64: 128, 128>}, {pipeline_mode = #tpu.pipeline_mode<synchronous>, transform_indices = @transform_1, window_bounds = array<i64: 128, 512>}, {pipeline_mode = #tpu.pipeline_mode<synchronous>, transform_indices = @transform_2, window_bounds = array<i64: 128, 512>}, {pipeline_mode = #tpu.pipeline_mode<synchronous>, transform_indices = @transform_3, window_bounds = array<i64: 1, 512>}, {pipeline_mode = #tpu.pipeline_mode<synchronous>, transform_indices = @transform_4, window_bounds = array<i64: 128, 512>}, {pipeline_mode = #tpu.pipeline_mode<synchronous>, transform_indices = @transform_5, window_bounds = array<i64: 128, 512>}, {pipeline_mode = #tpu.pipeline_mode<synchronous>, transform_indices = @transform_6, window_bounds = array<i64: 1, 512>}, {pipeline_mode = #tpu.pipeline_mode<synchronous>, transform_indices = @transform_7, window_bounds = array<i64: 128, 128>}, {pipeline_mode = #tpu.pipeline_mode<synchronous>, transform_indices = @transform_8, window_bounds = array<i64: 1, 128>}, {pipeline_mode = #tpu.pipeline_mode<synchronous>, transform_indices = @transform_9, window_bounds = array<i64: 16, 128>}]} {
    %c0_i32 = arith.constant 0 : i32
    %0 = arith.cmpi eq, %arg0, %c0_i32 : i32
    %1 = arith.extui %0 : i1 to i32
    %c0_i32_0 = arith.constant 0 : i32
    %2 = arith.cmpi ne, %1, %c0_i32_0 : i32
    scf.if %2 {
      %cst_187 = arith.constant 0.000000e+00 : f32
      %592 = vector.broadcast %cst_187 : f32 to vector<2x16x128xf32>
      %c0_188 = arith.constant 0 : index
      %c0_189 = arith.constant 0 : index
      %c0_190 = arith.constant 0 : index
      %593 = vector.load %arg13[%c0_188, %c0_189, %c0_190] : memref<2x16x128xf32, #tpu.memory_space<vmem>>, vector<2x16x128xf32>
      tpu.vector_store %arg13[%c0_188, %c0_189, %c0_190], %592 {strides = array<i32>} : memref<2x16x128xf32, #tpu.memory_space<vmem>>, vector<2x16x128xf32>,
      %cst_191 = arith.constant 0.000000e+00 : f32
      %594 = vector.broadcast %cst_191 : f32 to vector<2x16x128xf32>
      %c0_192 = arith.constant 0 : index
      %c0_193 = arith.constant 0 : index
      %c0_194 = arith.constant 0 : index
      %595 = vector.load %arg14[%c0_192, %c0_193, %c0_194] : memref<2x16x128xf32, #tpu.memory_space<vmem>>, vector<2x16x128xf32>
      tpu.vector_store %arg14[%c0_192, %c0_193, %c0_194], %594 {strides = array<i32>} : memref<2x16x128xf32, #tpu.memory_space<vmem>>, vector<2x16x128xf32>,
    } else {
    }
    %c0 = arith.constant 0 : index
    %c0_1 = arith.constant 0 : index
    %3 = vector.load %arg1[%c0, %c0_1] : memref<128x128xbf16, #tpu.memory_space<vmem>>, vector<128x128xbf16>
    %c0_2 = arith.constant 0 : index
    %c0_3 = arith.constant 0 : index
    %4 = vector.load %arg2[%c0_2, %c0_3] : memref<128x512xbf16, #tpu.memory_space<vmem>>, vector<128x512xbf16>
    %cst = arith.constant dense<0.000000e+00> : vector<128x512xf32>
    %5 = tpu.matmul %3, %4, %cst {dimension_numbers = #tpu.dot_dimension_numbers<[1], [0], [0], [1], [0, 0, 1, 1], [], []>} : vector<128x128xbf16>, vector<128x512xbf16>, vector<128x512xf32> -> vector<128x512xf32>
    %c0_4 = arith.constant 0 : index
    %c0_5 = arith.constant 0 : index
    %6 = vector.load %arg4[%c0_4, %c0_5] : memref<1x512xf32, #tpu.memory_space<vmem>>, vector<1x512xf32>
    %7 = vector.broadcast %6 : vector<1x512xf32> to vector<128x512xf32>
    %8 = arith.addf %5, %7 : vector<128x512xf32>
    %c0_6 = arith.constant 0 : index
    %c0_7 = arith.constant 0 : index
    %9 = vector.load %arg11[%c0_6, %c0_7] : memref<128x512xf32, #tpu.memory_space<vmem>>, vector<128x512xf32>
    tpu.vector_store %arg11[%c0_6, %c0_7], %8 {strides = array<i32>} : memref<128x512xf32, #tpu.memory_space<vmem>>, vector<128x512xf32>,
    %c0_8 = arith.constant 0 : index
    %c0_9 = arith.constant 0 : index
    %c0_10 = arith.constant 0 : index
    %10 = vector.load %arg13[%c0_8, %c0_9, %c0_10] : memref<2x16x128xf32, #tpu.memory_space<vmem>>, vector<1x16x128xf32>
    %11 = vector.shape_cast %10 : vector<1x16x128xf32> to vector<16x128xf32>
    %c0_11 = arith.constant 0 : index
    %c0_12 = arith.constant 0 : index
    %c0_13 = arith.constant 0 : index
    %12 = vector.load %arg14[%c0_11, %c0_12, %c0_13] : memref<2x16x128xf32, #tpu.memory_space<vmem>>, vector<1x16x128xf32>
    %13 = vector.shape_cast %12 : vector<1x16x128xf32> to vector<16x128xf32>
    %c0_i32_14 = arith.constant 0 : i32
    %c16_i32 = arith.constant 16 : i32
    %14 = arith.muli %c0_i32_14, %c16_i32 : i32
    %15 = tpu.assume_multiple %14, 16 : i32
    %16 = arith.index_cast %15 : i32 to index
    %c0_15 = arith.constant 0 : index
    %17 = vector.load %arg11[%16, %c0_15] : memref<128x512xf32, #tpu.memory_space<vmem>>, vector<16x512xf32>
    %18 = arith.truncf %11 : vector<16x128xf32> to vector<16x128xbf16>
    %c0_16 = arith.constant 0 : index
    %c0_17 = arith.constant 0 : index
    %19 = vector.load %arg3[%c0_16, %c0_17] : memref<128x512xbf16, #tpu.memory_space<vmem>>, vector<128x512xbf16>
    %cst_18 = arith.constant dense<0.000000e+00> : vector<16x512xf32>
    %20 = tpu.matmul %18, %19, %cst_18 {dimension_numbers = #tpu.dot_dimension_numbers<[1], [0], [0], [1], [0, 0, 1, 1], [], []>} : vector<16x128xbf16>, vector<128x512xbf16>, vector<16x512xf32> -> vector<16x512xf32>
    %21 = arith.addf %17, %20 : vector<16x512xf32>
    %22 = vector.extract_strided_slice %21 {offsets = [0, 0], sizes = [16, 128], strides = [1, 1]} : vector<16x512xf32> to vector<16x128xf32>
    %23 = arith.negf %22 : vector<16x128xf32>
    %24 = math.exp %23 : vector<16x128xf32>
    %cst_19 = arith.constant 1.000000e+00 : f32
    %25 = vector.broadcast %cst_19 : f32 to vector<16x128xf32>
    %26 = arith.addf %25, %24 : vector<16x128xf32>
    %27 = arith.divf %25, %26 : vector<16x128xf32>
    %28 = vector.extract_strided_slice %21 {offsets = [0, 128], sizes = [16, 128], strides = [1, 1]} : vector<16x512xf32> to vector<16x128xf32>
    %29 = arith.negf %28 : vector<16x128xf32>
    %30 = math.exp %29 : vector<16x128xf32>
    %cst_20 = arith.constant 1.000000e+00 : f32
    %31 = vector.broadcast %cst_20 : f32 to vector<16x128xf32>
    %32 = arith.addf %31, %30 : vector<16x128xf32>
    %33 = arith.divf %31, %32 : vector<16x128xf32>
    %34 = vector.extract_strided_slice %21 {offsets = [0, 256], sizes = [16, 128], strides = [1, 1]} : vector<16x512xf32> to vector<16x128xf32>
    %35 = math.tanh %34 : vector<16x128xf32>
    %36 = vector.extract_strided_slice %21 {offsets = [0, 384], sizes = [16, 128], strides = [1, 1]} : vector<16x512xf32> to vector<16x128xf32>
    %37 = arith.negf %36 : vector<16x128xf32>
    %38 = math.exp %37 : vector<16x128xf32>
    %cst_21 = arith.constant 1.000000e+00 : f32
    %39 = vector.broadcast %cst_21 : f32 to vector<16x128xf32>
    %40 = arith.addf %39, %38 : vector<16x128xf32>
    %41 = arith.divf %39, %40 : vector<16x128xf32>
    %42 = arith.mulf %33, %13 : vector<16x128xf32>
    %43 = arith.mulf %27, %35 : vector<16x128xf32>
    %44 = arith.addf %42, %43 : vector<16x128xf32>
    %45 = math.tanh %44 : vector<16x128xf32>
    %46 = arith.mulf %41, %45 : vector<16x128xf32>
    %47 = arith.truncf %46 : vector<16x128xf32> to vector<16x128xbf16>
    %48 = arith.index_cast %15 : i32 to index
    %c0_22 = arith.constant 0 : index
    %49 = vector.load %arg12[%48, %c0_22] : memref<128x128xbf16, #tpu.memory_space<vmem>>, vector<16x128xbf16>
    tpu.vector_store %arg12[%48, %c0_22], %47 {strides = array<i32>} : memref<128x128xbf16, #tpu.memory_space<vmem>>, vector<16x128xbf16>,
    %c1_i32 = arith.constant 1 : i32
    %c16_i32_23 = arith.constant 16 : i32
    %50 = arith.muli %c1_i32, %c16_i32_23 : i32
    %51 = tpu.assume_multiple %50, 16 : i32
    %52 = arith.index_cast %51 : i32 to index
    %c0_24 = arith.constant 0 : index
    %53 = vector.load %arg11[%52, %c0_24] : memref<128x512xf32, #tpu.memory_space<vmem>>, vector<16x512xf32>
    %54 = arith.truncf %46 : vector<16x128xf32> to vector<16x128xbf16>
    %c0_25 = arith.constant 0 : index
    %c0_26 = arith.constant 0 : index
    %55 = vector.load %arg3[%c0_25, %c0_26] : memref<128x512xbf16, #tpu.memory_space<vmem>>, vector<128x512xbf16>
    %cst_27 = arith.constant dense<0.000000e+00> : vector<16x512xf32>
    %56 = tpu.matmul %54, %55, %cst_27 {dimension_numbers = #tpu.dot_dimension_numbers<[1], [0], [0], [1], [0, 0, 1, 1], [], []>} : vector<16x128xbf16>, vector<128x512xbf16>, vector<16x512xf32> -> vector<16x512xf32>
    %57 = arith.addf %53, %56 : vector<16x512xf32>
    %58 = vector.extract_strided_slice %57 {offsets = [0, 0], sizes = [16, 128], strides = [1, 1]} : vector<16x512xf32> to vector<16x128xf32>
    %59 = arith.negf %58 : vector<16x128xf32>
    %60 = math.exp %59 : vector<16x128xf32>
    %cst_28 = arith.constant 1.000000e+00 : f32
    %61 = vector.broadcast %cst_28 : f32 to vector<16x128xf32>
    %62 = arith.addf %61, %60 : vector<16x128xf32>
    %63 = arith.divf %61, %62 : vector<16x128xf32>
    %64 = vector.extract_strided_slice %57 {offsets = [0, 128], sizes = [16, 128], strides = [1, 1]} : vector<16x512xf32> to vector<16x128xf32>
    %65 = arith.negf %64 : vector<16x128xf32>
    %66 = math.exp %65 : vector<16x128xf32>
    %cst_29 = arith.constant 1.000000e+00 : f32
    %67 = vector.broadcast %cst_29 : f32 to vector<16x128xf32>
    %68 = arith.addf %67, %66 : vector<16x128xf32>
    %69 = arith.divf %67, %68 : vector<16x128xf32>
    %70 = vector.extract_strided_slice %57 {offsets = [0, 256], sizes = [16, 128], strides = [1, 1]} : vector<16x512xf32> to vector<16x128xf32>
    %71 = math.tanh %70 : vector<16x128xf32>
    %72 = vector.extract_strided_slice %57 {offsets = [0, 384], sizes = [16, 128], strides = [1, 1]} : vector<16x512xf32> to vector<16x128xf32>
    %73 = arith.negf %72 : vector<16x128xf32>
    %74 = math.exp %73 : vector<16x128xf32>
    %cst_30 = arith.constant 1.000000e+00 : f32
    %75 = vector.broadcast %cst_30 : f32 to vector<16x128xf32>
    %76 = arith.addf %75, %74 : vector<16x128xf32>
    %77 = arith.divf %75, %76 : vector<16x128xf32>
    %78 = arith.mulf %69, %44 : vector<16x128xf32>
    %79 = arith.mulf %63, %71 : vector<16x128xf32>
    %80 = arith.addf %78, %79 : vector<16x128xf32>
    %81 = math.tanh %80 : vector<16x128xf32>
    %82 = arith.mulf %77, %81 : vector<16x128xf32>
    %83 = arith.truncf %82 : vector<16x128xf32> to vector<16x128xbf16>
    %84 = arith.index_cast %51 : i32 to index
    %c0_31 = arith.constant 0 : index
    %85 = vector.load %arg12[%84, %c0_31] : memref<128x128xbf16, #tpu.memory_space<vmem>>, vector<16x128xbf16>
    tpu.vector_store %arg12[%84, %c0_31], %83 {strides = array<i32>} : memref<128x128xbf16, #tpu.memory_space<vmem>>, vector<16x128xbf16>,
    %c2_i32 = arith.constant 2 : i32
    %c16_i32_32 = arith.constant 16 : i32
    %86 = arith.muli %c2_i32, %c16_i32_32 : i32
    %87 = tpu.assume_multiple %86, 16 : i32
    %88 = arith.index_cast %87 : i32 to index
    %c0_33 = arith.constant 0 : index
    %89 = vector.load %arg11[%88, %c0_33] : memref<128x512xf32, #tpu.memory_space<vmem>>, vector<16x512xf32>
    %90 = arith.truncf %82 : vector<16x128xf32> to vector<16x128xbf16>
    %c0_34 = arith.constant 0 : index
    %c0_35 = arith.constant 0 : index
    %91 = vector.load %arg3[%c0_34, %c0_35] : memref<128x512xbf16, #tpu.memory_space<vmem>>, vector<128x512xbf16>
    %cst_36 = arith.constant dense<0.000000e+00> : vector<16x512xf32>
    %92 = tpu.matmul %90, %91, %cst_36 {dimension_numbers = #tpu.dot_dimension_numbers<[1], [0], [0], [1], [0, 0, 1, 1], [], []>} : vector<16x128xbf16>, vector<128x512xbf16>, vector<16x512xf32> -> vector<16x512xf32>
    %93 = arith.addf %89, %92 : vector<16x512xf32>
    %94 = vector.extract_strided_slice %93 {offsets = [0, 0], sizes = [16, 128], strides = [1, 1]} : vector<16x512xf32> to vector<16x128xf32>
    %95 = arith.negf %94 : vector<16x128xf32>
    %96 = math.exp %95 : vector<16x128xf32>
    %cst_37 = arith.constant 1.000000e+00 : f32
    %97 = vector.broadcast %cst_37 : f32 to vector<16x128xf32>
    %98 = arith.addf %97, %96 : vector<16x128xf32>
    %99 = arith.divf %97, %98 : vector<16x128xf32>
    %100 = vector.extract_strided_slice %93 {offsets = [0, 128], sizes = [16, 128], strides = [1, 1]} : vector<16x512xf32> to vector<16x128xf32>
    %101 = arith.negf %100 : vector<16x128xf32>
    %102 = math.exp %101 : vector<16x128xf32>
    %cst_38 = arith.constant 1.000000e+00 : f32
    %103 = vector.broadcast %cst_38 : f32 to vector<16x128xf32>
    %104 = arith.addf %103, %102 : vector<16x128xf32>
    %105 = arith.divf %103, %104 : vector<16x128xf32>
    %106 = vector.extract_strided_slice %93 {offsets = [0, 256], sizes = [16, 128], strides = [1, 1]} : vector<16x512xf32> to vector<16x128xf32>
    %107 = math.tanh %106 : vector<16x128xf32>
    %108 = vector.extract_strided_slice %93 {offsets = [0, 384], sizes = [16, 128], strides = [1, 1]} : vector<16x512xf32> to vector<16x128xf32>
    %109 = arith.negf %108 : vector<16x128xf32>
    %110 = math.exp %109 : vector<16x128xf32>
    %cst_39 = arith.constant 1.000000e+00 : f32
    %111 = vector.broadcast %cst_39 : f32 to vector<16x128xf32>
    %112 = arith.addf %111, %110 : vector<16x128xf32>
    %113 = arith.divf %111, %112 : vector<16x128xf32>
    %114 = arith.mulf %105, %80 : vector<16x128xf32>
    %115 = arith.mulf %99, %107 : vector<16x128xf32>
    %116 = arith.addf %114, %115 : vector<16x128xf32>
    %117 = math.tanh %116 : vector<16x128xf32>
    %118 = arith.mulf %113, %117 : vector<16x128xf32>
    %119 = arith.truncf %118 : vector<16x128xf32> to vector<16x128xbf16>
    %120 = arith.index_cast %87 : i32 to index
    %c0_40 = arith.constant 0 : index
    %121 = vector.load %arg12[%120, %c0_40] : memref<128x128xbf16, #tpu.memory_space<vmem>>, vector<16x128xbf16>
    tpu.vector_store %arg12[%120, %c0_40], %119 {strides = array<i32>} : memref<128x128xbf16, #tpu.memory_space<vmem>>, vector<16x128xbf16>,
    %c3_i32 = arith.constant 3 : i32
    %c16_i32_41 = arith.constant 16 : i32
    %122 = arith.muli %c3_i32, %c16_i32_41 : i32
    %123 = tpu.assume_multiple %122, 16 : i32
    %124 = arith.index_cast %123 : i32 to index
    %c0_42 = arith.constant 0 : index
    %125 = vector.load %arg11[%124, %c0_42] : memref<128x512xf32, #tpu.memory_space<vmem>>, vector<16x512xf32>
    %126 = arith.truncf %118 : vector<16x128xf32> to vector<16x128xbf16>
    %c0_43 = arith.constant 0 : index
    %c0_44 = arith.constant 0 : index
    %127 = vector.load %arg3[%c0_43, %c0_44] : memref<128x512xbf16, #tpu.memory_space<vmem>>, vector<128x512xbf16>
    %cst_45 = arith.constant dense<0.000000e+00> : vector<16x512xf32>
    %128 = tpu.matmul %126, %127, %cst_45 {dimension_numbers = #tpu.dot_dimension_numbers<[1], [0], [0], [1], [0, 0, 1, 1], [], []>} : vector<16x128xbf16>, vector<128x512xbf16>, vector<16x512xf32> -> vector<16x512xf32>
    %129 = arith.addf %125, %128 : vector<16x512xf32>
    %130 = vector.extract_strided_slice %129 {offsets = [0, 0], sizes = [16, 128], strides = [1, 1]} : vector<16x512xf32> to vector<16x128xf32>
    %131 = arith.negf %130 : vector<16x128xf32>
    %132 = math.exp %131 : vector<16x128xf32>
    %cst_46 = arith.constant 1.000000e+00 : f32
    %133 = vector.broadcast %cst_46 : f32 to vector<16x128xf32>
    %134 = arith.addf %133, %132 : vector<16x128xf32>
    %135 = arith.divf %133, %134 : vector<16x128xf32>
    %136 = vector.extract_strided_slice %129 {offsets = [0, 128], sizes = [16, 128], strides = [1, 1]} : vector<16x512xf32> to vector<16x128xf32>
    %137 = arith.negf %136 : vector<16x128xf32>
    %138 = math.exp %137 : vector<16x128xf32>
    %cst_47 = arith.constant 1.000000e+00 : f32
    %139 = vector.broadcast %cst_47 : f32 to vector<16x128xf32>
    %140 = arith.addf %139, %138 : vector<16x128xf32>
    %141 = arith.divf %139, %140 : vector<16x128xf32>
    %142 = vector.extract_strided_slice %129 {offsets = [0, 256], sizes = [16, 128], strides = [1, 1]} : vector<16x512xf32> to vector<16x128xf32>
    %143 = math.tanh %142 : vector<16x128xf32>
    %144 = vector.extract_strided_slice %129 {offsets = [0, 384], sizes = [16, 128], strides = [1, 1]} : vector<16x512xf32> to vector<16x128xf32>
    %145 = arith.negf %144 : vector<16x128xf32>
    %146 = math.exp %145 : vector<16x128xf32>
    %cst_48 = arith.constant 1.000000e+00 : f32
    %147 = vector.broadcast %cst_48 : f32 to vector<16x128xf32>
    %148 = arith.addf %147, %146 : vector<16x128xf32>
    %149 = arith.divf %147, %148 : vector<16x128xf32>
    %150 = arith.mulf %141, %116 : vector<16x128xf32>
    %151 = arith.mulf %135, %143 : vector<16x128xf32>
    %152 = arith.addf %150, %151 : vector<16x128xf32>
    %153 = math.tanh %152 : vector<16x128xf32>
    %154 = arith.mulf %149, %153 : vector<16x128xf32>
    %155 = arith.truncf %154 : vector<16x128xf32> to vector<16x128xbf16>
    %156 = arith.index_cast %123 : i32 to index
    %c0_49 = arith.constant 0 : index
    %157 = vector.load %arg12[%156, %c0_49] : memref<128x128xbf16, #tpu.memory_space<vmem>>, vector<16x128xbf16>
    tpu.vector_store %arg12[%156, %c0_49], %155 {strides = array<i32>} : memref<128x128xbf16, #tpu.memory_space<vmem>>, vector<16x128xbf16>,
    %c4_i32 = arith.constant 4 : i32
    %c16_i32_50 = arith.constant 16 : i32
    %158 = arith.muli %c4_i32, %c16_i32_50 : i32
    %159 = tpu.assume_multiple %158, 16 : i32
    %160 = arith.index_cast %159 : i32 to index
    %c0_51 = arith.constant 0 : index
    %161 = vector.load %arg11[%160, %c0_51] : memref<128x512xf32, #tpu.memory_space<vmem>>, vector<16x512xf32>
    %162 = arith.truncf %154 : vector<16x128xf32> to vector<16x128xbf16>
    %c0_52 = arith.constant 0 : index
    %c0_53 = arith.constant 0 : index
    %163 = vector.load %arg3[%c0_52, %c0_53] : memref<128x512xbf16, #tpu.memory_space<vmem>>, vector<128x512xbf16>
    %cst_54 = arith.constant dense<0.000000e+00> : vector<16x512xf32>
    %164 = tpu.matmul %162, %163, %cst_54 {dimension_numbers = #tpu.dot_dimension_numbers<[1], [0], [0], [1], [0, 0, 1, 1], [], []>} : vector<16x128xbf16>, vector<128x512xbf16>, vector<16x512xf32> -> vector<16x512xf32>
    %165 = arith.addf %161, %164 : vector<16x512xf32>
    %166 = vector.extract_strided_slice %165 {offsets = [0, 0], sizes = [16, 128], strides = [1, 1]} : vector<16x512xf32> to vector<16x128xf32>
    %167 = arith.negf %166 : vector<16x128xf32>
    %168 = math.exp %167 : vector<16x128xf32>
    %cst_55 = arith.constant 1.000000e+00 : f32
    %169 = vector.broadcast %cst_55 : f32 to vector<16x128xf32>
    %170 = arith.addf %169, %168 : vector<16x128xf32>
    %171 = arith.divf %169, %170 : vector<16x128xf32>
    %172 = vector.extract_strided_slice %165 {offsets = [0, 128], sizes = [16, 128], strides = [1, 1]} : vector<16x512xf32> to vector<16x128xf32>
    %173 = arith.negf %172 : vector<16x128xf32>
    %174 = math.exp %173 : vector<16x128xf32>
    %cst_56 = arith.constant 1.000000e+00 : f32
    %175 = vector.broadcast %cst_56 : f32 to vector<16x128xf32>
    %176 = arith.addf %175, %174 : vector<16x128xf32>
    %177 = arith.divf %175, %176 : vector<16x128xf32>
    %178 = vector.extract_strided_slice %165 {offsets = [0, 256], sizes = [16, 128], strides = [1, 1]} : vector<16x512xf32> to vector<16x128xf32>
    %179 = math.tanh %178 : vector<16x128xf32>
    %180 = vector.extract_strided_slice %165 {offsets = [0, 384], sizes = [16, 128], strides = [1, 1]} : vector<16x512xf32> to vector<16x128xf32>
    %181 = arith.negf %180 : vector<16x128xf32>
    %182 = math.exp %181 : vector<16x128xf32>
    %cst_57 = arith.constant 1.000000e+00 : f32
    %183 = vector.broadcast %cst_57 : f32 to vector<16x128xf32>
    %184 = arith.addf %183, %182 : vector<16x128xf32>
    %185 = arith.divf %183, %184 : vector<16x128xf32>
    %186 = arith.mulf %177, %152 : vector<16x128xf32>
    %187 = arith.mulf %171, %179 : vector<16x128xf32>
    %188 = arith.addf %186, %187 : vector<16x128xf32>
    %189 = math.tanh %188 : vector<16x128xf32>
    %190 = arith.mulf %185, %189 : vector<16x128xf32>
    %191 = arith.truncf %190 : vector<16x128xf32> to vector<16x128xbf16>
    %192 = arith.index_cast %159 : i32 to index
    %c0_58 = arith.constant 0 : index
    %193 = vector.load %arg12[%192, %c0_58] : memref<128x128xbf16, #tpu.memory_space<vmem>>, vector<16x128xbf16>
    tpu.vector_store %arg12[%192, %c0_58], %191 {strides = array<i32>} : memref<128x128xbf16, #tpu.memory_space<vmem>>, vector<16x128xbf16>,
    %c5_i32 = arith.constant 5 : i32
    %c16_i32_59 = arith.constant 16 : i32
    %194 = arith.muli %c5_i32, %c16_i32_59 : i32
    %195 = tpu.assume_multiple %194, 16 : i32
    %196 = arith.index_cast %195 : i32 to index
    %c0_60 = arith.constant 0 : index
    %197 = vector.load %arg11[%196, %c0_60] : memref<128x512xf32, #tpu.memory_space<vmem>>, vector<16x512xf32>
    %198 = arith.truncf %190 : vector<16x128xf32> to vector<16x128xbf16>
    %c0_61 = arith.constant 0 : index
    %c0_62 = arith.constant 0 : index
    %199 = vector.load %arg3[%c0_61, %c0_62] : memref<128x512xbf16, #tpu.memory_space<vmem>>, vector<128x512xbf16>
    %cst_63 = arith.constant dense<0.000000e+00> : vector<16x512xf32>
    %200 = tpu.matmul %198, %199, %cst_63 {dimension_numbers = #tpu.dot_dimension_numbers<[1], [0], [0], [1], [0, 0, 1, 1], [], []>} : vector<16x128xbf16>, vector<128x512xbf16>, vector<16x512xf32> -> vector<16x512xf32>
    %201 = arith.addf %197, %200 : vector<16x512xf32>
    %202 = vector.extract_strided_slice %201 {offsets = [0, 0], sizes = [16, 128], strides = [1, 1]} : vector<16x512xf32> to vector<16x128xf32>
    %203 = arith.negf %202 : vector<16x128xf32>
    %204 = math.exp %203 : vector<16x128xf32>
    %cst_64 = arith.constant 1.000000e+00 : f32
    %205 = vector.broadcast %cst_64 : f32 to vector<16x128xf32>
    %206 = arith.addf %205, %204 : vector<16x128xf32>
    %207 = arith.divf %205, %206 : vector<16x128xf32>
    %208 = vector.extract_strided_slice %201 {offsets = [0, 128], sizes = [16, 128], strides = [1, 1]} : vector<16x512xf32> to vector<16x128xf32>
    %209 = arith.negf %208 : vector<16x128xf32>
    %210 = math.exp %209 : vector<16x128xf32>
    %cst_65 = arith.constant 1.000000e+00 : f32
    %211 = vector.broadcast %cst_65 : f32 to vector<16x128xf32>
    %212 = arith.addf %211, %210 : vector<16x128xf32>
    %213 = arith.divf %211, %212 : vector<16x128xf32>
    %214 = vector.extract_strided_slice %201 {offsets = [0, 256], sizes = [16, 128], strides = [1, 1]} : vector<16x512xf32> to vector<16x128xf32>
    %215 = math.tanh %214 : vector<16x128xf32>
    %216 = vector.extract_strided_slice %201 {offsets = [0, 384], sizes = [16, 128], strides = [1, 1]} : vector<16x512xf32> to vector<16x128xf32>
    %217 = arith.negf %216 : vector<16x128xf32>
    %218 = math.exp %217 : vector<16x128xf32>
    %cst_66 = arith.constant 1.000000e+00 : f32
    %219 = vector.broadcast %cst_66 : f32 to vector<16x128xf32>
    %220 = arith.addf %219, %218 : vector<16x128xf32>
    %221 = arith.divf %219, %220 : vector<16x128xf32>
    %222 = arith.mulf %213, %188 : vector<16x128xf32>
    %223 = arith.mulf %207, %215 : vector<16x128xf32>
    %224 = arith.addf %222, %223 : vector<16x128xf32>
    %225 = math.tanh %224 : vector<16x128xf32>
    %226 = arith.mulf %221, %225 : vector<16x128xf32>
    %227 = arith.truncf %226 : vector<16x128xf32> to vector<16x128xbf16>
    %228 = arith.index_cast %195 : i32 to index
    %c0_67 = arith.constant 0 : index
    %229 = vector.load %arg12[%228, %c0_67] : memref<128x128xbf16, #tpu.memory_space<vmem>>, vector<16x128xbf16>
    tpu.vector_store %arg12[%228, %c0_67], %227 {strides = array<i32>} : memref<128x128xbf16, #tpu.memory_space<vmem>>, vector<16x128xbf16>,
    %c6_i32 = arith.constant 6 : i32
    %c16_i32_68 = arith.constant 16 : i32
    %230 = arith.muli %c6_i32, %c16_i32_68 : i32
    %231 = tpu.assume_multiple %230, 16 : i32
    %232 = arith.index_cast %231 : i32 to index
    %c0_69 = arith.constant 0 : index
    %233 = vector.load %arg11[%232, %c0_69] : memref<128x512xf32, #tpu.memory_space<vmem>>, vector<16x512xf32>
    %234 = arith.truncf %226 : vector<16x128xf32> to vector<16x128xbf16>
    %c0_70 = arith.constant 0 : index
    %c0_71 = arith.constant 0 : index
    %235 = vector.load %arg3[%c0_70, %c0_71] : memref<128x512xbf16, #tpu.memory_space<vmem>>, vector<128x512xbf16>
    %cst_72 = arith.constant dense<0.000000e+00> : vector<16x512xf32>
    %236 = tpu.matmul %234, %235, %cst_72 {dimension_numbers = #tpu.dot_dimension_numbers<[1], [0], [0], [1], [0, 0, 1, 1], [], []>} : vector<16x128xbf16>, vector<128x512xbf16>, vector<16x512xf32> -> vector<16x512xf32>
    %237 = arith.addf %233, %236 : vector<16x512xf32>
    %238 = vector.extract_strided_slice %237 {offsets = [0, 0], sizes = [16, 128], strides = [1, 1]} : vector<16x512xf32> to vector<16x128xf32>
    %239 = arith.negf %238 : vector<16x128xf32>
    %240 = math.exp %239 : vector<16x128xf32>
    %cst_73 = arith.constant 1.000000e+00 : f32
    %241 = vector.broadcast %cst_73 : f32 to vector<16x128xf32>
    %242 = arith.addf %241, %240 : vector<16x128xf32>
    %243 = arith.divf %241, %242 : vector<16x128xf32>
    %244 = vector.extract_strided_slice %237 {offsets = [0, 128], sizes = [16, 128], strides = [1, 1]} : vector<16x512xf32> to vector<16x128xf32>
    %245 = arith.negf %244 : vector<16x128xf32>
    %246 = math.exp %245 : vector<16x128xf32>
    %cst_74 = arith.constant 1.000000e+00 : f32
    %247 = vector.broadcast %cst_74 : f32 to vector<16x128xf32>
    %248 = arith.addf %247, %246 : vector<16x128xf32>
    %249 = arith.divf %247, %248 : vector<16x128xf32>
    %250 = vector.extract_strided_slice %237 {offsets = [0, 256], sizes = [16, 128], strides = [1, 1]} : vector<16x512xf32> to vector<16x128xf32>
    %251 = math.tanh %250 : vector<16x128xf32>
    %252 = vector.extract_strided_slice %237 {offsets = [0, 384], sizes = [16, 128], strides = [1, 1]} : vector<16x512xf32> to vector<16x128xf32>
    %253 = arith.negf %252 : vector<16x128xf32>
    %254 = math.exp %253 : vector<16x128xf32>
    %cst_75 = arith.constant 1.000000e+00 : f32
    %255 = vector.broadcast %cst_75 : f32 to vector<16x128xf32>
    %256 = arith.addf %255, %254 : vector<16x128xf32>
    %257 = arith.divf %255, %256 : vector<16x128xf32>
    %258 = arith.mulf %249, %224 : vector<16x128xf32>
    %259 = arith.mulf %243, %251 : vector<16x128xf32>
    %260 = arith.addf %258, %259 : vector<16x128xf32>
    %261 = math.tanh %260 : vector<16x128xf32>
    %262 = arith.mulf %257, %261 : vector<16x128xf32>
    %263 = arith.truncf %262 : vector<16x128xf32> to vector<16x128xbf16>
    %264 = arith.index_cast %231 : i32 to index
    %c0_76 = arith.constant 0 : index
    %265 = vector.load %arg12[%264, %c0_76] : memref<128x128xbf16, #tpu.memory_space<vmem>>, vector<16x128xbf16>
    tpu.vector_store %arg12[%264, %c0_76], %263 {strides = array<i32>} : memref<128x128xbf16, #tpu.memory_space<vmem>>, vector<16x128xbf16>,
    %c7_i32 = arith.constant 7 : i32
    %c16_i32_77 = arith.constant 16 : i32
    %266 = arith.muli %c7_i32, %c16_i32_77 : i32
    %267 = tpu.assume_multiple %266, 16 : i32
    %268 = arith.index_cast %267 : i32 to index
    %c0_78 = arith.constant 0 : index
    %269 = vector.load %arg11[%268, %c0_78] : memref<128x512xf32, #tpu.memory_space<vmem>>, vector<16x512xf32>
    %270 = arith.truncf %262 : vector<16x128xf32> to vector<16x128xbf16>
    %c0_79 = arith.constant 0 : index
    %c0_80 = arith.constant 0 : index
    %271 = vector.load %arg3[%c0_79, %c0_80] : memref<128x512xbf16, #tpu.memory_space<vmem>>, vector<128x512xbf16>
    %cst_81 = arith.constant dense<0.000000e+00> : vector<16x512xf32>
    %272 = tpu.matmul %270, %271, %cst_81 {dimension_numbers = #tpu.dot_dimension_numbers<[1], [0], [0], [1], [0, 0, 1, 1], [], []>} : vector<16x128xbf16>, vector<128x512xbf16>, vector<16x512xf32> -> vector<16x512xf32>
    %273 = arith.addf %269, %272 : vector<16x512xf32>
    %274 = vector.extract_strided_slice %273 {offsets = [0, 0], sizes = [16, 128], strides = [1, 1]} : vector<16x512xf32> to vector<16x128xf32>
    %275 = arith.negf %274 : vector<16x128xf32>
    %276 = math.exp %275 : vector<16x128xf32>
    %cst_82 = arith.constant 1.000000e+00 : f32
    %277 = vector.broadcast %cst_82 : f32 to vector<16x128xf32>
    %278 = arith.addf %277, %276 : vector<16x128xf32>
    %279 = arith.divf %277, %278 : vector<16x128xf32>
    %280 = vector.extract_strided_slice %273 {offsets = [0, 128], sizes = [16, 128], strides = [1, 1]} : vector<16x512xf32> to vector<16x128xf32>
    %281 = arith.negf %280 : vector<16x128xf32>
    %282 = math.exp %281 : vector<16x128xf32>
    %cst_83 = arith.constant 1.000000e+00 : f32
    %283 = vector.broadcast %cst_83 : f32 to vector<16x128xf32>
    %284 = arith.addf %283, %282 : vector<16x128xf32>
    %285 = arith.divf %283, %284 : vector<16x128xf32>
    %286 = vector.extract_strided_slice %273 {offsets = [0, 256], sizes = [16, 128], strides = [1, 1]} : vector<16x512xf32> to vector<16x128xf32>
    %287 = math.tanh %286 : vector<16x128xf32>
    %288 = vector.extract_strided_slice %273 {offsets = [0, 384], sizes = [16, 128], strides = [1, 1]} : vector<16x512xf32> to vector<16x128xf32>
    %289 = arith.negf %288 : vector<16x128xf32>
    %290 = math.exp %289 : vector<16x128xf32>
    %cst_84 = arith.constant 1.000000e+00 : f32
    %291 = vector.broadcast %cst_84 : f32 to vector<16x128xf32>
    %292 = arith.addf %291, %290 : vector<16x128xf32>
    %293 = arith.divf %291, %292 : vector<16x128xf32>
    %294 = arith.mulf %285, %260 : vector<16x128xf32>
    %295 = arith.mulf %279, %287 : vector<16x128xf32>
    %296 = arith.addf %294, %295 : vector<16x128xf32>
    %297 = math.tanh %296 : vector<16x128xf32>
    %298 = arith.mulf %293, %297 : vector<16x128xf32>
    %299 = arith.truncf %298 : vector<16x128xf32> to vector<16x128xbf16>
    %300 = arith.index_cast %267 : i32 to index
    %c0_85 = arith.constant 0 : index
    %301 = vector.load %arg12[%300, %c0_85] : memref<128x128xbf16, #tpu.memory_space<vmem>>, vector<16x128xbf16>
    tpu.vector_store %arg12[%300, %c0_85], %299 {strides = array<i32>} : memref<128x128xbf16, #tpu.memory_space<vmem>>, vector<16x128xbf16>,
    %c8_i32 = arith.constant 8 : i32
    %c0_86 = arith.constant 0 : index
    %c0_87 = arith.constant 0 : index
    %c0_88 = arith.constant 0 : index
    %302 = vector.load %arg13[%c0_86, %c0_87, %c0_88] : memref<2x16x128xf32, #tpu.memory_space<vmem>>, vector<1x16x128xf32>
    %303 = vector.shape_cast %302 : vector<1x16x128xf32> to vector<16x128xf32>
    %304 = vector.shape_cast %298 : vector<16x128xf32> to vector<1x16x128xf32>
    tpu.vector_store %arg13[%c0_86, %c0_87, %c0_88], %304 {strides = array<i32>} : memref<2x16x128xf32, #tpu.memory_space<vmem>>, vector<1x16x128xf32>,
    %c0_89 = arith.constant 0 : index
    %c0_90 = arith.constant 0 : index
    %c0_91 = arith.constant 0 : index
    %305 = vector.load %arg14[%c0_89, %c0_90, %c0_91] : memref<2x16x128xf32, #tpu.memory_space<vmem>>, vector<1x16x128xf32>
    %306 = vector.shape_cast %305 : vector<1x16x128xf32> to vector<16x128xf32>
    %307 = vector.shape_cast %296 : vector<16x128xf32> to vector<1x16x128xf32>
    tpu.vector_store %arg14[%c0_89, %c0_90, %c0_91], %307 {strides = array<i32>} : memref<2x16x128xf32, #tpu.memory_space<vmem>>, vector<1x16x128xf32>,
    %c0_92 = arith.constant 0 : index
    %c0_93 = arith.constant 0 : index
    %308 = vector.load %arg12[%c0_92, %c0_93] : memref<128x128xbf16, #tpu.memory_space<vmem>>, vector<128x128xbf16>
    %c0_94 = arith.constant 0 : index
    %c0_95 = arith.constant 0 : index
    %309 = vector.load %arg5[%c0_94, %c0_95] : memref<128x512xbf16, #tpu.memory_space<vmem>>, vector<128x512xbf16>
    %cst_96 = arith.constant dense<0.000000e+00> : vector<128x512xf32>
    %310 = tpu.matmul %308, %309, %cst_96 {dimension_numbers = #tpu.dot_dimension_numbers<[1], [0], [0], [1], [0, 0, 1, 1], [], []>} : vector<128x128xbf16>, vector<128x512xbf16>, vector<128x512xf32> -> vector<128x512xf32>
    %c0_97 = arith.constant 0 : index
    %c0_98 = arith.constant 0 : index
    %311 = vector.load %arg7[%c0_97, %c0_98] : memref<1x512xf32, #tpu.memory_space<vmem>>, vector<1x512xf32>
    %312 = vector.broadcast %311 : vector<1x512xf32> to vector<128x512xf32>
    %313 = arith.addf %310, %312 : vector<128x512xf32>
    %c0_99 = arith.constant 0 : index
    %c0_100 = arith.constant 0 : index
    %314 = vector.load %arg11[%c0_99, %c0_100] : memref<128x512xf32, #tpu.memory_space<vmem>>, vector<128x512xf32>
    tpu.vector_store %arg11[%c0_99, %c0_100], %313 {strides = array<i32>} : memref<128x512xf32, #tpu.memory_space<vmem>>, vector<128x512xf32>,
    %c1 = arith.constant 1 : index
    %c0_101 = arith.constant 0 : index
    %c0_102 = arith.constant 0 : index
    %315 = vector.load %arg13[%c1, %c0_101, %c0_102] : memref<2x16x128xf32, #tpu.memory_space<vmem>>, vector<1x16x128xf32>
    %316 = vector.shape_cast %315 : vector<1x16x128xf32> to vector<16x128xf32>
    %c1_103 = arith.constant 1 : index
    %c0_104 = arith.constant 0 : index
    %c0_105 = arith.constant 0 : index
    %317 = vector.load %arg14[%c1_103, %c0_104, %c0_105] : memref<2x16x128xf32, #tpu.memory_space<vmem>>, vector<1x16x128xf32>
    %318 = vector.shape_cast %317 : vector<1x16x128xf32> to vector<16x128xf32>
    %c0_i32_106 = arith.constant 0 : i32
    %c16_i32_107 = arith.constant 16 : i32
    %319 = arith.muli %c0_i32_106, %c16_i32_107 : i32
    %320 = tpu.assume_multiple %319, 16 : i32
    %321 = arith.index_cast %320 : i32 to index
    %c0_108 = arith.constant 0 : index
    %322 = vector.load %arg11[%321, %c0_108] : memref<128x512xf32, #tpu.memory_space<vmem>>, vector<16x512xf32>
    %323 = arith.truncf %316 : vector<16x128xf32> to vector<16x128xbf16>
    %c0_109 = arith.constant 0 : index
    %c0_110 = arith.constant 0 : index
    %324 = vector.load %arg6[%c0_109, %c0_110] : memref<128x512xbf16, #tpu.memory_space<vmem>>, vector<128x512xbf16>
    %cst_111 = arith.constant dense<0.000000e+00> : vector<16x512xf32>
    %325 = tpu.matmul %323, %324, %cst_111 {dimension_numbers = #tpu.dot_dimension_numbers<[1], [0], [0], [1], [0, 0, 1, 1], [], []>} : vector<16x128xbf16>, vector<128x512xbf16>, vector<16x512xf32> -> vector<16x512xf32>
    %326 = arith.addf %322, %325 : vector<16x512xf32>
    %327 = vector.extract_strided_slice %326 {offsets = [0, 0], sizes = [16, 128], strides = [1, 1]} : vector<16x512xf32> to vector<16x128xf32>
    %328 = arith.negf %327 : vector<16x128xf32>
    %329 = math.exp %328 : vector<16x128xf32>
    %cst_112 = arith.constant 1.000000e+00 : f32
    %330 = vector.broadcast %cst_112 : f32 to vector<16x128xf32>
    %331 = arith.addf %330, %329 : vector<16x128xf32>
    %332 = arith.divf %330, %331 : vector<16x128xf32>
    %333 = vector.extract_strided_slice %326 {offsets = [0, 128], sizes = [16, 128], strides = [1, 1]} : vector<16x512xf32> to vector<16x128xf32>
    %334 = arith.negf %333 : vector<16x128xf32>
    %335 = math.exp %334 : vector<16x128xf32>
    %cst_113 = arith.constant 1.000000e+00 : f32
    %336 = vector.broadcast %cst_113 : f32 to vector<16x128xf32>
    %337 = arith.addf %336, %335 : vector<16x128xf32>
    %338 = arith.divf %336, %337 : vector<16x128xf32>
    %339 = vector.extract_strided_slice %326 {offsets = [0, 256], sizes = [16, 128], strides = [1, 1]} : vector<16x512xf32> to vector<16x128xf32>
    %340 = math.tanh %339 : vector<16x128xf32>
    %341 = vector.extract_strided_slice %326 {offsets = [0, 384], sizes = [16, 128], strides = [1, 1]} : vector<16x512xf32> to vector<16x128xf32>
    %342 = arith.negf %341 : vector<16x128xf32>
    %343 = math.exp %342 : vector<16x128xf32>
    %cst_114 = arith.constant 1.000000e+00 : f32
    %344 = vector.broadcast %cst_114 : f32 to vector<16x128xf32>
    %345 = arith.addf %344, %343 : vector<16x128xf32>
    %346 = arith.divf %344, %345 : vector<16x128xf32>
    %347 = arith.mulf %338, %318 : vector<16x128xf32>
    %348 = arith.mulf %332, %340 : vector<16x128xf32>
    %349 = arith.addf %347, %348 : vector<16x128xf32>
    %350 = math.tanh %349 : vector<16x128xf32>
    %351 = arith.mulf %346, %350 : vector<16x128xf32>
    %c1_i32_115 = arith.constant 1 : i32
    %c16_i32_116 = arith.constant 16 : i32
    %352 = arith.muli %c1_i32_115, %c16_i32_116 : i32
    %353 = tpu.assume_multiple %352, 16 : i32
    %354 = arith.index_cast %353 : i32 to index
    %c0_117 = arith.constant 0 : index
    %355 = vector.load %arg11[%354, %c0_117] : memref<128x512xf32, #tpu.memory_space<vmem>>, vector<16x512xf32>
    %356 = arith.truncf %351 : vector<16x128xf32> to vector<16x128xbf16>
    %c0_118 = arith.constant 0 : index
    %c0_119 = arith.constant 0 : index
    %357 = vector.load %arg6[%c0_118, %c0_119] : memref<128x512xbf16, #tpu.memory_space<vmem>>, vector<128x512xbf16>
    %cst_120 = arith.constant dense<0.000000e+00> : vector<16x512xf32>
    %358 = tpu.matmul %356, %357, %cst_120 {dimension_numbers = #tpu.dot_dimension_numbers<[1], [0], [0], [1], [0, 0, 1, 1], [], []>} : vector<16x128xbf16>, vector<128x512xbf16>, vector<16x512xf32> -> vector<16x512xf32>
    %359 = arith.addf %355, %358 : vector<16x512xf32>
    %360 = vector.extract_strided_slice %359 {offsets = [0, 0], sizes = [16, 128], strides = [1, 1]} : vector<16x512xf32> to vector<16x128xf32>
    %361 = arith.negf %360 : vector<16x128xf32>
    %362 = math.exp %361 : vector<16x128xf32>
    %cst_121 = arith.constant 1.000000e+00 : f32
    %363 = vector.broadcast %cst_121 : f32 to vector<16x128xf32>
    %364 = arith.addf %363, %362 : vector<16x128xf32>
    %365 = arith.divf %363, %364 : vector<16x128xf32>
    %366 = vector.extract_strided_slice %359 {offsets = [0, 128], sizes = [16, 128], strides = [1, 1]} : vector<16x512xf32> to vector<16x128xf32>
    %367 = arith.negf %366 : vector<16x128xf32>
    %368 = math.exp %367 : vector<16x128xf32>
    %cst_122 = arith.constant 1.000000e+00 : f32
    %369 = vector.broadcast %cst_122 : f32 to vector<16x128xf32>
    %370 = arith.addf %369, %368 : vector<16x128xf32>
    %371 = arith.divf %369, %370 : vector<16x128xf32>
    %372 = vector.extract_strided_slice %359 {offsets = [0, 256], sizes = [16, 128], strides = [1, 1]} : vector<16x512xf32> to vector<16x128xf32>
    %373 = math.tanh %372 : vector<16x128xf32>
    %374 = vector.extract_strided_slice %359 {offsets = [0, 384], sizes = [16, 128], strides = [1, 1]} : vector<16x512xf32> to vector<16x128xf32>
    %375 = arith.negf %374 : vector<16x128xf32>
    %376 = math.exp %375 : vector<16x128xf32>
    %cst_123 = arith.constant 1.000000e+00 : f32
    %377 = vector.broadcast %cst_123 : f32 to vector<16x128xf32>
    %378 = arith.addf %377, %376 : vector<16x128xf32>
    %379 = arith.divf %377, %378 : vector<16x128xf32>
    %380 = arith.mulf %371, %349 : vector<16x128xf32>
    %381 = arith.mulf %365, %373 : vector<16x128xf32>
    %382 = arith.addf %380, %381 : vector<16x128xf32>
    %383 = math.tanh %382 : vector<16x128xf32>
    %384 = arith.mulf %379, %383 : vector<16x128xf32>
    %c2_i32_124 = arith.constant 2 : i32
    %c16_i32_125 = arith.constant 16 : i32
    %385 = arith.muli %c2_i32_124, %c16_i32_125 : i32
    %386 = tpu.assume_multiple %385, 16 : i32
    %387 = arith.index_cast %386 : i32 to index
    %c0_126 = arith.constant 0 : index
    %388 = vector.load %arg11[%387, %c0_126] : memref<128x512xf32, #tpu.memory_space<vmem>>, vector<16x512xf32>
    %389 = arith.truncf %384 : vector<16x128xf32> to vector<16x128xbf16>
    %c0_127 = arith.constant 0 : index
    %c0_128 = arith.constant 0 : index
    %390 = vector.load %arg6[%c0_127, %c0_128] : memref<128x512xbf16, #tpu.memory_space<vmem>>, vector<128x512xbf16>
    %cst_129 = arith.constant dense<0.000000e+00> : vector<16x512xf32>
    %391 = tpu.matmul %389, %390, %cst_129 {dimension_numbers = #tpu.dot_dimension_numbers<[1], [0], [0], [1], [0, 0, 1, 1], [], []>} : vector<16x128xbf16>, vector<128x512xbf16>, vector<16x512xf32> -> vector<16x512xf32>
    %392 = arith.addf %388, %391 : vector<16x512xf32>
    %393 = vector.extract_strided_slice %392 {offsets = [0, 0], sizes = [16, 128], strides = [1, 1]} : vector<16x512xf32> to vector<16x128xf32>
    %394 = arith.negf %393 : vector<16x128xf32>
    %395 = math.exp %394 : vector<16x128xf32>
    %cst_130 = arith.constant 1.000000e+00 : f32
    %396 = vector.broadcast %cst_130 : f32 to vector<16x128xf32>
    %397 = arith.addf %396, %395 : vector<16x128xf32>
    %398 = arith.divf %396, %397 : vector<16x128xf32>
    %399 = vector.extract_strided_slice %392 {offsets = [0, 128], sizes = [16, 128], strides = [1, 1]} : vector<16x512xf32> to vector<16x128xf32>
    %400 = arith.negf %399 : vector<16x128xf32>
    %401 = math.exp %400 : vector<16x128xf32>
    %cst_131 = arith.constant 1.000000e+00 : f32
    %402 = vector.broadcast %cst_131 : f32 to vector<16x128xf32>
    %403 = arith.addf %402, %401 : vector<16x128xf32>
    %404 = arith.divf %402, %403 : vector<16x128xf32>
    %405 = vector.extract_strided_slice %392 {offsets = [0, 256], sizes = [16, 128], strides = [1, 1]} : vector<16x512xf32> to vector<16x128xf32>
    %406 = math.tanh %405 : vector<16x128xf32>
    %407 = vector.extract_strided_slice %392 {offsets = [0, 384], sizes = [16, 128], strides = [1, 1]} : vector<16x512xf32> to vector<16x128xf32>
    %408 = arith.negf %407 : vector<16x128xf32>
    %409 = math.exp %408 : vector<16x128xf32>
    %cst_132 = arith.constant 1.000000e+00 : f32
    %410 = vector.broadcast %cst_132 : f32 to vector<16x128xf32>
    %411 = arith.addf %410, %409 : vector<16x128xf32>
    %412 = arith.divf %410, %411 : vector<16x128xf32>
    %413 = arith.mulf %404, %382 : vector<16x128xf32>
    %414 = arith.mulf %398, %406 : vector<16x128xf32>
    %415 = arith.addf %413, %414 : vector<16x128xf32>
    %416 = math.tanh %415 : vector<16x128xf32>
    %417 = arith.mulf %412, %416 : vector<16x128xf32>
    %c3_i32_133 = arith.constant 3 : i32
    %c16_i32_134 = arith.constant 16 : i32
    %418 = arith.muli %c3_i32_133, %c16_i32_134 : i32
    %419 = tpu.assume_multiple %418, 16 : i32
    %420 = arith.index_cast %419 : i32 to index
    %c0_135 = arith.constant 0 : index
    %421 = vector.load %arg11[%420, %c0_135] : memref<128x512xf32, #tpu.memory_space<vmem>>, vector<16x512xf32>
    %422 = arith.truncf %417 : vector<16x128xf32> to vector<16x128xbf16>
    %c0_136 = arith.constant 0 : index
    %c0_137 = arith.constant 0 : index
    %423 = vector.load %arg6[%c0_136, %c0_137] : memref<128x512xbf16, #tpu.memory_space<vmem>>, vector<128x512xbf16>
    %cst_138 = arith.constant dense<0.000000e+00> : vector<16x512xf32>
    %424 = tpu.matmul %422, %423, %cst_138 {dimension_numbers = #tpu.dot_dimension_numbers<[1], [0], [0], [1], [0, 0, 1, 1], [], []>} : vector<16x128xbf16>, vector<128x512xbf16>, vector<16x512xf32> -> vector<16x512xf32>
    %425 = arith.addf %421, %424 : vector<16x512xf32>
    %426 = vector.extract_strided_slice %425 {offsets = [0, 0], sizes = [16, 128], strides = [1, 1]} : vector<16x512xf32> to vector<16x128xf32>
    %427 = arith.negf %426 : vector<16x128xf32>
    %428 = math.exp %427 : vector<16x128xf32>
    %cst_139 = arith.constant 1.000000e+00 : f32
    %429 = vector.broadcast %cst_139 : f32 to vector<16x128xf32>
    %430 = arith.addf %429, %428 : vector<16x128xf32>
    %431 = arith.divf %429, %430 : vector<16x128xf32>
    %432 = vector.extract_strided_slice %425 {offsets = [0, 128], sizes = [16, 128], strides = [1, 1]} : vector<16x512xf32> to vector<16x128xf32>
    %433 = arith.negf %432 : vector<16x128xf32>
    %434 = math.exp %433 : vector<16x128xf32>
    %cst_140 = arith.constant 1.000000e+00 : f32
    %435 = vector.broadcast %cst_140 : f32 to vector<16x128xf32>
    %436 = arith.addf %435, %434 : vector<16x128xf32>
    %437 = arith.divf %435, %436 : vector<16x128xf32>
    %438 = vector.extract_strided_slice %425 {offsets = [0, 256], sizes = [16, 128], strides = [1, 1]} : vector<16x512xf32> to vector<16x128xf32>
    %439 = math.tanh %438 : vector<16x128xf32>
    %440 = vector.extract_strided_slice %425 {offsets = [0, 384], sizes = [16, 128], strides = [1, 1]} : vector<16x512xf32> to vector<16x128xf32>
    %441 = arith.negf %440 : vector<16x128xf32>
    %442 = math.exp %441 : vector<16x128xf32>
    %cst_141 = arith.constant 1.000000e+00 : f32
    %443 = vector.broadcast %cst_141 : f32 to vector<16x128xf32>
    %444 = arith.addf %443, %442 : vector<16x128xf32>
    %445 = arith.divf %443, %444 : vector<16x128xf32>
    %446 = arith.mulf %437, %415 : vector<16x128xf32>
    %447 = arith.mulf %431, %439 : vector<16x128xf32>
    %448 = arith.addf %446, %447 : vector<16x128xf32>
    %449 = math.tanh %448 : vector<16x128xf32>
    %450 = arith.mulf %445, %449 : vector<16x128xf32>
    %c4_i32_142 = arith.constant 4 : i32
    %c16_i32_143 = arith.constant 16 : i32
    %451 = arith.muli %c4_i32_142, %c16_i32_143 : i32
    %452 = tpu.assume_multiple %451, 16 : i32
    %453 = arith.index_cast %452 : i32 to index
    %c0_144 = arith.constant 0 : index
    %454 = vector.load %arg11[%453, %c0_144] : memref<128x512xf32, #tpu.memory_space<vmem>>, vector<16x512xf32>
    %455 = arith.truncf %450 : vector<16x128xf32> to vector<16x128xbf16>
    %c0_145 = arith.constant 0 : index
    %c0_146 = arith.constant 0 : index
    %456 = vector.load %arg6[%c0_145, %c0_146] : memref<128x512xbf16, #tpu.memory_space<vmem>>, vector<128x512xbf16>
    %cst_147 = arith.constant dense<0.000000e+00> : vector<16x512xf32>
    %457 = tpu.matmul %455, %456, %cst_147 {dimension_numbers = #tpu.dot_dimension_numbers<[1], [0], [0], [1], [0, 0, 1, 1], [], []>} : vector<16x128xbf16>, vector<128x512xbf16>, vector<16x512xf32> -> vector<16x512xf32>
    %458 = arith.addf %454, %457 : vector<16x512xf32>
    %459 = vector.extract_strided_slice %458 {offsets = [0, 0], sizes = [16, 128], strides = [1, 1]} : vector<16x512xf32> to vector<16x128xf32>
    %460 = arith.negf %459 : vector<16x128xf32>
    %461 = math.exp %460 : vector<16x128xf32>
    %cst_148 = arith.constant 1.000000e+00 : f32
    %462 = vector.broadcast %cst_148 : f32 to vector<16x128xf32>
    %463 = arith.addf %462, %461 : vector<16x128xf32>
    %464 = arith.divf %462, %463 : vector<16x128xf32>
    %465 = vector.extract_strided_slice %458 {offsets = [0, 128], sizes = [16, 128], strides = [1, 1]} : vector<16x512xf32> to vector<16x128xf32>
    %466 = arith.negf %465 : vector<16x128xf32>
    %467 = math.exp %466 : vector<16x128xf32>
    %cst_149 = arith.constant 1.000000e+00 : f32
    %468 = vector.broadcast %cst_149 : f32 to vector<16x128xf32>
    %469 = arith.addf %468, %467 : vector<16x128xf32>
    %470 = arith.divf %468, %469 : vector<16x128xf32>
    %471 = vector.extract_strided_slice %458 {offsets = [0, 256], sizes = [16, 128], strides = [1, 1]} : vector<16x512xf32> to vector<16x128xf32>
    %472 = math.tanh %471 : vector<16x128xf32>
    %473 = vector.extract_strided_slice %458 {offsets = [0, 384], sizes = [16, 128], strides = [1, 1]} : vector<16x512xf32> to vector<16x128xf32>
    %474 = arith.negf %473 : vector<16x128xf32>
    %475 = math.exp %474 : vector<16x128xf32>
    %cst_150 = arith.constant 1.000000e+00 : f32
    %476 = vector.broadcast %cst_150 : f32 to vector<16x128xf32>
    %477 = arith.addf %476, %475 : vector<16x128xf32>
    %478 = arith.divf %476, %477 : vector<16x128xf32>
    %479 = arith.mulf %470, %448 : vector<16x128xf32>
    %480 = arith.mulf %464, %472 : vector<16x128xf32>
    %481 = arith.addf %479, %480 : vector<16x128xf32>
    %482 = math.tanh %481 : vector<16x128xf32>
    %483 = arith.mulf %478, %482 : vector<16x128xf32>
    %c5_i32_151 = arith.constant 5 : i32
    %c16_i32_152 = arith.constant 16 : i32
    %484 = arith.muli %c5_i32_151, %c16_i32_152 : i32
    %485 = tpu.assume_multiple %484, 16 : i32
    %486 = arith.index_cast %485 : i32 to index
    %c0_153 = arith.constant 0 : index
    %487 = vector.load %arg11[%486, %c0_153] : memref<128x512xf32, #tpu.memory_space<vmem>>, vector<16x512xf32>
    %488 = arith.truncf %483 : vector<16x128xf32> to vector<16x128xbf16>
    %c0_154 = arith.constant 0 : index
    %c0_155 = arith.constant 0 : index
    %489 = vector.load %arg6[%c0_154, %c0_155] : memref<128x512xbf16, #tpu.memory_space<vmem>>, vector<128x512xbf16>
    %cst_156 = arith.constant dense<0.000000e+00> : vector<16x512xf32>
    %490 = tpu.matmul %488, %489, %cst_156 {dimension_numbers = #tpu.dot_dimension_numbers<[1], [0], [0], [1], [0, 0, 1, 1], [], []>} : vector<16x128xbf16>, vector<128x512xbf16>, vector<16x512xf32> -> vector<16x512xf32>
    %491 = arith.addf %487, %490 : vector<16x512xf32>
    %492 = vector.extract_strided_slice %491 {offsets = [0, 0], sizes = [16, 128], strides = [1, 1]} : vector<16x512xf32> to vector<16x128xf32>
    %493 = arith.negf %492 : vector<16x128xf32>
    %494 = math.exp %493 : vector<16x128xf32>
    %cst_157 = arith.constant 1.000000e+00 : f32
    %495 = vector.broadcast %cst_157 : f32 to vector<16x128xf32>
    %496 = arith.addf %495, %494 : vector<16x128xf32>
    %497 = arith.divf %495, %496 : vector<16x128xf32>
    %498 = vector.extract_strided_slice %491 {offsets = [0, 128], sizes = [16, 128], strides = [1, 1]} : vector<16x512xf32> to vector<16x128xf32>
    %499 = arith.negf %498 : vector<16x128xf32>
    %500 = math.exp %499 : vector<16x128xf32>
    %cst_158 = arith.constant 1.000000e+00 : f32
    %501 = vector.broadcast %cst_158 : f32 to vector<16x128xf32>
    %502 = arith.addf %501, %500 : vector<16x128xf32>
    %503 = arith.divf %501, %502 : vector<16x128xf32>
    %504 = vector.extract_strided_slice %491 {offsets = [0, 256], sizes = [16, 128], strides = [1, 1]} : vector<16x512xf32> to vector<16x128xf32>
    %505 = math.tanh %504 : vector<16x128xf32>
    %506 = vector.extract_strided_slice %491 {offsets = [0, 384], sizes = [16, 128], strides = [1, 1]} : vector<16x512xf32> to vector<16x128xf32>
    %507 = arith.negf %506 : vector<16x128xf32>
    %508 = math.exp %507 : vector<16x128xf32>
    %cst_159 = arith.constant 1.000000e+00 : f32
    %509 = vector.broadcast %cst_159 : f32 to vector<16x128xf32>
    %510 = arith.addf %509, %508 : vector<16x128xf32>
    %511 = arith.divf %509, %510 : vector<16x128xf32>
    %512 = arith.mulf %503, %481 : vector<16x128xf32>
    %513 = arith.mulf %497, %505 : vector<16x128xf32>
    %514 = arith.addf %512, %513 : vector<16x128xf32>
    %515 = math.tanh %514 : vector<16x128xf32>
    %516 = arith.mulf %511, %515 : vector<16x128xf32>
    %c6_i32_160 = arith.constant 6 : i32
    %c16_i32_161 = arith.constant 16 : i32
    %517 = arith.muli %c6_i32_160, %c16_i32_161 : i32
    %518 = tpu.assume_multiple %517, 16 : i32
    %519 = arith.index_cast %518 : i32 to index
    %c0_162 = arith.constant 0 : index
    %520 = vector.load %arg11[%519, %c0_162] : memref<128x512xf32, #tpu.memory_space<vmem>>, vector<16x512xf32>
    %521 = arith.truncf %516 : vector<16x128xf32> to vector<16x128xbf16>
    %c0_163 = arith.constant 0 : index
    %c0_164 = arith.constant 0 : index
    %522 = vector.load %arg6[%c0_163, %c0_164] : memref<128x512xbf16, #tpu.memory_space<vmem>>, vector<128x512xbf16>
    %cst_165 = arith.constant dense<0.000000e+00> : vector<16x512xf32>
    %523 = tpu.matmul %521, %522, %cst_165 {dimension_numbers = #tpu.dot_dimension_numbers<[1], [0], [0], [1], [0, 0, 1, 1], [], []>} : vector<16x128xbf16>, vector<128x512xbf16>, vector<16x512xf32> -> vector<16x512xf32>
    %524 = arith.addf %520, %523 : vector<16x512xf32>
    %525 = vector.extract_strided_slice %524 {offsets = [0, 0], sizes = [16, 128], strides = [1, 1]} : vector<16x512xf32> to vector<16x128xf32>
    %526 = arith.negf %525 : vector<16x128xf32>
    %527 = math.exp %526 : vector<16x128xf32>
    %cst_166 = arith.constant 1.000000e+00 : f32
    %528 = vector.broadcast %cst_166 : f32 to vector<16x128xf32>
    %529 = arith.addf %528, %527 : vector<16x128xf32>
    %530 = arith.divf %528, %529 : vector<16x128xf32>
    %531 = vector.extract_strided_slice %524 {offsets = [0, 128], sizes = [16, 128], strides = [1, 1]} : vector<16x512xf32> to vector<16x128xf32>
    %532 = arith.negf %531 : vector<16x128xf32>
    %533 = math.exp %532 : vector<16x128xf32>
    %cst_167 = arith.constant 1.000000e+00 : f32
    %534 = vector.broadcast %cst_167 : f32 to vector<16x128xf32>
    %535 = arith.addf %534, %533 : vector<16x128xf32>
    %536 = arith.divf %534, %535 : vector<16x128xf32>
    %537 = vector.extract_strided_slice %524 {offsets = [0, 256], sizes = [16, 128], strides = [1, 1]} : vector<16x512xf32> to vector<16x128xf32>
    %538 = math.tanh %537 : vector<16x128xf32>
    %539 = vector.extract_strided_slice %524 {offsets = [0, 384], sizes = [16, 128], strides = [1, 1]} : vector<16x512xf32> to vector<16x128xf32>
    %540 = arith.negf %539 : vector<16x128xf32>
    %541 = math.exp %540 : vector<16x128xf32>
    %cst_168 = arith.constant 1.000000e+00 : f32
    %542 = vector.broadcast %cst_168 : f32 to vector<16x128xf32>
    %543 = arith.addf %542, %541 : vector<16x128xf32>
    %544 = arith.divf %542, %543 : vector<16x128xf32>
    %545 = arith.mulf %536, %514 : vector<16x128xf32>
    %546 = arith.mulf %530, %538 : vector<16x128xf32>
    %547 = arith.addf %545, %546 : vector<16x128xf32>
    %548 = math.tanh %547 : vector<16x128xf32>
    %549 = arith.mulf %544, %548 : vector<16x128xf32>
    %c7_i32_169 = arith.constant 7 : i32
    %c16_i32_170 = arith.constant 16 : i32
    %550 = arith.muli %c7_i32_169, %c16_i32_170 : i32
    %551 = tpu.assume_multiple %550, 16 : i32
    %552 = arith.index_cast %551 : i32 to index
    %c0_171 = arith.constant 0 : index
    %553 = vector.load %arg11[%552, %c0_171] : memref<128x512xf32, #tpu.memory_space<vmem>>, vector<16x512xf32>
    %554 = arith.truncf %549 : vector<16x128xf32> to vector<16x128xbf16>
    %c0_172 = arith.constant 0 : index
    %c0_173 = arith.constant 0 : index
    %555 = vector.load %arg6[%c0_172, %c0_173] : memref<128x512xbf16, #tpu.memory_space<vmem>>, vector<128x512xbf16>
    %cst_174 = arith.constant dense<0.000000e+00> : vector<16x512xf32>
    %556 = tpu.matmul %554, %555, %cst_174 {dimension_numbers = #tpu.dot_dimension_numbers<[1], [0], [0], [1], [0, 0, 1, 1], [], []>} : vector<16x128xbf16>, vector<128x512xbf16>, vector<16x512xf32> -> vector<16x512xf32>
    %557 = arith.addf %553, %556 : vector<16x512xf32>
    %558 = vector.extract_strided_slice %557 {offsets = [0, 0], sizes = [16, 128], strides = [1, 1]} : vector<16x512xf32> to vector<16x128xf32>
    %559 = arith.negf %558 : vector<16x128xf32>
    %560 = math.exp %559 : vector<16x128xf32>
    %cst_175 = arith.constant 1.000000e+00 : f32
    %561 = vector.broadcast %cst_175 : f32 to vector<16x128xf32>
    %562 = arith.addf %561, %560 : vector<16x128xf32>
    %563 = arith.divf %561, %562 : vector<16x128xf32>
    %564 = vector.extract_strided_slice %557 {offsets = [0, 128], sizes = [16, 128], strides = [1, 1]} : vector<16x512xf32> to vector<16x128xf32>
    %565 = arith.negf %564 : vector<16x128xf32>
    %566 = math.exp %565 : vector<16x128xf32>
    %cst_176 = arith.constant 1.000000e+00 : f32
    %567 = vector.broadcast %cst_176 : f32 to vector<16x128xf32>
    %568 = arith.addf %567, %566 : vector<16x128xf32>
    %569 = arith.divf %567, %568 : vector<16x128xf32>
    %570 = vector.extract_strided_slice %557 {offsets = [0, 256], sizes = [16, 128], strides = [1, 1]} : vector<16x512xf32> to vector<16x128xf32>
    %571 = math.tanh %570 : vector<16x128xf32>
    %572 = vector.extract_strided_slice %557 {offsets = [0, 384], sizes = [16, 128], strides = [1, 1]} : vector<16x512xf32> to vector<16x128xf32>
    %573 = arith.negf %572 : vector<16x128xf32>
    %574 = math.exp %573 : vector<16x128xf32>
    %cst_177 = arith.constant 1.000000e+00 : f32
    %575 = vector.broadcast %cst_177 : f32 to vector<16x128xf32>
    %576 = arith.addf %575, %574 : vector<16x128xf32>
    %577 = arith.divf %575, %576 : vector<16x128xf32>
    %578 = arith.mulf %569, %547 : vector<16x128xf32>
    %579 = arith.mulf %563, %571 : vector<16x128xf32>
    %580 = arith.addf %578, %579 : vector<16x128xf32>
    %581 = math.tanh %580 : vector<16x128xf32>
    %582 = arith.mulf %577, %581 : vector<16x128xf32>
    %c8_i32_178 = arith.constant 8 : i32
    %c1_179 = arith.constant 1 : index
    %c0_180 = arith.constant 0 : index
    %c0_181 = arith.constant 0 : index
    %583 = vector.load %arg13[%c1_179, %c0_180, %c0_181] : memref<2x16x128xf32, #tpu.memory_space<vmem>>, vector<1x16x128xf32>
    %584 = vector.shape_cast %583 : vector<1x16x128xf32> to vector<16x128xf32>
    %585 = vector.shape_cast %582 : vector<16x128xf32> to vector<1x16x128xf32>
    tpu.vector_store %arg13[%c1_179, %c0_180, %c0_181], %585 {strides = array<i32>} : memref<2x16x128xf32, #tpu.memory_space<vmem>>, vector<1x16x128xf32>,
    %c1_182 = arith.constant 1 : index
    %c0_183 = arith.constant 0 : index
    %c0_184 = arith.constant 0 : index
    %586 = vector.load %arg14[%c1_182, %c0_183, %c0_184] : memref<2x16x128xf32, #tpu.memory_space<vmem>>, vector<1x16x128xf32>
    %587 = vector.shape_cast %586 : vector<1x16x128xf32> to vector<16x128xf32>
    %588 = vector.shape_cast %580 : vector<16x128xf32> to vector<1x16x128xf32>
    tpu.vector_store %arg14[%c1_182, %c0_183, %c0_184], %588 {strides = array<i32>} : memref<2x16x128xf32, #tpu.memory_space<vmem>>, vector<1x16x128xf32>,
    %c0_i32_185 = arith.constant 0 : i32
    %589 = arith.cmpi eq, %arg0, %c0_i32_185 : i32
    %590 = arith.extui %589 : i1 to i32
    %c0_i32_186 = arith.constant 0 : i32
    %591 = arith.cmpi ne, %590, %c0_i32_186 : i32
    scf.if %591 {
      %c0_187 = arith.constant 0 : index
      %c0_188 = arith.constant 0 : index
      %592 = vector.load %arg8[%c0_187, %c0_188] : memref<128x128xf32, #tpu.memory_space<vmem>>, vector<128x128xf32>
      %cst_189 = arith.constant dense<0.000000e+00> : vector<16x128xf32>
      %593 = tpu.matmul %582, %592, %cst_189 {dimension_numbers = #tpu.dot_dimension_numbers<[1], [0], [0], [1], [0, 0, 1, 1], [], []>} : vector<16x128xf32>, vector<128x128xf32>, vector<16x128xf32> -> vector<16x128xf32>
      %c0_190 = arith.constant 0 : index
      %c0_191 = arith.constant 0 : index
      %594 = vector.load %arg9[%c0_190, %c0_191] : memref<1x128xf32, #tpu.memory_space<vmem>>, vector<1x128xf32>
      %595 = vector.broadcast %594 : vector<1x128xf32> to vector<16x128xf32>
      %596 = arith.addf %593, %595 : vector<16x128xf32>
      %597 = arith.negf %596 : vector<16x128xf32>
      %598 = math.exp %597 : vector<16x128xf32>
      %cst_192 = arith.constant 1.000000e+00 : f32
      %599 = vector.broadcast %cst_192 : f32 to vector<16x128xf32>
      %600 = arith.addf %599, %598 : vector<16x128xf32>
      %601 = arith.divf %599, %600 : vector<16x128xf32>
      %c0_193 = arith.constant 0 : index
      %c0_194 = arith.constant 0 : index
      %602 = vector.load %arg10[%c0_193, %c0_194] : memref<16x128xf32, #tpu.memory_space<vmem>>, vector<16x128xf32>
      tpu.vector_store %arg10[%c0_193, %c0_194], %601 {strides = array<i32>} : memref<16x128xf32, #tpu.memory_space<vmem>>, vector<16x128xf32>,
    } else {
    }
    return
  }
  func.func @transform_0(%arg0: i32) -> (i32, i32) {
    %c0_i32 = arith.constant 0 : i32
    %c0_i32_0 = arith.constant 0 : i32
    return %arg0, %c0_i32 : i32, i32
  }
  func.func @transform_1(%arg0: i32) -> (i32, i32) {
    %c0_i32 = arith.constant 0 : i32
    %c0_i32_0 = arith.constant 0 : i32
    %c0_i32_1 = arith.constant 0 : i32
    return %c0_i32, %c0_i32_0 : i32, i32
  }
  func.func @transform_2(%arg0: i32) -> (i32, i32) {
    %c0_i32 = arith.constant 0 : i32
    %c0_i32_0 = arith.constant 0 : i32
    %c0_i32_1 = arith.constant 0 : i32
    return %c0_i32, %c0_i32_0 : i32, i32
  }
  func.func @transform_3(%arg0: i32) -> (i32, i32) {
    %c0_i32 = arith.constant 0 : i32
    %c0_i32_0 = arith.constant 0 : i32
    %c0_i32_1 = arith.constant 0 : i32
    return %c0_i32, %c0_i32_0 : i32, i32
  }
  func.func @transform_4(%arg0: i32) -> (i32, i32) {
    %c0_i32 = arith.constant 0 : i32
    %c0_i32_0 = arith.constant 0 : i32
    %c0_i32_1 = arith.constant 0 : i32
    return %c0_i32, %c0_i32_0 : i32, i32
  }
  func.func @transform_5(%arg0: i32) -> (i32, i32) {
    %c0_i32 = arith.constant 0 : i32
    %c0_i32_0 = arith.constant 0 : i32
    %c0_i32_1 = arith.constant 0 : i32
    return %c0_i32, %c0_i32_0 : i32, i32
  }
  func.func @transform_6(%arg0: i32) -> (i32, i32) {
    %c0_i32 = arith.constant 0 : i32
    %c0_i32_0 = arith.constant 0 : i32
    %c0_i32_1 = arith.constant 0 : i32
    return %c0_i32, %c0_i32_0 : i32, i32
  }
  func.func @transform_7(%arg0: i32) -> (i32, i32) {
    %c0_i32 = arith.constant 0 : i32
    %c0_i32_0 = arith.constant 0 : i32
    %c0_i32_1 = arith.constant 0 : i32
    return %c0_i32, %c0_i32_0 : i32, i32
  }
  func.func @transform_8(%arg0: i32) -> (i32, i32) {
    %c0_i32 = arith.constant 0 : i32
    %c0_i32_0 = arith.constant 0 : i32
    %c0_i32_1 = arith.constant 0 : i32
    return %c0_i32, %c0_i32_0 : i32, i32
  }
  func.func @transform_9(%arg0: i32) -> (i32, i32) {
    %c0_i32 = arith.constant 0 : i32
    %c0_i32_0 = arith.constant 0 : i32
    %c0_i32_1 = arith.constant 0 : i32
    return %c0_i32, %c0_i32_0 : i32, i32
  }
}

</mosaic_0001>

<bundles_post_ra>
// kernel: tpu_custom_call.1
= control target key start
LH: loop header
LB: loop body
LE: loop exit
PB: predicated region body
PF: predicated region fallthrough
CT: control target
= control target key end

     0   :  { %vm25_vm0 = vcmask 1041408   ;;  %v128_v1 = vmov 0.0   ;;  %vm129_vm1 = vmmov 0   ;;  %vm21_vm2 = vcmask 31744   ;;  %s166_s0 = inlined_call_operand.vmem [shape: bf16[16,4], index: 0, kind: input, shape index: {}]   ;;  %s167_s1 = inlined_call_operand.vmem [shape: bf16[4,128], index: 1, kind: input, shape index: {}]   ;;  %s168_s2 = inlined_call_operand.hbm [shape: f32[16,128], index: 2, kind: output, shape index: {}]  }
   0x1   :  { %v15_v0 = vld [vmem:[%s167_s1] sm:$0x3]  ;;  %92 = vmatprep.subr.bf16.mxu0 %v128_v1  ;;  %94 = vmatprep.mubr.msk.bf16.mxu0 %vm129_vm1, %v128_v1 }
   0x2   :  { %v27_v2 = vsel %vm25_vm0, %v15_v0, 0  ;;  %v103_v3 = vld [vmem:[%s166_s0] sm:$0xff]  }
   0x3   :  { %93 = vmatpush3.bf16.msra.mxu0 %v27_v2 }
   0x4   :  { %7 = vsyncpa [#allocation3], 0  ;;  %s130_s13 = smov [#allocation2]  }
   0x5   :  { %s77_s14 = sshll.u32 %s130_s13, 4  ;;  %s78_s14 = int_to_ptr.vmem [resolvable:$true] %s77_s14 }
   0x6   :  { %95 = vmatmul.mubr.msk.bf16.vlgmr.msra.gmra.mrb[0].mxu0 %vm21_vm2, %v103_v3  ;;  %s104_s1 = scalar_lea.vmem %s78_s14, 256  ;;  %p109_p1 = scmp.lt.s32.totalorder %s78_s14, %s78_s14 }
   0x7   :  { %p105_p0 = scmp.ne.s32.totalorder %s78_s14, %s104_s1  ;;  %p110_p2 = scmp.lt.s32.totalorder %s104_s1, %s104_s1 }
   0x9   :  { %p111_p3 = por %p110_p2, %p109_p1 }
   0xb   :  { %p112_p4 = pnand %p111_p3, %p105_p0 }
  0xd9   :  { %v63_v4 = vpop.f32.mrb[0].mxu0 }
  0xda   :  { %70 = vst [vmem:[#allocation2] sm:$0xff] %v63_v4  ;;  %v96_v5 = vpop.f32.mrb[1].mxu0 }
  0xdb   :  { %v66_v6 = vpop.f32.mrb[2].mxu0 }
  0xdc   :  { %71 = vst [vmem:[#allocation2 + $0x8] sm:$0xff] %v66_v6  ;;  %v97_v7 = vpop.f32.mrb[3].mxu0 }
  0xdd   :  { %115 = shalt.err (!%p112_p4)
}
  0xde   :  { %s116_s16 = scalar_lea.hbm %s168_s2, 256 }
  0xdf   :  { %p117_p5 = scmp.ne.s32.totalorder %s168_s2, %s116_s16  ;;  %p120_p6 = scmp.lt.u32.totalorder %s116_s16, %s168_s2 }
  0xe1   :  { %p122_p7 = pnand %p120_p6, %p117_p5 }
  0xe3   :  { %125 = shalt.err (!%p122_p7)
}
  0xe4   :  { %s131_s21 = smov 128   ;;  %s132_s22 = smov 8  }
  0xe5   :  { %83 = dma.vmem_to_hbm [thread:$0]  %s78_s14, 256, %s168_s2, [#allocation3], %s131_s21, %s131_s21, %s132_s22  }
  0xe6   :  { %126 = dma.done.wait [#allocation3], 256  }
  0xe7   :  { %127 = vsyncadd [#allocation3], 4294967040 }
  0xe8   :  { %87 = vsyncpa [#allocation3], 1 }

// kernel: tpu_custom_call.1
= control target key start
LH: loop header
LB: loop body
LE: loop exit
PB: predicated region body
PF: predicated region fallthrough
CT: control target
= control target key end

     0   :  { %6 = vsyncpa [#allocation3], 0  ;;  %s341_s0 = inlined_call_operand.hbm [shape: f32[8,128], index: 0, kind: input, shape index: {}]   ;;  %s342_s1 = inlined_call_operand.hbm [shape: f32[8,128], index: 1, kind: output, shape index: {}]  }
   0x1   :  { %7 = vsyncpa [#allocation4], 0  ;;  %s262_s6 = smov 0  }
   0x2 LB: > { %s145_s7 = sadd.s32 4294967295, %s248_s6   ;;  %p146_p0 = scmp.ge.s32.totalorder %s248_s6, 1  ;;  %s248_s6 = sphi %s262_s6, %s13_s6  }
   0x3   : > { %p60_p1 = scmp.lt.s32.totalorder %s248_s6, 3  ;;  %p276_p3 = scmp.eq.s32.totalorder %s145_s7, 0 }
   0x4   : > { %s250_s10 = smov [#allocation2]   ;;  %s180_s15 = scalar_lea.hbm %s341_s0, 128 }
   0x5   : > { %p270_p2 = pnand %p146_p0, %p60_p1  ;;  %s73_s11 = sshll.u32 %s250_s10, 4  ;;  %s74_s11 = int_to_ptr.vmem [resolvable:$true] %s73_s11 }
   0x6   : > { %s347_s9 = scalar_select %p276_p3, 1, 0 }
   0x7   : > { %s346_s8 = scalar_select %p270_p2, 1, 0 }
   0x8   : > { %p162_p4 = pneg %p270_p2  ;;  %p181_p6 = scmp.ne.s32.totalorder %s341_s0, %s180_s15 }
   0x9   : > { %p187_p10 = scmp.lt.u32.totalorder %s180_s15, %s341_s0 }
   0xa   : > { %p284_p5 = pnand %p276_p3, %p162_p4 }
   0xc   : > { %p182_p7 = pneg %p284_p5 }
   0xe   : > { %p183_p8 = pnand %p182_p7, %p181_p6 }
  0x10   : > { %p184_p9 = pneg %p183_p8 }
  0x12   : > { %p189_p11 = pnand %p187_p10, %p184_p9 }
  0x14   : > { %192 = shalt.err (!%p189_p11)
}
  0x15   : > { %s193_s20 = scalar_lea.vmem %s74_s11, 128  ;;  %p201_p1 = scmp.lt.s32.totalorder %s74_s11, %s74_s11 }
  0x16   : > { %p194_p12 = scmp.ne.s32.totalorder %s74_s11, %s193_s20  ;;  %p202_p4 = scmp.lt.s32.totalorder %s193_s20, %s193_s20 }
  0x18   : > { %p196_p13 = pnand %p194_p12, %p182_p7  ;;  %p203_p3 = por %p202_p4, %p201_p1 }
  0x1a   : > { %p197_p0 = pneg %p196_p13 }
  0x1c   : > { %p204_p2 = pnand %p203_p3, %p197_p0 }
  0x1e   : > { %207 = shalt.err (!%p204_p2)
}
  0x1f   : > { %165 = dma.hbm_to_vmem [thread:$0]  (!%p284_p5), %s341_s0, 128, %s74_s11, [#allocation3]  }
  0x20   : > { %p349_p6 = scmp.ne.s32.totalorder %s346_s8, 0 }
  0x21   : > { %p350_p8 = scmp.ne.s32.totalorder (!%p349_p6), %s347_s9, 0 }
  0x22   : > { %86 = sbr.rel (%p349_p6) target bundleno = 67 (0x43), region = 24 }
  0x29   : > { %239 = dma.done.wait (%p350_p8), [#allocation3], 128  }
  0x2a   : > { %241 = vsyncadd (%p350_p8), [#allocation3], 4294967168  ;;  %s251_s23 = smov [#allocation5]   ;;  %v96_v0 = vld [vmem:[#allocation2] sm:$0xff]  ;;  %p312_p2 = scmp.eq.s32.totalorder %s145_s7, 1 }
  0x2b   : > { %s106_s24 = sshll.u32 %s251_s23, 4  ;;  %v97_v1 = vmul.f32 2.0, %v96_v0  ;;  %s107_s24 = int_to_ptr.vmem [resolvable:$true] %s106_s24 }
  0x2c   : > { %s208_s26 = scalar_lea.vmem %s107_s24, 128  ;;  %p215_p9 = scmp.lt.s32.totalorder %s107_s24, %s107_s24 }
  0x2d   : > { %98 = vst [vmem:[#allocation5] sm:$0xff] %v97_v1  ;;  %p209_p3 = scmp.ne.s32.totalorder %s107_s24, %s208_s26  ;;  %p216_p10 = scmp.lt.s32.totalorder %s208_s26, %s208_s26 }
  0x2f   : > { %p210_p5 = pnand %p209_p3, %p312_p2  ;;  %p217_p11 = por %p216_p10, %p215_p9 }
  0x31   : > { %p211_p7 = pneg %p210_p5 }
  0x33   : > { %p218_p12 = pnand %p217_p11, %p211_p7 }
  0x35   : > { %221 = shalt.err (!%p218_p12)
}
  0x36   : > { %s222_s29 = scalar_lea.hbm %s342_s1, 128 }
  0x37   : > { %p223_p13 = scmp.ne.s32.totalorder %s342_s1, %s222_s29  ;;  %p228_p4 = scmp.lt.u32.totalorder %s222_s29, %s342_s1 }
  0x39   : > { %p224_p0 = pnand %p223_p13, %p312_p2 }
  0x3b   : > { %p225_p1 = pneg %p224_p0 }
  0x3d   : > { %p230_p6 = pnand %p228_p4, %p225_p1 }
  0x3f   : > { %233 = shalt.err (!%p230_p6)
}
  0x40   : > { %159 = dma.vmem_to_hbm [thread:$0]  (%p312_p2), %s107_s24, 128, %s342_s1, [#allocation4]  }
  0x41   : > { %243 = dma.done.wait (%p312_p2), [#allocation4], 128  }
  0x42   : > { %245 = vsyncadd (%p312_p2), [#allocation4], 4294967168 }
  0x43 PF: > { %s13_s6 = sadd.s32 1, %s248_s6  }
  0x44   : > { %p10_p8 = scmp.ge.s32.totalorder %s13_s6, 4  }
  0x46   :  { %12 = sbr.rel (!%p10_p8) target bundleno = 2 (0x2), region = 53 }
  0x4d   :  { %119 = vsyncpa [#allocation3], 1 }
  0x4e   :  { %121 = vsyncpa [#allocation3 + $0x1], 1 }
  0x4f   :  { %122 = vsyncpa [#allocation4], 1 }
  0x50   :  { %124 = vsyncpa [#allocation4 + $0x1], 1 }

// kernel: tpu_custom_call.1
= control target key start
LH: loop header
LB: loop body
LE: loop exit
PB: predicated region body
PF: predicated region fallthrough
CT: control target
= control target key end

     0   :  { %14 = vsyncpa [#allocation7], 0  ;;  %s8665_s0 = inlined_call_operand.hbm [shape: bf16[128,128], index: 0, kind: input, shape index: {}]   ;;  %s8666_s1 = inlined_call_operand.hbm [shape: bf16[128,512], index: 1, kind: input, shape index: {}]   ;;  %s8667_s2 = inlined_call_operand.hbm [shape: bf16[128,512], index: 2, kind: input, shape index: {}]   ;;  %s8668_s3 = inlined_call_operand.vmem [shape: f32[1,512], index: 3, kind: input, shape index: {}]   ;;  %s8669_s4 = inlined_call_operand.hbm [shape: bf16[128,512], index: 4, kind: input, shape index: {}]   ;;  %s8670_s5 = inlined_call_operand.hbm [shape: bf16[128,512], index: 5, kind: input, shape index: {}]   ;;  %s8671_s6 = inlined_call_operand.vmem [shape: f32[1,512], index: 6, kind: input, shape index: {}]   ;;  %s8672_s7 = inlined_call_operand.hbm [shape: f32[128,128], index: 7, kind: input, shape index: {}]   ;;  %s8673_s8 = inlined_call_operand.vmem [shape: f32[1,128], index: 8, kind: input, shape index: {}]   ;;  %s8674_s9 = inlined_call_operand.hbm [shape: f32[16,128], index: 9, kind: output, shape index: {}]  }
   0x1   :  { %15 = vsyncpa [#allocation10], 0 }
   0x2   :  { %16 = vsyncpa [#allocation13], 0 }
   0x3   :  { %17 = vsyncpa [#allocation16], 0 }
   0x4   :  { %18 = vsyncpa [#allocation8], 0  ;;  %s7337_s30 = smov [#allocation9]   ;;  %s7173_s13 = scalar_lea.hbm %s8666_s1, 4096 }
   0x5   :  { %s36_s10 = sshll.u32 %s7337_s30, 4  ;;  %p7174_p0 = scmp.ne.s32.totalorder %s8666_s1, %s7173_s13  ;;  %s37_s10 = int_to_ptr.vmem [resolvable:$true] %s36_s10 }
   0x6   :  { %p7177_p1 = scmp.lt.u32.totalorder %s7173_s13, %s8666_s1 }
   0x8   :  { %p7179_p2 = pnand %p7177_p1, %p7174_p0 }
   0xa   :  { %7182 = shalt.err (!%p7179_p2)
}
   0xb   :  { %s7183_s18 = scalar_lea.vmem %s37_s10, 4096  ;;  %p7188_p4 = scmp.lt.s32.totalorder %s37_s10, %s37_s10 }
   0xc   :  { %p7184_p3 = scmp.ne.s32.totalorder %s37_s10, %s7183_s18  ;;  %p7189_p5 = scmp.lt.s32.totalorder %s7183_s18, %s7183_s18 }
   0xe   :  { %p7190_p6 = por %p7189_p5, %p7188_p4 }
  0x10   :  { %p7191_p7 = pnand %p7190_p6, %p7184_p3 }
  0x12   :  { %7194 = shalt.err (!%p7191_p7)
}
  0x13   :  { %s7338_s19 = smov 256   ;;  %s7339_s20 = smov 16  }
  0x14   :  { %42 = dma.hbm_to_vmem [thread:$0]  %s8666_s1, 4096, %s37_s10, [#allocation10], %s7338_s19, %s7338_s19, %s7339_s20  }
  0x15   :  { %s7340_s23 = smov [#allocation12]   ;;  %s7341_s25 = smov [#allocation6]  }
  0x16   :  { %s62_s24 = sshll.u32 %s7340_s23, 4  ;;  %s24_s26 = sshll.u32 %s7341_s25, 4  ;;  %s63_s24 = int_to_ptr.vmem [resolvable:$true] %s62_s24  ;;  %s25_s26 = int_to_ptr.vmem [resolvable:$true] %s24_s26 }
  0x17   :  { %s7195_s29 = scalar_lea.hbm %s8669_s4, 4096 }
  0x18   :  { %p7196_p8 = scmp.ne.s32.totalorder %s8669_s4, %s7195_s29  ;;  %p7199_p9 = scmp.lt.u32.totalorder %s7195_s29, %s8669_s4 }
  0x1a   :  { %p7201_p10 = pnand %p7199_p9, %p7196_p8 }
  0x1c   :  { %7204 = shalt.err (!%p7201_p10)
}
  0x1d   :  { %s7205_s1 = scalar_lea.vmem %s63_s24, 4096  ;;  %p7210_p12 = scmp.lt.s32.totalorder %s63_s24, %s63_s24 }
  0x1e   :  { %p7206_p11 = scmp.ne.s32.totalorder %s63_s24, %s7205_s1  ;;  %p7211_p13 = scmp.lt.s32.totalorder %s7205_s1, %s7205_s1 }
  0x20   :  { %p7212_p0 = por %p7211_p13, %p7210_p12 }
  0x22   :  { %p7213_p1 = pnand %p7212_p0, %p7206_p11 }
  0x24   :  { %7216 = shalt.err (!%p7213_p1)
}
  0x25   :  { %68 = dma.hbm_to_vmem [thread:$0]  %s8669_s4, 4096, %s63_s24, [#allocation13], %s7338_s19, %s7338_s19, %s7339_s20  }
  0x26   :  { %s7217_s17 = scalar_lea.hbm %s8665_s0, 1024 }
  0x27   :  { %p7218_p2 = scmp.ne.s32.totalorder %s8665_s0, %s7217_s17  ;;  %p7221_p3 = scmp.lt.u32.totalorder %s7217_s17, %s8665_s0 }
  0x29   :  { %p7223_p4 = pnand %p7221_p3, %p7218_p2 }
  0x2b   :  { %7226 = shalt.err (!%p7223_p4)
}
  0x2c   :  { %s7227_s25 = scalar_lea.vmem %s25_s26, 1024  ;;  %p7232_p6 = scmp.lt.s32.totalorder %s25_s26, %s25_s26 }
  0x2d   :  { %p7228_p5 = scmp.ne.s32.totalorder %s25_s26, %s7227_s25  ;;  %p7233_p7 = scmp.lt.s32.totalorder %s7227_s25, %s7227_s25 }
  0x2f   :  { %p7234_p8 = por %p7233_p7, %p7232_p6 }
  0x31   :  { %p7235_p9 = pnand %p7234_p8, %p7228_p5 }
  0x33   :  { %7238 = shalt.err (!%p7235_p9)
}
  0x34   :  { %s7342_s4 = smov 64   ;;  %s7343_s24 = smov 4  }
  0x35   :  { %30 = dma.hbm_to_vmem [thread:$0]  %s8665_s0, 1024, %s25_s26, [#allocation7], %s7342_s4, %s7342_s4, %s7343_s24  }
  0x36   :  { %s7344_s29 = smov [#allocation11]   ;;  %s7345_s11 = smov [#allocation14]  }
  0x37   :  { %s48_s30 = sshll.u32 %s7344_s29, 4  ;;  %s74_s12 = sshll.u32 %s7345_s11, 4  ;;  %s49_s30 = int_to_ptr.vmem [resolvable:$true] %s48_s30  ;;  %s75_s12 = int_to_ptr.vmem [resolvable:$true] %s74_s12 }
  0x38   :  { %s7239_s10 = scalar_lea.hbm %s8667_s2, 4096 }
  0x39   :  { %p7240_p10 = scmp.ne.s32.totalorder %s8667_s2, %s7239_s10  ;;  %p7243_p11 = scmp.lt.u32.totalorder %s7239_s10, %s8667_s2 }
  0x3b   :  { %p7245_p12 = pnand %p7243_p11, %p7240_p10 }
  0x3d   :  { %7248 = shalt.err (!%p7245_p12)
}
  0x3e   :  { %s7249_s0 = scalar_lea.vmem %s49_s30, 4096  ;;  %p7254_p0 = scmp.lt.s32.totalorder %s49_s30, %s49_s30 }
  0x3f   :  { %p7250_p13 = scmp.ne.s32.totalorder %s49_s30, %s7249_s0  ;;  %p7255_p1 = scmp.lt.s32.totalorder %s7249_s0, %s7249_s0 }
  0x41   :  { %p7256_p2 = por %p7255_p1, %p7254_p0 }
  0x43   :  { %p7257_p3 = pnand %p7256_p2, %p7250_p13 }
  0x45   :  { %7260 = shalt.err (!%p7257_p3)
}
  0x46   :  { %54 = dma.hbm_to_vmem [thread:$0]  %s8667_s2, 4096, %s49_s30, [#allocation10], %s7338_s19, %s7338_s19, %s7339_s20  }
  0x47   :  { %s7261_s23 = scalar_lea.hbm %s8670_s5, 4096 }
  0x48   :  { %p7262_p4 = scmp.ne.s32.totalorder %s8670_s5, %s7261_s23  ;;  %p7265_p5 = scmp.lt.u32.totalorder %s7261_s23, %s8670_s5 }
  0x4a   :  { %p7267_p6 = pnand %p7265_p5, %p7262_p4 }
  0x4c   :  { %7270 = shalt.err (!%p7267_p6)
}
  0x4d   :  { %s7271_s28 = scalar_lea.vmem %s75_s12, 4096  ;;  %p7276_p8 = scmp.lt.s32.totalorder %s75_s12, %s75_s12 }
  0x4e   :  { %p7272_p7 = scmp.ne.s32.totalorder %s75_s12, %s7271_s28  ;;  %p7277_p9 = scmp.lt.s32.totalorder %s7271_s28, %s7271_s28 }
  0x50   :  { %p7278_p10 = por %p7277_p9, %p7276_p8 }
  0x52   :  { %p7279_p11 = pnand %p7278_p10, %p7272_p7 }
  0x54   :  { %7282 = shalt.err (!%p7279_p11)
}
  0x55   :  { %80 = dma.hbm_to_vmem [thread:$0]  %s8670_s5, 4096, %s75_s12, [#allocation13], %s7338_s19, %s7338_s19, %s7339_s20  }
  0x56   :  { %s7346_s30 = smov [#allocation15]   ;;  %s7283_s10 = scalar_lea.hbm %s8672_s7, 2048 }
  0x57   :  { %s88_s11 = sshll.u32 %s7346_s30, 4  ;;  %p7284_p12 = scmp.ne.s32.totalorder %s8672_s7, %s7283_s10  ;;  %s89_s11 = int_to_ptr.vmem [resolvable:$true] %s88_s11 }
  0x58   :  { %p7287_p13 = scmp.lt.u32.totalorder %s7283_s10, %s8672_s7 }
  0x5a   :  { %p7289_p0 = pnand %p7287_p13, %p7284_p12 }
  0x5c   :  { %7292 = shalt.err (!%p7289_p0)
}
  0x5d   :  { %s7293_s0 = scalar_lea.vmem %s89_s11, 2048  ;;  %p7298_p2 = scmp.lt.s32.totalorder %s89_s11, %s89_s11 }
  0x5e   :  { %p7294_p1 = scmp.ne.s32.totalorder %s89_s11, %s7293_s0  ;;  %p7299_p3 = scmp.lt.s32.totalorder %s7293_s0, %s7293_s0 }
  0x60   :  { %p7300_p4 = por %p7299_p3, %p7298_p2 }
  0x62   :  { %p7301_p5 = pnand %p7300_p4, %p7294_p1 }
  0x64   :  { %7304 = shalt.err (!%p7301_p5)
}
  0x65   :  { %s7347_s5 = smov 128   ;;  %s7348_s19 = smov 8  }
  0x66   :  { %94 = dma.hbm_to_vmem [thread:$0]  %s8672_s7, 2048, %s89_s11, [#allocation16], %s7347_s5, %s7347_s5, %s7348_s19  }
  0x67   :  { %7327 = dma.done.wait [#allocation7], 1024  }
  0x68   :  { %7328 = vsyncadd [#allocation7], 4294966272 }
  0x69   :  { %7329 = dma.done.wait [#allocation10], 8192  }
  0x6a   :  { %7330 = vsyncadd [#allocation10], 4294959104 }
  0x6b   :  { %7331 = dma.done.wait [#allocation13], 8192  }
  0x6c   :  { %7332 = vsyncadd [#allocation13], 4294959104 }
  0x6d   :  { %7333 = dma.done.wait [#allocation16], 2048  }
  0x6e   :  { %7334 = vsyncadd [#allocation16], 4294965248  ;;  %v7349_v0 = vmov 0   ;;  %v6367_v1 = vld [vmem:[#allocation9 + $0x4] ss:$16 sps:$4 sm:$0xff]   ;;  %v6419_v43 = vld [vmem:[#allocation6 + $0x8] sm:$0xff]  }
  0x6f   :  { %438 = vmatprep.mubr.bf16.mxu0 %v7349_v0  ;;  %551 = vmatprep.mubr.bf16.mxu1 %v7349_v0  ;;  %v6369_v2 = vld [vmem:[#allocation9 + $0xc] ss:$16 sps:$4 sm:$0xff]   ;;  %v6371_v3 = vld [vmem:[#allocation9] ss:$16 sps:$4 sm:$0xff]   ;;  %v6372_v4 = vld [vmem:[#allocation9 + $0x8] ss:$16 sps:$4 sm:$0xff]  }
  0x70   :  { %406 = vmatprep.subr.bf16.mxu0 %v6367_v1  ;;  %519 = vmatprep.subr.bf16.mxu1 %v6369_v2  ;;  %v6373_v5 = vld [vmem:[#allocation9 + $0x24] ss:$16 sps:$4 sm:$0xff]   ;;  %v6375_v6 = vld [vmem:[#allocation9 + $0x2c] ss:$16 sps:$4 sm:$0xff]   ;;  %v6377_v7 = vld [vmem:[#allocation9 + $0x20] ss:$16 sps:$4 sm:$0xff]  }
  0x71   :  { %407 = vmatpush1.bf16.msra.mxu0 %v6371_v3  ;;  %520 = vmatpush1.bf16.msra.mxu1 %v6372_v4  ;;  %v6378_v8 = vld [vmem:[#allocation9 + $0x28] ss:$16 sps:$4 sm:$0xff]   ;;  %v6379_v9 = vld [vmem:[#allocation9 + $0x44] ss:$16 sps:$4 sm:$0xff]   ;;  %v6381_v10 = vld [vmem:[#allocation9 + $0x4c] ss:$16 sps:$4 sm:$0xff]  }
  0x72   :  { %408 = vmatprep.subr.bf16.mxu0 %v6373_v5  ;;  %521 = vmatprep.subr.bf16.mxu1 %v6375_v6  ;;  %v6383_v11 = vld [vmem:[#allocation9 + $0x40] ss:$16 sps:$4 sm:$0xff]   ;;  %v6384_v12 = vld [vmem:[#allocation9 + $0x48] ss:$16 sps:$4 sm:$0xff]   ;;  %v6385_v13 = vld [vmem:[#allocation9 + $0x64] ss:$16 sps:$4 sm:$0xff]  }
  0x73   :  { %v6387_v14 = vld [vmem:[#allocation9 + $0x6c] ss:$16 sps:$4 sm:$0xff]   ;;  %v6389_v15 = vld [vmem:[#allocation9 + $0x60] ss:$16 sps:$4 sm:$0xff]   ;;  %v6390_v16 = vld [vmem:[#allocation9 + $0x68] ss:$16 sps:$4 sm:$0xff]  }
  0x74   :  { %v6391_v17 = vld [vmem:[#allocation9 + $0x84] ss:$16 sps:$4 sm:$0xff]   ;;  %v6393_v18 = vld [vmem:[#allocation9 + $0x8c] ss:$16 sps:$4 sm:$0xff]   ;;  %v6395_v19 = vld [vmem:[#allocation9 + $0x80] ss:$16 sps:$4 sm:$0xff]  }
  0x75   :  { %409 = vmatpush1.bf16.msra.mxu0 %v6377_v7  ;;  %522 = vmatpush1.bf16.msra.mxu1 %v6378_v8  ;;  %v6396_v20 = vld [vmem:[#allocation9 + $0x88] ss:$16 sps:$4 sm:$0xff]   ;;  %v6397_v21 = vld [vmem:[#allocation9 + $0xa4] ss:$16 sps:$4 sm:$0xff]   ;;  %v6399_v22 = vld [vmem:[#allocation9 + $0xac] ss:$16 sps:$4 sm:$0xff]  }
  0x76   :  { %410 = vmatprep.subr.bf16.mxu0 %v6379_v9  ;;  %523 = vmatprep.subr.bf16.mxu1 %v6381_v10  ;;  %v6401_v23 = vld [vmem:[#allocation9 + $0xa0] ss:$16 sps:$4 sm:$0xff]   ;;  %v6402_v24 = vld [vmem:[#allocation9 + $0xa8] ss:$16 sps:$4 sm:$0xff]   ;;  %v6403_v25 = vld [vmem:[#allocation9 + $0xc4] ss:$16 sps:$4 sm:$0xff]  }
  0x77   :  { %v6405_v26 = vld [vmem:[#allocation9 + $0xcc] ss:$16 sps:$4 sm:$0xff]   ;;  %v6407_v27 = vld [vmem:[#allocation9 + $0xc0] ss:$16 sps:$4 sm:$0xff]   ;;  %v6408_v28 = vld [vmem:[#allocation9 + $0xc8] ss:$16 sps:$4 sm:$0xff]  }
  0x78   :  { %v6409_v29 = vld [vmem:[#allocation9 + $0xe4] ss:$16 sps:$4 sm:$0xff]   ;;  %v6411_v30 = vld [vmem:[#allocation9 + $0xec] ss:$16 sps:$4 sm:$0xff]   ;;  %v6413_v31 = vld [vmem:[#allocation9 + $0xe0] ss:$16 sps:$4 sm:$0xff]  }
  0x79   :  { %411 = vmatpush1.bf16.msra.mxu0 %v6383_v11  ;;  %524 = vmatpush1.bf16.msra.mxu1 %v6384_v12  ;;  %v6414_v32 = vld [vmem:[#allocation9 + $0xe8] ss:$16 sps:$4 sm:$0xff]   ;;  %v7491_v33 = vld [vmem:[#allocation11 + $0x4] ss:$16 sps:$4 sm:$0xff]   ;;  %v7493_v34 = vld [vmem:[#allocation11 + $0xc] ss:$16 sps:$4 sm:$0xff]   ;;  %v178_v11 = vlaneseq }
  0x7a   :  { %412 = vmatprep.subr.bf16.mxu0 %v6385_v13  ;;  %525 = vmatprep.subr.bf16.mxu1 %v6387_v14  ;;  %v6415_v35 = vld [vmem:[#allocation6] sm:$0xff]   ;;  %v7501_v38 = vld [vmem:[#allocation11 + $0x8] ss:$16 sps:$4 sm:$0xff]   ;;  %v7503_v39 = vld [vmem:[#allocation11 + $0x2c] ss:$16 sps:$4 sm:$0xff]   ;;  %v7350_v10 = vmov 0.0|0.0  }
  0x7b   :  { %v7495_v36 = vld [vmem:[#allocation11] ss:$16 sps:$4 sm:$0xff]   ;;  %v7498_v37 = vld [vmem:[#allocation11 + $0x24] ss:$16 sps:$4 sm:$0xff]   ;;  %v7514_v42 = vld [vmem:[#allocation11 + $0x28] ss:$16 sps:$4 sm:$0xff]  }
  0x7c   :  { %v7507_v40 = vld [vmem:[#allocation11 + $0x20] ss:$16 sps:$4 sm:$0xff]   ;;  %v7511_v41 = vld [vmem:[#allocation11 + $0x44] ss:$16 sps:$4 sm:$0xff]   ;;  %v7523_v46 = vld [vmem:[#allocation11 + $0x4c] ss:$16 sps:$4 sm:$0xff]  }
  0x7d   :  { %413 = vmatpush1.bf16.msra.mxu0 %v6389_v15  ;;  %526 = vmatpush1.bf16.msra.mxu1 %v6390_v16  ;;  %v7518_v44 = vld [vmem:[#allocation11 + $0x40] ss:$16 sps:$4 sm:$0xff]   ;;  %v7521_v45 = vld [vmem:[#allocation11 + $0x64] ss:$16 sps:$4 sm:$0xff]   ;;  %v7526_v47 = vld [vmem:[#allocation11 + $0x48] ss:$16 sps:$4 sm:$0xff]  }
  0x7e   :  { %414 = vmatprep.subr.bf16.mxu0 %v6391_v17  ;;  %527 = vmatprep.subr.bf16.mxu1 %v6393_v18  ;;  %v7528_v48 = vld [vmem:[#allocation11 + $0x6c] ss:$16 sps:$4 sm:$0xff]   ;;  %v7533_v49 = vld [vmem:[#allocation11 + $0x60] ss:$16 sps:$4 sm:$0xff]   ;;  %v7536_v50 = vld [vmem:[#allocation11 + $0x84] ss:$16 sps:$4 sm:$0xff]  }
  0x7f   :  { %v7540_v51 = vld [vmem:[#allocation11 + $0x68] ss:$16 sps:$4 sm:$0xff]   ;;  %v6426_v52 = vld [vmem:[#allocation6 + $0x10] sm:$0xff]   ;;  %v7546_v54 = vld [vmem:[#allocation11 + $0x8c] ss:$16 sps:$4 sm:$0xff]   ;;  %v7641_v12 = vshrl.u32 %v178_v11, 7 }
  0x80   :  { %v7543_v53 = vld [vmem:[#allocation11 + $0x80] ss:$16 sps:$4 sm:$0xff]   ;;  %v7549_v55 = vld [vmem:[#allocation11 + $0xa4] ss:$16 sps:$4 sm:$0xff]   ;;  %v7552_v56 = vld [vmem:[#allocation11 + $0x88] ss:$16 sps:$4 sm:$0xff]  }
  0x81   :  { %415 = vmatpush1.bf16.msra.mxu0 %v6395_v19  ;;  %528 = vmatpush1.bf16.msra.mxu1 %v6396_v20  ;;  %v7554_v57 = vld [vmem:[#allocation11 + $0xac] ss:$16 sps:$4 sm:$0xff]   ;;  %v7556_v58 = vld [vmem:[#allocation11 + $0xa0] ss:$16 sps:$4 sm:$0xff]   ;;  %v7560_v59 = vld [vmem:[#allocation11 + $0xc4] ss:$16 sps:$4 sm:$0xff]  }
  0x82   :  { %416 = vmatprep.subr.bf16.mxu0 %v6397_v21  ;;  %529 = vmatprep.subr.bf16.mxu1 %v6399_v22  ;;  %v7562_v60 = vld [vmem:[#allocation11 + $0xa8] ss:$16 sps:$4 sm:$0xff]   ;;  %v7568_v62 = vld [vmem:[#allocation11 + $0xc0] ss:$16 sps:$4 sm:$0xff]   ;;  %v7571_v63 = vld [vmem:[#allocation11 + $0xcc] ss:$16 sps:$4 sm:$0xff]  }
  0x83   :  { %v6433_v61 = vld [vmem:[#allocation6 + $0x18] sm:$0xff]   ;;  %v7573_v1 = vld [vmem:[#allocation11 + $0xe4] ss:$16 sps:$4 sm:$0xff]   ;;  %v7582_v4 = vld [vmem:[#allocation11 + $0xe0] ss:$16 sps:$4 sm:$0xff]   ;;  %v180_v13 = vsub.s32 0, %v7641_v12 }
  0x84   :  { %v7575_v2 = vld [vmem:[#allocation11 + $0xc8] ss:$16 sps:$4 sm:$0xff]   ;;  %v7578_v3 = vld [vmem:[#allocation11 + $0xec] ss:$16 sps:$4 sm:$0xff]   ;;  %v6440_v6 = vld [vmem:[#allocation6 + $0x20] sm:$0xff]   ;;  %v8677_v15 = vsub.s32 1, %v7641_v12 }
  0x85   :  { %417 = vmatpush1.bf16.msra.mxu0 %v6401_v23  ;;  %530 = vmatpush1.bf16.msra.mxu1 %v6402_v24  ;;  %v7586_v5 = vld [vmem:[#allocation11 + $0xe8] ss:$16 sps:$4 sm:$0xff]   ;;  %v6454_v8 = vld [vmem:[#allocation6 + $0x30] sm:$0xff]   ;;  %v176_v14 = vld [vmem:[%s8668_s3] sm:$0xf]  ;;  %v8676_v20 = vsub.s32 3, %v7641_v12 }
  0x86   :  { %418 = vmatprep.subr.bf16.mxu0 %v6403_v25  ;;  %531 = vmatprep.subr.bf16.mxu1 %v6405_v26  ;;  %v6447_v7 = vld [vmem:[#allocation6 + $0x28] sm:$0xff]   ;;  %v6461_v9 = vld [vmem:[#allocation6 + $0x38] sm:$0xff]   ;;  %v7650_v16 = vrot.slane %v176_v14, %v180_v13  ;;  %v7654_v17 = vrot.slane %v176_v14, %v8677_v15  ;;  %s7351_s22 = smov [#allocation17]  }
  0x87   :  { %s5530_s23 = sshll.u32 %s7351_s22, 4  ;;  %s5531_s23 = int_to_ptr.vmem [resolvable:$true] %s5530_s23 }
  0x88   :  { %p7310_p7 = scmp.lt.s32.totalorder %s5531_s23, %s5531_s23 }
  0x89   :  { %419 = vmatpush1.bf16.msra.mxu0 %v6407_v27  ;;  %532 = vmatpush1.bf16.msra.mxu1 %v6408_v28  ;;  %v8675_v28 = vsub.s32 2, %v7641_v12 }
  0x8a   :  { %420 = vmatprep.subr.bf16.mxu0 %v6409_v29  ;;  %533 = vmatprep.subr.bf16.mxu1 %v6411_v30 }
  0x8d   :  { %421 = vmatpush1.bf16.msra.mxu0 %v6413_v31  ;;  %534 = vmatpush1.bf16.msra.mxu1 %v6414_v32 }
  0x8e   :  { %904 = vmatprep.subr.bf16.mxu0 %v7491_v33  ;;  %947 = vmatprep.subr.bf16.mxu1 %v7493_v34 }
  0x90   :  { %439 = vmatmul.mubr.bf16.vlgmr.msra.gmra.mrb[0].mxu0 %v6415_v35  ;;  %552 = vmatmul.mubr.bf16.vlgmr.msra.gmra.mrb[0].mxu1 %v6415_v35 }
  0x91   :  { %905 = vmatpush1.bf16.msra.mxu0 %v7495_v36  ;;  %448 = vmatprep.mubr.bf16.mxu0 %v7349_v0 }
  0x92   :  { %561 = vmatprep.mubr.bf16.mxu1 %v7349_v0  ;;  %906 = vmatprep.subr.bf16.mxu0 %v7498_v37 }
  0x93   :  { %948 = vmatpush1.bf16.msra.mxu1 %v7501_v38 }
  0x94   :  { %949 = vmatprep.subr.bf16.mxu1 %v7503_v39 }
  0x95   :  { %907 = vmatpush1.bf16.msra.mxu0 %v7507_v40 }
  0x96   :  { %908 = vmatprep.subr.bf16.mxu0 %v7511_v41 }
  0x97   :  { %950 = vmatpush1.bf16.msra.mxu1 %v7514_v42 }
  0x98   :  { %449 = vmatmul.mubr.bf16.gmra.mrb[4].mxu0 %v6419_v43  ;;  %562 = vmatmul.mubr.bf16.gmra.mrb[4].mxu1 %v6419_v43 }
  0x99   :  { %458 = vmatprep.mubr.bf16.mxu0 %v7349_v0  ;;  %571 = vmatprep.mubr.bf16.mxu1 %v7349_v0 }
  0x9a   :  { %909 = vmatpush1.bf16.msra.mxu0 %v7518_v44  ;;  %951 = vmatprep.subr.bf16.mxu1 %v7523_v46 }
  0x9b   :  { %910 = vmatprep.subr.bf16.mxu0 %v7521_v45  ;;  %952 = vmatpush1.bf16.msra.mxu1 %v7526_v47 }
  0x9c   :  { %953 = vmatprep.subr.bf16.mxu1 %v7528_v48 }
  0x9e   :  { %911 = vmatpush1.bf16.msra.mxu0 %v7533_v49 }
  0x9f   :  { %912 = vmatprep.subr.bf16.mxu0 %v7536_v50  ;;  %954 = vmatpush1.bf16.msra.mxu1 %v7540_v51 }
  0xa0   :  { %459 = vmatmul.mubr.bf16.gmra.mrb[8].mxu0 %v6426_v52  ;;  %572 = vmatmul.mubr.bf16.gmra.mrb[8].mxu1 %v6426_v52 }
  0xa1   :  { %468 = vmatprep.mubr.bf16.mxu0 %v7349_v0  ;;  %581 = vmatprep.mubr.bf16.mxu1 %v7349_v0 }
  0xa2   :  { %913 = vmatpush1.bf16.msra.mxu0 %v7543_v53  ;;  %955 = vmatprep.subr.bf16.mxu1 %v7546_v54 }
  0xa3   :  { %914 = vmatprep.subr.bf16.mxu0 %v7549_v55  ;;  %956 = vmatpush1.bf16.msra.mxu1 %v7552_v56 }
  0xa4   :  { %957 = vmatprep.subr.bf16.mxu1 %v7554_v57 }
  0xa6   :  { %915 = vmatpush1.bf16.msra.mxu0 %v7556_v58 }
  0xa7   :  { %916 = vmatprep.subr.bf16.mxu0 %v7560_v59  ;;  %958 = vmatpush1.bf16.msra.mxu1 %v7562_v60 }
  0xa8   :  { %469 = vmatmul.mubr.bf16.gmra.mrb[12].mxu0 %v6433_v61  ;;  %582 = vmatmul.mubr.bf16.gmra.mrb[12].mxu1 %v6433_v61  ;;  %v7668_v61 = vrot.slane %v176_v14, %v8675_v28 }
  0xa9   :  { %478 = vmatprep.mubr.bf16.mxu0 %v7349_v0  ;;  %591 = vmatprep.mubr.bf16.mxu1 %v7349_v0 }
  0xaa   :  { %917 = vmatpush1.bf16.msra.mxu0 %v7568_v62  ;;  %959 = vmatprep.subr.bf16.mxu1 %v7571_v63 }
  0xab   :  { %918 = vmatprep.subr.bf16.mxu0 %v7573_v1  ;;  %960 = vmatpush1.bf16.msra.mxu1 %v7575_v2 }
  0xac   :  { %961 = vmatprep.subr.bf16.mxu1 %v7578_v3 }
  0xae   :  { %919 = vmatpush1.bf16.msra.mxu0 %v7582_v4 }
  0xaf   :  { %962 = vmatpush1.bf16.msra.mxu1 %v7586_v5  ;;  %1251 = vmatprep.subr.bf16.mxu0 %v7491_v33 }
  0xb0   :  { %479 = vmatmul.mubr.bf16.gmra.mrb[16].mxu0 %v6440_v6  ;;  %592 = vmatmul.mubr.bf16.gmra.mrb[16].mxu1 %v6440_v6 }
  0xb1   :  { %488 = vmatprep.mubr.bf16.mxu0 %v7349_v0  ;;  %601 = vmatprep.mubr.bf16.mxu1 %v7349_v0 }
  0xb2   :  { %1294 = vmatprep.subr.bf16.mxu1 %v7493_v34 }
  0xb8   :  { %489 = vmatmul.mubr.bf16.gmra.mrb[20].mxu0 %v6447_v7  ;;  %602 = vmatmul.mubr.bf16.gmra.mrb[20].mxu1 %v6447_v7 }
  0xb9   :  { %498 = vmatprep.mubr.bf16.mxu0 %v7349_v0  ;;  %611 = vmatprep.mubr.bf16.mxu1 %v7349_v0 }
  0xc0   :  { %499 = vmatmul.mubr.bf16.gmra.mrb[24].mxu0 %v6454_v8  ;;  %612 = vmatmul.mubr.bf16.gmra.mrb[24].mxu1 %v6454_v8 }
  0xc1   :  { %508 = vmatprep.mubr.bf16.mxu0 %v7349_v0  ;;  %621 = vmatprep.mubr.bf16.mxu1 %v7349_v0 }
  0xc8   :  { %509 = vmatmul.mubr.bf16.gmra.mrb[28].mxu0 %v6461_v9  ;;  %622 = vmatmul.mubr.bf16.gmra.mrb[28].mxu1 %v6461_v9 }
  0xc9   :  { %936 = vmatprep.mubr.bf16.mxu0 %v7349_v0  ;;  %979 = vmatprep.mubr.bf16.mxu1 %v7349_v0 }
  0xd0   :  { %937 = vmatmul.mubr.bf16.vlgmr.msra.gmra.mrb[0].mxu0 %v7350_v10  ;;  %980 = vmatmul.mubr.bf16.vlgmr.msra.gmra.mrb[0].mxu1 %v7350_v10 }
  0xd1   :  { %1252 = vmatpush1.bf16.msra.mxu0 %v7495_v36  ;;  %1295 = vmatpush1.bf16.msra.mxu1 %v7501_v38 }
  0xd2   :  { %1253 = vmatprep.subr.bf16.mxu0 %v7498_v37  ;;  %1296 = vmatprep.subr.bf16.mxu1 %v7503_v39 }
  0xd3   :  { %1283 = vmatprep.mubr.bf16.mxu0 %v7349_v0  ;;  %1326 = vmatprep.mubr.bf16.mxu1 %v7349_v0 }
  0xd5   :  { %1254 = vmatpush1.bf16.msra.mxu0 %v7507_v40  ;;  %1297 = vmatpush1.bf16.msra.mxu1 %v7514_v42 }
  0xd6   :  { %1255 = vmatprep.subr.bf16.mxu0 %v7511_v41  ;;  %1298 = vmatprep.subr.bf16.mxu1 %v7523_v46 }
  0xd9   :  { %1256 = vmatpush1.bf16.msra.mxu0 %v7518_v44  ;;  %1299 = vmatpush1.bf16.msra.mxu1 %v7526_v47 }
  0xda   :  { %1257 = vmatprep.subr.bf16.mxu0 %v7521_v45  ;;  %1300 = vmatprep.subr.bf16.mxu1 %v7528_v48 }
  0xdd   :  { %1258 = vmatpush1.bf16.msra.mxu0 %v7533_v49  ;;  %1301 = vmatpush1.bf16.msra.mxu1 %v7540_v51 }
  0xde   :  { %1259 = vmatprep.subr.bf16.mxu0 %v7536_v50  ;;  %1302 = vmatprep.subr.bf16.mxu1 %v7546_v54 }
  0xe1   :  { %1260 = vmatpush1.bf16.msra.mxu0 %v7543_v53  ;;  %1303 = vmatpush1.bf16.msra.mxu1 %v7552_v56 }
  0xe2   :  { %1261 = vmatprep.subr.bf16.mxu0 %v7549_v55  ;;  %1304 = vmatprep.subr.bf16.mxu1 %v7554_v57 }
  0xe5   :  { %1262 = vmatpush1.bf16.msra.mxu0 %v7556_v58  ;;  %1305 = vmatpush1.bf16.msra.mxu1 %v7562_v60 }
  0xe6   :  { %1263 = vmatprep.subr.bf16.mxu0 %v7560_v59  ;;  %1306 = vmatprep.subr.bf16.mxu1 %v7571_v63 }
  0xe9   :  { %1264 = vmatpush1.bf16.msra.mxu0 %v7568_v62  ;;  %1307 = vmatpush1.bf16.msra.mxu1 %v7575_v2 }
  0xea   :  { %1265 = vmatprep.subr.bf16.mxu0 %v7573_v1  ;;  %1308 = vmatprep.subr.bf16.mxu1 %v7578_v3 }
  0xed   :  { %1266 = vmatpush1.bf16.msra.mxu0 %v7582_v4  ;;  %1309 = vmatpush1.bf16.msra.mxu1 %v7586_v5 }
  0xee   :  { %1599 = vmatprep.subr.bf16.mxu0 %v7491_v33  ;;  %1642 = vmatprep.subr.bf16.mxu1 %v7493_v34  ;;  %v7663_v33 = vrot.slane %v176_v14, %v8676_v20 }
 0x1a3   :  { %v938_v18 = vpop.f32.mrb[0].mxu0  ;;  %v981_v19 = vpop.f32.mrb[0].mxu1 }
 0x1a4   :  { %v6096_v21 = vadd.f32 %v938_v18, %v7650_v16  ;;  %v940_v22 = vpop.f32.mrb[1].mxu0  ;;  %v983_v23 = vpop.f32.mrb[1].mxu1  ;;  %v6128_v7 = vadd.f32 %v981_v19, %v7668_v61 }
 0x1a5   :  { %v6097_v24 = vadd.f32 %v940_v22, %v7654_v17  ;;  %v942_v25 = vpop.f32.mrb[2].mxu0  ;;  %v985_v26 = vpop.f32.mrb[2].mxu1  ;;  %v6129_v6 = vadd.f32 %v983_v23, %v7663_v33 }
 0x1a6   :  { %v5624_v27 = vmul.f32 -1.442695, %v6096_v21  ;;  %v6098_v29 = vadd.f32 %v942_v25, %v7650_v16  ;;  %v944_v30 = vpop.f32.mrb[3].mxu0  ;;  %v987_v31 = vpop.f32.mrb[3].mxu1  ;;  %v6130_v11 = vadd.f32 %v985_v26, %v7668_v61 }
 0x1a7   :  { %v5626_v32 = vmul.f32 -1.442695, %v6097_v24  ;;  %v6099_v35 = vadd.f32 %v944_v30, %v7654_v17  ;;  %v5628_v8 = vmul.f32 -1.442695, %v6129_v6  ;;  %v6131_v9 = vadd.f32 %v987_v31, %v7663_v33 }
 0x1a8   :  { %6621 = vpow2.f32 %v5624_v27  ;;  %v5625_v43 = vmul.f32 -1.442695, %v6098_v29 }
 0x1a9   :  { %6623 = vpow2.f32 %v5626_v32  ;;  %v5627_v52 = vmul.f32 -1.442695, %v6099_v35  ;;  %v5629_v24 = vmul.f32 -1.442695, %v6131_v9 }
 0x1aa   :  { %6625 = vpow2.f32 %v5625_v43 }
 0x1ab   :  { %6627 = vpow2.f32 %v5627_v52 }
 0x1ac   :  { %6629 = vtanh.f32 %v6128_v7 }
 0x1ad   :  { %6631 = vpow2.f32 %v5628_v8 }
 0x1ae   :  { %6633 = vtanh.f32 %v6130_v11 }
 0x1b2   :  { %v6622_v18 = vpop.eup %6621 }
 0x1b3   :  { %v6624_v21 = vpop.eup %6623  ;;  %v1004_v22 = vadd.f32 1.0, %v6622_v18 }
 0x1b4   :  { %v1016_v25 = vadd.f32 1.0, %v6624_v21  ;;  %v6626_v14 = vpop.eup %6625 }
 0x1b5   :  { %6635 = vrcp.f32 %v1004_v22  ;;  %v1005_v23 = vadd.f32 1.0, %v6626_v14  ;;  %v6628_v27 = vpop.eup %6627 }
 0x1b6   :  { %6637 = vrcp.f32 %v1016_v25  ;;  %v1017_v19 = vadd.f32 1.0, %v6628_v27  ;;  %v6630_v29 = vpop.eup %6629 }
 0x1b7   :  { %6639 = vpow2.f32 %v5629_v24  ;;  %v6632_v30 = vpop.eup %6631 }
 0x1b8   :  { %6641 = vrcp.f32 %v1005_v23  ;;  %v6634_v26 = vpop.eup %6633  ;;  %v1030_v7 = vadd.f32 1.0, %v6632_v30 }
 0x1b9   :  { %6643 = vrcp.f32 %v1017_v19 }
 0x1ba   :  { %6645 = vrcp.f32 %v1030_v7 }
 0x1bf   :  { %v6636_v31 = vpop.eup %6635 }
 0x1c0   :  { %v6638_v32 = vpop.eup %6637  ;;  %v1038_v35 = vmul.f32 %v6636_v31, %v6630_v29 }
 0x1c1   :  { %v6640_v43 = vpop.eup %6639  ;;  %v1036_v52 = vmul.f32 0.0, %v6638_v32 }
 0x1c2   :  { %v6642_v6 = vpop.eup %6641  ;;  %v1031_v18 = vadd.f32 1.0, %v6640_v43 }
 0x1c3   :  { %v7674_v8 = vadd.f32 %v1038_v35, %v1036_v52  ;;  %v1039_v9 = vmul.f32 %v6642_v6, %v6634_v26  ;;  %v6644_v11 = vpop.eup %6643 }
 0x1c4   :  { %v1037_v21 = vmul.f32 0.0, %v6644_v11  ;;  %v6646_v24 = vpop.eup %6645 }
 0x1c5   :  { %6647 = vtanh.f32 %v7674_v8 }
 0x1c6   :  { %v7677_v22 = vadd.f32 %v1039_v9, %v1037_v21  ;;  %6649 = vrcp.f32 %v1031_v18 }
 0x1c8   :  { %6651 = vtanh.f32 %v7677_v22 }
 0x1cf   :  { %v6648_v25 = vpop.eup %6647 }
 0x1d0   :  { %v6650_v14 = vpop.eup %6649  ;;  %v1044_v27 = vmul.f32 %v6648_v25, %v6646_v24 }
 0x1d2   :  { %v6652_v23 = vpop.eup %6651 }
 0x1d3   :  { %v1045_v19 = vmul.f32 %v6652_v23, %v6650_v14 }
 0x1d5   :  { %v7680_v29 = vpack.c.bf16 %v1045_v19, %v1044_v27 }
 0x1d7   :  { %1284 = vmatmul.mubr.bf16.vlgmr.msra.gmra.mrb[4].mxu0 %v7680_v29  ;;  %1327 = vmatmul.mubr.bf16.vlgmr.msra.gmra.mrb[4].mxu1 %v7680_v29 }
 0x1d8   :  { %1600 = vmatpush1.bf16.msra.mxu0 %v7495_v36  ;;  %1643 = vmatpush1.bf16.msra.mxu1 %v7501_v38 }
 0x1d9   :  { %1601 = vmatprep.subr.bf16.mxu0 %v7498_v37  ;;  %1644 = vmatprep.subr.bf16.mxu1 %v7503_v39 }
 0x1da   :  { %1631 = vmatprep.mubr.bf16.mxu0 %v7349_v0  ;;  %1674 = vmatprep.mubr.bf16.mxu1 %v7349_v0 }
 0x1dc   :  { %1602 = vmatpush1.bf16.msra.mxu0 %v7507_v40  ;;  %1645 = vmatpush1.bf16.msra.mxu1 %v7514_v42 }
 0x1dd   :  { %1603 = vmatprep.subr.bf16.mxu0 %v7511_v41  ;;  %1646 = vmatprep.subr.bf16.mxu1 %v7523_v46 }
 0x1e0   :  { %1604 = vmatpush1.bf16.msra.mxu0 %v7518_v44  ;;  %1647 = vmatpush1.bf16.msra.mxu1 %v7526_v47 }
 0x1e1   :  { %1605 = vmatprep.subr.bf16.mxu0 %v7521_v45  ;;  %1648 = vmatprep.subr.bf16.mxu1 %v7528_v48 }
 0x1e4   :  { %1606 = vmatpush1.bf16.msra.mxu0 %v7533_v49  ;;  %1649 = vmatpush1.bf16.msra.mxu1 %v7540_v51 }
 0x1e5   :  { %1607 = vmatprep.subr.bf16.mxu0 %v7536_v50  ;;  %1650 = vmatprep.subr.bf16.mxu1 %v7546_v54 }
 0x1e8   :  { %1608 = vmatpush1.bf16.msra.mxu0 %v7543_v53  ;;  %1651 = vmatpush1.bf16.msra.mxu1 %v7552_v56 }
 0x1e9   :  { %1609 = vmatprep.subr.bf16.mxu0 %v7549_v55  ;;  %1652 = vmatprep.subr.bf16.mxu1 %v7554_v57 }
 0x1ec   :  { %1610 = vmatpush1.bf16.msra.mxu0 %v7556_v58  ;;  %1653 = vmatpush1.bf16.msra.mxu1 %v7562_v60 }
 0x1ed   :  { %1611 = vmatprep.subr.bf16.mxu0 %v7560_v59  ;;  %1654 = vmatprep.subr.bf16.mxu1 %v7571_v63 }
 0x1f0   :  { %1612 = vmatpush1.bf16.msra.mxu0 %v7568_v62  ;;  %1655 = vmatpush1.bf16.msra.mxu1 %v7575_v2 }
 0x1f1   :  { %1613 = vmatprep.subr.bf16.mxu0 %v7573_v1  ;;  %1656 = vmatprep.subr.bf16.mxu1 %v7578_v3 }
 0x1f4   :  { %1614 = vmatpush1.bf16.msra.mxu0 %v7582_v4  ;;  %1657 = vmatpush1.bf16.msra.mxu1 %v7586_v5 }
 0x1f5   :  { %1990 = vmatprep.subr.bf16.mxu1 %v7493_v34 }
 0x2aa   :  { %v1285_v36 = vpop.f32.mrb[4].mxu0  ;;  %v1328_v37 = vpop.f32.mrb[4].mxu1 }
 0x2ab   :  { %v6100_v40 = vadd.f32 %v1285_v36, %v7650_v16  ;;  %v1287_v30 = vpop.f32.mrb[5].mxu0  ;;  %v1330_v26 = vpop.f32.mrb[5].mxu1  ;;  %v6132_v24 = vadd.f32 %v1328_v37, %v7668_v61 }
 0x2ac   :  { %v6101_v31 = vadd.f32 %v1287_v30, %v7654_v17  ;;  %v1289_v32 = vpop.f32.mrb[6].mxu0  ;;  %v1332_v35 = vpop.f32.mrb[6].mxu1  ;;  %v6133_v21 = vadd.f32 %v1330_v26, %v7663_v33 }
 0x2ad   :  { %v5662_v43 = vmul.f32 -1.442695, %v6100_v40  ;;  %v6102_v52 = vadd.f32 %v1289_v32, %v7650_v16  ;;  %v1291_v6 = vpop.f32.mrb[7].mxu0  ;;  %v1334_v7 = vpop.f32.mrb[7].mxu1  ;;  %v6134_v23 = vadd.f32 %v1332_v35, %v7668_v61 }
 0x2ae   :  { %v5664_v9 = vmul.f32 -1.442695, %v6101_v31  ;;  %v6103_v11 = vadd.f32 %v1291_v6, %v7654_v17  ;;  %v5666_v25 = vmul.f32 -1.442695, %v6133_v21  ;;  %v6135_v14 = vadd.f32 %v1334_v7, %v7663_v33 }
 0x2af   :  { %6653 = vpow2.f32 %v5662_v43  ;;  %v5663_v34 = vmul.f32 -1.442695, %v6102_v52 }
 0x2b0   :  { %6655 = vpow2.f32 %v5664_v9  ;;  %v5665_v18 = vmul.f32 -1.442695, %v6103_v11  ;;  %v5667_v40 = vmul.f32 -1.442695, %v6135_v14 }
 0x2b1   :  { %6657 = vpow2.f32 %v5663_v34 }
 0x2b2   :  { %6659 = vpow2.f32 %v5665_v18 }
 0x2b3   :  { %6661 = vtanh.f32 %v6132_v24 }
 0x2b4   :  { %6663 = vpow2.f32 %v5666_v25 }
 0x2b5   :  { %6665 = vtanh.f32 %v6134_v23 }
 0x2b9   :  { %v6654_v27 = vpop.eup %6653 }
 0x2ba   :  { %v6656_v19 = vpop.eup %6655  ;;  %v1351_v36 = vadd.f32 1.0, %v6654_v27 }
 0x2bb   :  { %v1363_v30 = vadd.f32 1.0, %v6656_v19  ;;  %v6658_v31 = vpop.eup %6657 }
 0x2bc   :  { %6667 = vrcp.f32 %v1351_v36  ;;  %v1352_v26 = vadd.f32 1.0, %v6658_v31  ;;  %v6660_v32 = vpop.eup %6659 }
 0x2bd   :  { %6669 = vrcp.f32 %v1363_v30  ;;  %v1364_v37 = vadd.f32 1.0, %v6660_v32  ;;  %v6662_v43 = vpop.eup %6661 }
 0x2be   :  { %6671 = vpow2.f32 %v5667_v40  ;;  %v6664_v52 = vpop.eup %6663 }
 0x2bf   :  { %6673 = vrcp.f32 %v1352_v26  ;;  %v6666_v35 = vpop.eup %6665  ;;  %v1377_v21 = vadd.f32 1.0, %v6664_v52 }
 0x2c0   :  { %6675 = vrcp.f32 %v1364_v37 }
 0x2c1   :  { %6677 = vrcp.f32 %v1377_v21 }
 0x2c6   :  { %v6668_v6 = vpop.eup %6667 }
 0x2c7   :  { %v6670_v7 = vpop.eup %6669  ;;  %v1385_v9 = vmul.f32 %v6668_v6, %v6662_v43 }
 0x2c8   :  { %v6672_v11 = vpop.eup %6671  ;;  %v1383_v34 = vmul.f32 %v6670_v7, %v7674_v8 }
 0x2c9   :  { %v6674_v18 = vpop.eup %6673  ;;  %v1378_v23 = vadd.f32 1.0, %v6672_v11 }
 0x2ca   :  { %v7726_v24 = vadd.f32 %v1385_v9, %v1383_v34  ;;  %v1386_v25 = vmul.f32 %v6674_v18, %v6666_v35  ;;  %v6676_v14 = vpop.eup %6675 }
 0x2cb   :  { %v1384_v27 = vmul.f32 %v6676_v14, %v7677_v22  ;;  %v6678_v36 = vpop.eup %6677 }
 0x2cc   :  { %6679 = vtanh.f32 %v7726_v24 }
 0x2cd   :  { %v7730_v19 = vadd.f32 %v1386_v25, %v1384_v27  ;;  %6681 = vrcp.f32 %v1378_v23 }
 0x2cf   :  { %6683 = vtanh.f32 %v7730_v19 }
 0x2d6   :  { %v6680_v40 = vpop.eup %6679 }
 0x2d7   :  { %v6682_v8 = vpop.eup %6681  ;;  %v1391_v31 = vmul.f32 %v6680_v40, %v6678_v36 }
 0x2d9   :  { %v6684_v30 = vpop.eup %6683 }
 0x2da   :  { %v1392_v26 = vmul.f32 %v6684_v30, %v6682_v8 }
 0x2dc   :  { %v7733_v32 = vpack.c.bf16 %v1392_v26, %v1391_v31 }
 0x2de   :  { %1632 = vmatmul.mubr.bf16.vlgmr.msra.gmra.mrb[8].mxu0 %v7733_v32  ;;  %1675 = vmatmul.mubr.bf16.vlgmr.msra.gmra.mrb[8].mxu1 %v7733_v32 }
 0x2df   :  { %1991 = vmatpush1.bf16.msra.mxu1 %v7501_v38  ;;  %1979 = vmatprep.mubr.bf16.mxu0 %v7349_v0  ;;  %v7754_v38 = vld [vmem:[#allocation11 + $0x4] ss:$16 sps:$4 sm:$0xff]  }
 0x2e0   :  { %1992 = vmatprep.subr.bf16.mxu1 %v7503_v39  ;;  %2022 = vmatprep.mubr.bf16.mxu1 %v7349_v0  ;;  %v7756_v39 = vld [vmem:[#allocation11] ss:$16 sps:$4 sm:$0xff]  }
 0x2e1   :  { %1947 = vmatprep.subr.bf16.mxu0 %v7754_v38 }
 0x2e2   :  { %1948 = vmatpush1.bf16.msra.mxu0 %v7756_v39 }
 0x2e3   :  { %1993 = vmatpush1.bf16.msra.mxu1 %v7514_v42  ;;  %v7760_v42 = vld [vmem:[#allocation11 + $0x24] ss:$16 sps:$4 sm:$0xff]  }
 0x2e4   :  { %1994 = vmatprep.subr.bf16.mxu1 %v7523_v46  ;;  %v7762_v46 = vld [vmem:[#allocation11 + $0x20] ss:$16 sps:$4 sm:$0xff]   ;;  %1949 = vmatprep.subr.bf16.mxu0 %v7760_v42 }
 0x2e6   :  { %1950 = vmatpush1.bf16.msra.mxu0 %v7762_v46 }
 0x2e7   :  { %1995 = vmatpush1.bf16.msra.mxu1 %v7526_v47  ;;  %1951 = vmatprep.subr.bf16.mxu0 %v7511_v41 }
 0x2e8   :  { %1996 = vmatprep.subr.bf16.mxu1 %v7528_v48 }
 0x2ea   :  { %1952 = vmatpush1.bf16.msra.mxu0 %v7518_v44 }
 0x2eb   :  { %1997 = vmatpush1.bf16.msra.mxu1 %v7540_v51  ;;  %1953 = vmatprep.subr.bf16.mxu0 %v7521_v45 }
 0x2ec   :  { %1998 = vmatprep.subr.bf16.mxu1 %v7546_v54 }
 0x2ee   :  { %1954 = vmatpush1.bf16.msra.mxu0 %v7533_v49 }
 0x2ef   :  { %1999 = vmatpush1.bf16.msra.mxu1 %v7552_v56  ;;  %1955 = vmatprep.subr.bf16.mxu0 %v7536_v50 }
 0x2f0   :  { %2000 = vmatprep.subr.bf16.mxu1 %v7554_v57 }
 0x2f2   :  { %1956 = vmatpush1.bf16.msra.mxu0 %v7543_v53 }
 0x2f3   :  { %2001 = vmatpush1.bf16.msra.mxu1 %v7562_v60  ;;  %1957 = vmatprep.subr.bf16.mxu0 %v7549_v55 }
 0x2f4   :  { %2002 = vmatprep.subr.bf16.mxu1 %v7571_v63 }
 0x2f6   :  { %1958 = vmatpush1.bf16.msra.mxu0 %v7556_v58 }
 0x2f7   :  { %2003 = vmatpush1.bf16.msra.mxu1 %v7575_v2  ;;  %1959 = vmatprep.subr.bf16.mxu0 %v7560_v59 }
 0x2f8   :  { %2004 = vmatprep.subr.bf16.mxu1 %v7578_v3 }
 0x2fa   :  { %1960 = vmatpush1.bf16.msra.mxu0 %v7568_v62 }
 0x2fb   :  { %2005 = vmatpush1.bf16.msra.mxu1 %v7586_v5  ;;  %1961 = vmatprep.subr.bf16.mxu0 %v7573_v1 }
 0x2fe   :  { %1962 = vmatpush1.bf16.msra.mxu0 %v7582_v4 }
 0x2ff   :  { %2295 = vmatprep.subr.bf16.mxu0 %v7754_v38 }
 0x3b1   :  { %v1633_v41 = vpop.f32.mrb[8].mxu0  ;;  %v1676_v44 = vpop.f32.mrb[8].mxu1 }
 0x3b2   :  { %v6104_v45 = vadd.f32 %v1633_v41, %v7650_v16  ;;  %v1635_v47 = vpop.f32.mrb[9].mxu0  ;;  %v1678_v48 = vpop.f32.mrb[9].mxu1  ;;  %v6136_v63 = vadd.f32 %v1676_v44, %v7668_v61 }
 0x3b3   :  { %v6105_v49 = vadd.f32 %v1635_v47, %v7654_v17  ;;  %v1637_v50 = vpop.f32.mrb[10].mxu0  ;;  %v1680_v51 = vpop.f32.mrb[10].mxu1  ;;  %v6137_v62 = vadd.f32 %v1678_v48, %v7663_v33 }
 0x3b4   :  { %v5700_v53 = vmul.f32 -1.442695, %v6104_v45  ;;  %v6106_v54 = vadd.f32 %v1637_v50, %v7650_v16  ;;  %v1639_v55 = vpop.f32.mrb[11].mxu0  ;;  %v1682_v56 = vpop.f32.mrb[11].mxu1  ;;  %v6138_v3 = vadd.f32 %v1680_v51, %v7668_v61  ;;  %v7806_v51 = vld [vmem:[#allocation11 + $0x8] ss:$16 sps:$4 sm:$0xff]  }
 0x3b5   :  { %v5702_v57 = vmul.f32 -1.442695, %v6105_v49  ;;  %v6107_v58 = vadd.f32 %v1639_v55, %v7654_v17  ;;  %v5704_v1 = vmul.f32 -1.442695, %v6137_v62  ;;  %v6139_v2 = vadd.f32 %v1682_v56, %v7663_v33  ;;  %v7816_v55 = vld [vmem:[#allocation11 + $0x44] ss:$16 sps:$4 sm:$0xff]  }
 0x3b6   :  { %6685 = vpow2.f32 %v5700_v53  ;;  %v5701_v59 = vmul.f32 -1.442695, %v6106_v54  ;;  %v7810_v53 = vld [vmem:[#allocation11 + $0x2c] ss:$16 sps:$4 sm:$0xff]   ;;  %v7812_v54 = vld [vmem:[#allocation11 + $0x28] ss:$16 sps:$4 sm:$0xff]  }
 0x3b7   :  { %6687 = vpow2.f32 %v5702_v57  ;;  %v5703_v60 = vmul.f32 -1.442695, %v6107_v58  ;;  %v5705_v37 = vmul.f32 -1.442695, %v6139_v2  ;;  %v7818_v56 = vld [vmem:[#allocation11 + $0x4c] ss:$16 sps:$4 sm:$0xff]  }
 0x3b8   :  { %6689 = vpow2.f32 %v5701_v59  ;;  %v7820_v57 = vld [vmem:[#allocation11 + $0x40] ss:$16 sps:$4 sm:$0xff]   ;;  %v7822_v58 = vld [vmem:[#allocation11 + $0x48] ss:$16 sps:$4 sm:$0xff]   ;;  %v7828_v59 = vld [vmem:[#allocation11 + $0x64] ss:$16 sps:$4 sm:$0xff]  }
 0x3b9   :  { %6691 = vpow2.f32 %v5703_v60  ;;  %v7830_v60 = vld [vmem:[#allocation11 + $0x6c] ss:$16 sps:$4 sm:$0xff]   ;;  %v7832_v62 = vld [vmem:[#allocation11 + $0x60] ss:$16 sps:$4 sm:$0xff]  }
 0x3ba   :  { %6693 = vtanh.f32 %v6136_v63  ;;  %v7834_v63 = vld [vmem:[#allocation11 + $0x68] ss:$16 sps:$4 sm:$0xff]   ;;  %v7842_v2 = vld [vmem:[#allocation11 + $0x8c] ss:$16 sps:$4 sm:$0xff]  }
 0x3bb   :  { %6695 = vpow2.f32 %v5704_v1  ;;  %v7840_v1 = vld [vmem:[#allocation11 + $0x84] ss:$16 sps:$4 sm:$0xff]  }
 0x3bc   :  { %6697 = vtanh.f32 %v6138_v3  ;;  %v7844_v3 = vld [vmem:[#allocation11 + $0x80] ss:$16 sps:$4 sm:$0xff]  }
 0x3c0   :  { %v6686_v4 = vpop.eup %6685 }
 0x3c1   :  { %v6688_v5 = vpop.eup %6687  ;;  %v1699_v22 = vadd.f32 1.0, %v6686_v4  ;;  %v7846_v4 = vld [vmem:[#allocation11 + $0x88] ss:$16 sps:$4 sm:$0xff]  }
 0x3c2   :  { %v1711_v43 = vadd.f32 1.0, %v6688_v5  ;;  %v6690_v52 = vpop.eup %6689  ;;  %v7850_v5 = vld [vmem:[#allocation11 + $0xa4] ss:$16 sps:$4 sm:$0xff]  }
 0x3c3   :  { %6699 = vrcp.f32 %v1699_v22  ;;  %v1700_v35 = vadd.f32 1.0, %v6690_v52  ;;  %v6692_v6 = vpop.eup %6691  ;;  %v7852_v22 = vld [vmem:[#allocation11 + $0xac] ss:$16 sps:$4 sm:$0xff]   ;;  %v7862_v52 = vld [vmem:[#allocation11 + $0xc4] ss:$16 sps:$4 sm:$0xff]  }
 0x3c4   :  { %6701 = vrcp.f32 %v1711_v43  ;;  %v1712_v7 = vadd.f32 1.0, %v6692_v6  ;;  %v6694_v9 = vpop.eup %6693  ;;  %v7858_v43 = vld [vmem:[#allocation11 + $0xa8] ss:$16 sps:$4 sm:$0xff]   ;;  %v7868_v6 = vld [vmem:[#allocation11 + $0xc0] ss:$16 sps:$4 sm:$0xff]  }
 0x3c5   :  { %6703 = vpow2.f32 %v5705_v37  ;;  %v6696_v11 = vpop.eup %6695  ;;  %v7856_v37 = vld [vmem:[#allocation11 + $0xa0] ss:$16 sps:$4 sm:$0xff]  }
 0x3c6   :  { %6705 = vrcp.f32 %v1700_v35  ;;  %v6698_v34 = vpop.eup %6697  ;;  %v1725_v36 = vadd.f32 1.0, %v6696_v11  ;;  %v7864_v35 = vld [vmem:[#allocation11 + $0xcc] ss:$16 sps:$4 sm:$0xff]  }
 0x3c7   :  { %6707 = vrcp.f32 %v1712_v7  ;;  %v7870_v7 = vld [vmem:[#allocation11 + $0xc8] ss:$16 sps:$4 sm:$0xff]   ;;  %v7876_v11 = vld [vmem:[#allocation11 + $0xec] ss:$16 sps:$4 sm:$0xff]  }
 0x3c8   :  { %6709 = vrcp.f32 %v1725_v36 }
 0x3cd   :  { %v6700_v18 = vpop.eup %6699 }
 0x3ce   :  { %v6702_v21 = vpop.eup %6701  ;;  %v1733_v25 = vmul.f32 %v6700_v18, %v6694_v9  ;;  %v7874_v9 = vld [vmem:[#allocation11 + $0xe4] ss:$16 sps:$4 sm:$0xff]   ;;  %v7882_v18 = vld [vmem:[#allocation11 + $0xe8] ss:$16 sps:$4 sm:$0xff]  }
 0x3cf   :  { %v6704_v14 = vpop.eup %6703  ;;  %v1731_v23 = vmul.f32 %v6702_v21, %v7726_v24 }
 0x3d0   :  { %v6706_v27 = vpop.eup %6705  ;;  %v1726_v31 = vadd.f32 1.0, %v6704_v14 }
 0x3d1   :  { %v7788_v40 = vadd.f32 %v1733_v25, %v1731_v23  ;;  %v1734_v8 = vmul.f32 %v6706_v27, %v6698_v34  ;;  %v6708_v30 = vpop.eup %6707  ;;  %v7880_v34 = vld [vmem:[#allocation11 + $0xe0] ss:$16 sps:$4 sm:$0xff]  }
 0x3d2   :  { %v1732_v26 = vmul.f32 %v6708_v30, %v7730_v19  ;;  %v6710_v44 = vpop.eup %6709  ;;  %v7804_v19 = vld [vmem:[#allocation11 + $0xc] ss:$16 sps:$4 sm:$0xff]  }
 0x3d3   :  { %6711 = vtanh.f32 %v7788_v40  ;;  %2338 = vmatprep.subr.bf16.mxu1 %v7804_v19 }
 0x3d4   :  { %v7792_v41 = vadd.f32 %v1734_v8, %v1732_v26  ;;  %6713 = vrcp.f32 %v1726_v31 }
 0x3d6   :  { %6715 = vtanh.f32 %v7792_v41 }
 0x3dd   :  { %v6712_v45 = vpop.eup %6711 }
 0x3de   :  { %v6714_v24 = vpop.eup %6713  ;;  %v1739_v48 = vmul.f32 %v6712_v45, %v6710_v44 }
 0x3e0   :  { %v6716_v47 = vpop.eup %6715 }
 0x3e1   :  { %v1740_v49 = vmul.f32 %v6716_v47, %v6714_v24 }
 0x3e3   :  { %v7795_v50 = vpack.c.bf16 %v1740_v49, %v1739_v48 }
 0x3e5   :  { %1980 = vmatmul.mubr.bf16.vlgmr.msra.gmra.mrb[12].mxu0 %v7795_v50  ;;  %2023 = vmatmul.mubr.bf16.vlgmr.msra.gmra.mrb[12].mxu1 %v7795_v50 }
 0x3e6   :  { %2296 = vmatpush1.bf16.msra.mxu0 %v7756_v39  ;;  %2327 = vmatprep.mubr.bf16.mxu0 %v7349_v0 }
 0x3e7   :  { %2297 = vmatprep.subr.bf16.mxu0 %v7760_v42  ;;  %2370 = vmatprep.mubr.bf16.mxu1 %v7349_v0 }
 0x3e8   :  { %2339 = vmatpush1.bf16.msra.mxu1 %v7806_v51 }
 0x3e9   :  { %2340 = vmatprep.subr.bf16.mxu1 %v7810_v53 }
 0x3ea   :  { %2298 = vmatpush1.bf16.msra.mxu0 %v7762_v46 }
 0x3eb   :  { %2299 = vmatprep.subr.bf16.mxu0 %v7816_v55 }
 0x3ec   :  { %2341 = vmatpush1.bf16.msra.mxu1 %v7812_v54 }
 0x3ed   :  { %2342 = vmatprep.subr.bf16.mxu1 %v7818_v56 }
 0x3ee   :  { %2300 = vmatpush1.bf16.msra.mxu0 %v7820_v57 }
 0x3ef   :  { %2301 = vmatprep.subr.bf16.mxu0 %v7828_v59 }
 0x3f0   :  { %2343 = vmatpush1.bf16.msra.mxu1 %v7822_v58 }
 0x3f1   :  { %2344 = vmatprep.subr.bf16.mxu1 %v7830_v60 }
 0x3f2   :  { %2302 = vmatpush1.bf16.msra.mxu0 %v7832_v62 }
 0x3f3   :  { %2303 = vmatprep.subr.bf16.mxu0 %v7840_v1 }
 0x3f4   :  { %2345 = vmatpush1.bf16.msra.mxu1 %v7834_v63 }
 0x3f5   :  { %2346 = vmatprep.subr.bf16.mxu1 %v7842_v2 }
 0x3f6   :  { %2304 = vmatpush1.bf16.msra.mxu0 %v7844_v3 }
 0x3f7   :  { %2305 = vmatprep.subr.bf16.mxu0 %v7850_v5 }
 0x3f8   :  { %2347 = vmatpush1.bf16.msra.mxu1 %v7846_v4 }
 0x3f9   :  { %2348 = vmatprep.subr.bf16.mxu1 %v7852_v22 }
 0x3fa   :  { %2306 = vmatpush1.bf16.msra.mxu0 %v7856_v37 }
 0x3fb   :  { %2307 = vmatprep.subr.bf16.mxu0 %v7862_v52 }
 0x3fc   :  { %2349 = vmatpush1.bf16.msra.mxu1 %v7858_v43 }
 0x3fd   :  { %2350 = vmatprep.subr.bf16.mxu1 %v7864_v35 }
 0x3fe   :  { %2308 = vmatpush1.bf16.msra.mxu0 %v7868_v6 }
 0x3ff   :  { %2309 = vmatprep.subr.bf16.mxu0 %v7874_v9 }
 0x400   :  { %2351 = vmatpush1.bf16.msra.mxu1 %v7870_v7 }
 0x401   :  { %2352 = vmatprep.subr.bf16.mxu1 %v7876_v11 }
 0x402   :  { %2310 = vmatpush1.bf16.msra.mxu0 %v7880_v34 }
 0x403   :  { %2643 = vmatprep.subr.bf16.mxu0 %v7754_v38 }
 0x404   :  { %2353 = vmatpush1.bf16.msra.mxu1 %v7882_v18 }
 0x405   :  { %2686 = vmatprep.subr.bf16.mxu1 %v7804_v19 }
 0x4b8   :  { %v1981_v21 = vpop.f32.mrb[12].mxu0  ;;  %v2024_v25 = vpop.f32.mrb[12].mxu1 }
 0x4b9   :  { %v6108_v14 = vadd.f32 %v1981_v21, %v7650_v16  ;;  %v1983_v23 = vpop.f32.mrb[13].mxu0  ;;  %v2026_v27 = vpop.f32.mrb[13].mxu1 }
 0x4ba   :  { %v6109_v36 = vadd.f32 %v1983_v23, %v7654_v17  ;;  %v1985_v8 = vpop.f32.mrb[14].mxu0  ;;  %v2028_v30 = vpop.f32.mrb[14].mxu1  ;;  %v6141_v21 = vadd.f32 %v2026_v27, %v7663_v33  ;;  %v6140_v23 = vadd.f32 %v2024_v25, %v7668_v61 }
 0x4bb   :  { %v5738_v31 = vmul.f32 -1.442695, %v6108_v14  ;;  %v6110_v26 = vadd.f32 %v1985_v8, %v7650_v16  ;;  %v1987_v44 = vpop.f32.mrb[15].mxu0  ;;  %v2030_v45 = vpop.f32.mrb[15].mxu1  ;;  %v6142_v8 = vadd.f32 %v2028_v30, %v7668_v61 }
 0x4bc   :  { %v5740_v24 = vmul.f32 -1.442695, %v6109_v36  ;;  %v6111_v47 = vadd.f32 %v1987_v44, %v7654_v17  ;;  %v5742_v28 = vmul.f32 -1.442695, %v6141_v21  ;;  %v6143_v14 = vadd.f32 %v2030_v45, %v7663_v33 }
 0x4bd   :  { %6717 = vpow2.f32 %v5738_v31  ;;  %v5739_v48 = vmul.f32 -1.442695, %v6110_v26 }
 0x4be   :  { %6719 = vpow2.f32 %v5740_v24  ;;  %v5741_v49 = vmul.f32 -1.442695, %v6111_v47  ;;  %v5743_v31 = vmul.f32 -1.442695, %v6143_v14 }
 0x4bf   :  { %6721 = vpow2.f32 %v5739_v48 }
 0x4c0   :  { %6723 = vpow2.f32 %v5741_v49 }
 0x4c1   :  { %6725 = vtanh.f32 %v6140_v23 }
 0x4c2   :  { %6727 = vpow2.f32 %v5742_v28 }
 0x4c3   :  { %6729 = vtanh.f32 %v6142_v8 }
 0x4c7   :  { %v6718_v20 = vpop.eup %6717 }
 0x4c8   :  { %v6720_v36 = vpop.eup %6719  ;;  %v2047_v15 = vadd.f32 1.0, %v6718_v20 }
 0x4c9   :  { %v2059_v26 = vadd.f32 1.0, %v6720_v36  ;;  %v6722_v44 = vpop.eup %6721 }
 0x4ca   :  { %6731 = vrcp.f32 %v2047_v15  ;;  %v2048_v27 = vadd.f32 1.0, %v6722_v44  ;;  %v6724_v24 = vpop.eup %6723 }
 0x4cb   :  { %6733 = vrcp.f32 %v2059_v26  ;;  %v2060_v25 = vadd.f32 1.0, %v6724_v24  ;;  %v6726_v45 = vpop.eup %6725 }
 0x4cc   :  { %6735 = vpow2.f32 %v5743_v31  ;;  %v6728_v47 = vpop.eup %6727 }
 0x4cd   :  { %6737 = vrcp.f32 %v2048_v27  ;;  %v6730_v30 = vpop.eup %6729  ;;  %v2073_v14 = vadd.f32 1.0, %v6728_v47 }
 0x4ce   :  { %6739 = vrcp.f32 %v2060_v25 }
 0x4cf   :  { %6741 = vrcp.f32 %v2073_v14 }
 0x4d4   :  { %v6732_v48 = vpop.eup %6731 }
 0x4d5   :  { %v6734_v49 = vpop.eup %6733  ;;  %v2081_v21 = vmul.f32 %v6732_v48, %v6726_v45 }
 0x4d6   :  { %v6736_v20 = vpop.eup %6735  ;;  %v2079_v28 = vmul.f32 %v6734_v49, %v7788_v40 }
 0x4d7   :  { %v6738_v23 = vpop.eup %6737  ;;  %v2074_v26 = vadd.f32 1.0, %v6736_v20 }
 0x4d8   :  { %v7899_v8 = vadd.f32 %v2081_v21, %v2079_v28  ;;  %v2082_v15 = vmul.f32 %v6738_v23, %v6730_v30  ;;  %v6740_v36 = vpop.eup %6739 }
 0x4d9   :  { %v2080_v31 = vmul.f32 %v6740_v36, %v7792_v41  ;;  %v6742_v27 = vpop.eup %6741 }
 0x4da   :  { %6743 = vtanh.f32 %v7899_v8 }
 0x4db   :  { %v7903_v44 = vadd.f32 %v2082_v15, %v2080_v31  ;;  %6745 = vrcp.f32 %v2074_v26 }
 0x4dd   :  { %6747 = vtanh.f32 %v7903_v44 }
 0x4e4   :  { %v6744_v24 = vpop.eup %6743 }
 0x4e5   :  { %v6746_v40 = vpop.eup %6745  ;;  %v2087_v45 = vmul.f32 %v6744_v24, %v6742_v27 }
 0x4e7   :  { %v6748_v25 = vpop.eup %6747 }
 0x4e8   :  { %v2088_v47 = vmul.f32 %v6748_v25, %v6746_v40 }
 0x4ea   :  { %v7906_v48 = vpack.c.bf16 %v2088_v47, %v2087_v45 }
 0x4ec   :  { %2328 = vmatmul.mubr.bf16.vlgmr.msra.gmra.mrb[16].mxu0 %v7906_v48  ;;  %2371 = vmatmul.mubr.bf16.vlgmr.msra.gmra.mrb[16].mxu1 %v7906_v48 }
 0x4ed   :  { %2644 = vmatpush1.bf16.msra.mxu0 %v7756_v39  ;;  %2687 = vmatpush1.bf16.msra.mxu1 %v7806_v51 }
 0x4ee   :  { %2645 = vmatprep.subr.bf16.mxu0 %v7760_v42  ;;  %2688 = vmatprep.subr.bf16.mxu1 %v7810_v53 }
 0x4ef   :  { %2675 = vmatprep.mubr.bf16.mxu0 %v7349_v0  ;;  %2718 = vmatprep.mubr.bf16.mxu1 %v7349_v0 }
 0x4f1   :  { %2646 = vmatpush1.bf16.msra.mxu0 %v7762_v46  ;;  %2689 = vmatpush1.bf16.msra.mxu1 %v7812_v54 }
 0x4f2   :  { %2647 = vmatprep.subr.bf16.mxu0 %v7816_v55  ;;  %2690 = vmatprep.subr.bf16.mxu1 %v7818_v56 }
 0x4f5   :  { %2648 = vmatpush1.bf16.msra.mxu0 %v7820_v57  ;;  %2691 = vmatpush1.bf16.msra.mxu1 %v7822_v58 }
 0x4f6   :  { %2649 = vmatprep.subr.bf16.mxu0 %v7828_v59  ;;  %2692 = vmatprep.subr.bf16.mxu1 %v7830_v60 }
 0x4f9   :  { %2650 = vmatpush1.bf16.msra.mxu0 %v7832_v62  ;;  %2693 = vmatpush1.bf16.msra.mxu1 %v7834_v63 }
 0x4fa   :  { %2651 = vmatprep.subr.bf16.mxu0 %v7840_v1  ;;  %2694 = vmatprep.subr.bf16.mxu1 %v7842_v2 }
 0x4fd   :  { %2652 = vmatpush1.bf16.msra.mxu0 %v7844_v3  ;;  %2695 = vmatpush1.bf16.msra.mxu1 %v7846_v4 }
 0x4fe   :  { %2653 = vmatprep.subr.bf16.mxu0 %v7850_v5  ;;  %2696 = vmatprep.subr.bf16.mxu1 %v7852_v22 }
 0x501   :  { %2654 = vmatpush1.bf16.msra.mxu0 %v7856_v37  ;;  %2697 = vmatpush1.bf16.msra.mxu1 %v7858_v43 }
 0x502   :  { %2655 = vmatprep.subr.bf16.mxu0 %v7862_v52  ;;  %2698 = vmatprep.subr.bf16.mxu1 %v7864_v35 }
 0x505   :  { %2656 = vmatpush1.bf16.msra.mxu0 %v7868_v6  ;;  %2699 = vmatpush1.bf16.msra.mxu1 %v7870_v7 }
 0x506   :  { %2657 = vmatprep.subr.bf16.mxu0 %v7874_v9  ;;  %2700 = vmatprep.subr.bf16.mxu1 %v7876_v11 }
 0x509   :  { %2658 = vmatpush1.bf16.msra.mxu0 %v7880_v34  ;;  %2701 = vmatpush1.bf16.msra.mxu1 %v7882_v18 }
 0x50a   :  { %2991 = vmatprep.subr.bf16.mxu0 %v7754_v38  ;;  %3034 = vmatprep.subr.bf16.mxu1 %v7804_v19 }
 0x5bf   :  { %v2329_v41 = vpop.f32.mrb[16].mxu0  ;;  %v2372_v30 = vpop.f32.mrb[16].mxu1 }
 0x5c0   :  { %v6112_v49 = vadd.f32 %v2329_v41, %v7650_v16  ;;  %v2331_v21 = vpop.f32.mrb[17].mxu0  ;;  %v2374_v20 = vpop.f32.mrb[17].mxu1  ;;  %v6144_v45 = vadd.f32 %v2372_v30, %v7668_v61 }
 0x5c1   :  { %v6113_v28 = vadd.f32 %v2331_v21, %v7654_v17  ;;  %v2333_v23 = vpop.f32.mrb[18].mxu0  ;;  %v2376_v14 = vpop.f32.mrb[18].mxu1  ;;  %v6145_v25 = vadd.f32 %v2374_v20, %v7663_v33 }
 0x5c2   :  { %v5776_v15 = vmul.f32 -1.442695, %v6112_v49  ;;  %v6114_v36 = vadd.f32 %v2333_v23, %v7650_v16  ;;  %v2335_v26 = vpop.f32.mrb[19].mxu0  ;;  %v2378_v31 = vpop.f32.mrb[19].mxu1  ;;  %v6146_v49 = vadd.f32 %v2376_v14, %v7668_v61 }
 0x5c3   :  { %v5778_v27 = vmul.f32 -1.442695, %v6113_v28  ;;  %v6115_v38 = vadd.f32 %v2335_v26, %v7654_v17  ;;  %v5780_v47 = vmul.f32 -1.442695, %v6145_v25  ;;  %v6147_v41 = vadd.f32 %v2378_v31, %v7663_v33 }
 0x5c4   :  { %6749 = vpow2.f32 %v5776_v15  ;;  %v5777_v24 = vmul.f32 -1.442695, %v6114_v36 }
 0x5c5   :  { %6751 = vpow2.f32 %v5778_v27  ;;  %v5779_v40 = vmul.f32 -1.442695, %v6115_v38  ;;  %v5781_v15 = vmul.f32 -1.442695, %v6147_v41 }
 0x5c6   :  { %6753 = vpow2.f32 %v5777_v24 }
 0x5c7   :  { %6755 = vpow2.f32 %v5779_v40 }
 0x5c8   :  { %6757 = vtanh.f32 %v6144_v45 }
 0x5c9   :  { %6759 = vpow2.f32 %v5780_v47 }
 0x5ca   :  { %6761 = vtanh.f32 %v6146_v49 }
 0x5ce   :  { %v6750_v21 = vpop.eup %6749 }
 0x5cf   :  { %v6752_v28 = vpop.eup %6751  ;;  %v2395_v23 = vadd.f32 1.0, %v6750_v21 }
 0x5d0   :  { %v2407_v36 = vadd.f32 1.0, %v6752_v28  ;;  %v6754_v26 = vpop.eup %6753 }
 0x5d1   :  { %6763 = vrcp.f32 %v2395_v23  ;;  %v2396_v20 = vadd.f32 1.0, %v6754_v26  ;;  %v6756_v27 = vpop.eup %6755 }
 0x5d2   :  { %6765 = vrcp.f32 %v2407_v36  ;;  %v2408_v30 = vadd.f32 1.0, %v6756_v27  ;;  %v6758_v31 = vpop.eup %6757 }
 0x5d3   :  { %6767 = vpow2.f32 %v5781_v15  ;;  %v6760_v38 = vpop.eup %6759 }
 0x5d4   :  { %6769 = vrcp.f32 %v2396_v20  ;;  %v6762_v14 = vpop.eup %6761  ;;  %v2421_v49 = vadd.f32 1.0, %v6760_v38 }
 0x5d5   :  { %6771 = vrcp.f32 %v2408_v30 }
 0x5d6   :  { %6773 = vrcp.f32 %v2421_v49 }
 0x5db   :  { %v6764_v24 = vpop.eup %6763 }
 0x5dc   :  { %v6766_v40 = vpop.eup %6765  ;;  %v2429_v25 = vmul.f32 %v6764_v24, %v6758_v31 }
 0x5dd   :  { %v6768_v45 = vpop.eup %6767  ;;  %v2427_v47 = vmul.f32 %v6766_v40, %v7899_v8 }
 0x5de   :  { %v6770_v41 = vpop.eup %6769  ;;  %v2422_v36 = vadd.f32 1.0, %v6768_v45 }
 0x5df   :  { %v7953_v21 = vadd.f32 %v2429_v25, %v2427_v47  ;;  %v2430_v28 = vmul.f32 %v6770_v41, %v6762_v14  ;;  %v6772_v23 = vpop.eup %6771 }
 0x5e0   :  { %v2428_v15 = vmul.f32 %v6772_v23, %v7903_v44  ;;  %v6774_v20 = vpop.eup %6773 }
 0x5e1   :  { %6775 = vtanh.f32 %v7953_v21 }
 0x5e2   :  { %v7957_v26 = vadd.f32 %v2430_v28, %v2428_v15  ;;  %6777 = vrcp.f32 %v2422_v36 }
 0x5e4   :  { %6779 = vtanh.f32 %v7957_v26 }
 0x5eb   :  { %v6776_v27 = vpop.eup %6775 }
 0x5ec   :  { %v6778_v8 = vpop.eup %6777  ;;  %v2435_v31 = vmul.f32 %v6776_v27, %v6774_v20 }
 0x5ee   :  { %v6780_v30 = vpop.eup %6779 }
 0x5ef   :  { %v2436_v38 = vmul.f32 %v6780_v30, %v6778_v8 }
 0x5f1   :  { %v7960_v24 = vpack.c.bf16 %v2436_v38, %v2435_v31 }
 0x5f3   :  { %2676 = vmatmul.mubr.bf16.vlgmr.msra.gmra.mrb[20].mxu0 %v7960_v24  ;;  %2719 = vmatmul.mubr.bf16.vlgmr.msra.gmra.mrb[20].mxu1 %v7960_v24 }
 0x5f4   :  { %2992 = vmatpush1.bf16.msra.mxu0 %v7756_v39  ;;  %3035 = vmatpush1.bf16.msra.mxu1 %v7806_v51 }
 0x5f5   :  { %2993 = vmatprep.subr.bf16.mxu0 %v7760_v42  ;;  %3036 = vmatprep.subr.bf16.mxu1 %v7810_v53 }
 0x5f6   :  { %3023 = vmatprep.mubr.bf16.mxu0 %v7349_v0  ;;  %3066 = vmatprep.mubr.bf16.mxu1 %v7349_v0 }
 0x5f8   :  { %2994 = vmatpush1.bf16.msra.mxu0 %v7762_v46  ;;  %3037 = vmatpush1.bf16.msra.mxu1 %v7812_v54 }
 0x5f9   :  { %2995 = vmatprep.subr.bf16.mxu0 %v7816_v55  ;;  %3038 = vmatprep.subr.bf16.mxu1 %v7818_v56 }
 0x5fc   :  { %2996 = vmatpush1.bf16.msra.mxu0 %v7820_v57  ;;  %3039 = vmatpush1.bf16.msra.mxu1 %v7822_v58 }
 0x5fd   :  { %2997 = vmatprep.subr.bf16.mxu0 %v7828_v59  ;;  %3040 = vmatprep.subr.bf16.mxu1 %v7830_v60 }
 0x600   :  { %2998 = vmatpush1.bf16.msra.mxu0 %v7832_v62  ;;  %3041 = vmatpush1.bf16.msra.mxu1 %v7834_v63 }
 0x601   :  { %2999 = vmatprep.subr.bf16.mxu0 %v7840_v1  ;;  %3042 = vmatprep.subr.bf16.mxu1 %v7842_v2 }
 0x604   :  { %3000 = vmatpush1.bf16.msra.mxu0 %v7844_v3  ;;  %3043 = vmatpush1.bf16.msra.mxu1 %v7846_v4 }
 0x605   :  { %3001 = vmatprep.subr.bf16.mxu0 %v7850_v5  ;;  %3044 = vmatprep.subr.bf16.mxu1 %v7852_v22 }
 0x608   :  { %3002 = vmatpush1.bf16.msra.mxu0 %v7856_v37  ;;  %3045 = vmatpush1.bf16.msra.mxu1 %v7858_v43 }
 0x609   :  { %3003 = vmatprep.subr.bf16.mxu0 %v7862_v52  ;;  %3046 = vmatprep.subr.bf16.mxu1 %v7864_v35 }
 0x60c   :  { %3004 = vmatpush1.bf16.msra.mxu0 %v7868_v6  ;;  %3047 = vmatpush1.bf16.msra.mxu1 %v7870_v7 }
 0x60d   :  { %3005 = vmatprep.subr.bf16.mxu0 %v7874_v9  ;;  %3048 = vmatprep.subr.bf16.mxu1 %v7876_v11 }
 0x610   :  { %3006 = vmatpush1.bf16.msra.mxu0 %v7880_v34  ;;  %3049 = vmatpush1.bf16.msra.mxu1 %v7882_v18 }
 0x611   :  { %3382 = vmatprep.subr.bf16.mxu1 %v7804_v19 }
 0x6c6   :  { %v2677_v39 = vpop.f32.mrb[20].mxu0  ;;  %v2720_v42 = vpop.f32.mrb[20].mxu1 }
 0x6c7   :  { %v6116_v46 = vadd.f32 %v2677_v39, %v7650_v16  ;;  %v2679_v44 = vpop.f32.mrb[21].mxu0  ;;  %v2722_v14 = vpop.f32.mrb[21].mxu1  ;;  %v6148_v27 = vadd.f32 %v2720_v42, %v7668_v61 }
 0x6c8   :  { %v6117_v40 = vadd.f32 %v2679_v44, %v7654_v17  ;;  %v2681_v25 = vpop.f32.mrb[22].mxu0  ;;  %v2724_v45 = vpop.f32.mrb[22].mxu1  ;;  %v6149_v20 = vadd.f32 %v2722_v14, %v7663_v33 }
 0x6c9   :  { %v5814_v47 = vmul.f32 -1.442695, %v6116_v46  ;;  %v6118_v41 = vadd.f32 %v2681_v25, %v7650_v16  ;;  %v2683_v49 = vpop.f32.mrb[23].mxu0  ;;  %v2726_v28 = vpop.f32.mrb[23].mxu1  ;;  %v6150_v31 = vadd.f32 %v2724_v45, %v7668_v61 }
 0x6ca   :  { %v5816_v23 = vmul.f32 -1.442695, %v6117_v40  ;;  %v6119_v36 = vadd.f32 %v2683_v49, %v7654_v17  ;;  %v5818_v8 = vmul.f32 -1.442695, %v6149_v20  ;;  %v6151_v30 = vadd.f32 %v2726_v28, %v7663_v33 }
 0x6cb   :  { %6781 = vpow2.f32 %v5814_v47  ;;  %v5815_v19 = vmul.f32 -1.442695, %v6118_v41 }
 0x6cc   :  { %6783 = vpow2.f32 %v5816_v23  ;;  %v5817_v15 = vmul.f32 -1.442695, %v6119_v36  ;;  %v5819_v44 = vmul.f32 -1.442695, %v6151_v30 }
 0x6cd   :  { %6785 = vpow2.f32 %v5815_v19 }
 0x6ce   :  { %6787 = vpow2.f32 %v5817_v15 }
 0x6cf   :  { %6789 = vtanh.f32 %v6148_v27 }
 0x6d0   :  { %6791 = vpow2.f32 %v5818_v8 }
 0x6d1   :  { %6793 = vtanh.f32 %v6150_v31 }
 0x6d5   :  { %v6782_v38 = vpop.eup %6781 }
 0x6d6   :  { %v6784_v39 = vpop.eup %6783  ;;  %v2743_v46 = vadd.f32 1.0, %v6782_v38 }
 0x6d7   :  { %v2755_v40 = vadd.f32 1.0, %v6784_v39  ;;  %v6786_v25 = vpop.eup %6785 }
 0x6d8   :  { %6795 = vrcp.f32 %v2743_v46  ;;  %v2744_v14 = vadd.f32 1.0, %v6786_v25  ;;  %v6788_v47 = vpop.eup %6787 }
 0x6d9   :  { %6797 = vrcp.f32 %v2755_v40  ;;  %v2756_v42 = vadd.f32 1.0, %v6788_v47  ;;  %v6790_v41 = vpop.eup %6789 }
 0x6da   :  { %6799 = vpow2.f32 %v5819_v44  ;;  %v6792_v49 = vpop.eup %6791 }
 0x6db   :  { %6801 = vrcp.f32 %v2744_v14  ;;  %v6794_v45 = vpop.eup %6793  ;;  %v2769_v27 = vadd.f32 1.0, %v6792_v49 }
 0x6dc   :  { %6803 = vrcp.f32 %v2756_v42 }
 0x6dd   :  { %6805 = vrcp.f32 %v2769_v27 }
 0x6e2   :  { %v6796_v28 = vpop.eup %6795 }
 0x6e3   :  { %v6798_v23 = vpop.eup %6797  ;;  %v2777_v36 = vmul.f32 %v6796_v28, %v6790_v41 }
 0x6e4   :  { %v6800_v19 = vpop.eup %6799  ;;  %v2775_v15 = vmul.f32 %v6798_v23, %v7953_v21 }
 0x6e5   :  { %v6802_v20 = vpop.eup %6801  ;;  %v2770_v38 = vadd.f32 1.0, %v6800_v19 }
 0x6e6   :  { %v8006_v8 = vadd.f32 %v2777_v36, %v2775_v15  ;;  %v2778_v30 = vmul.f32 %v6802_v20, %v6794_v45  ;;  %v6804_v31 = vpop.eup %6803 }
 0x6e7   :  { %v2776_v39 = vmul.f32 %v6804_v31, %v7957_v26  ;;  %v6806_v44 = vpop.eup %6805 }
 0x6e8   :  { %6807 = vtanh.f32 %v8006_v8 }
 0x6e9   :  { %v8010_v46 = vadd.f32 %v2778_v30, %v2776_v39  ;;  %6809 = vrcp.f32 %v2770_v38 }
 0x6eb   :  { %6811 = vtanh.f32 %v8010_v46 }
 0x6f2   :  { %v6808_v40 = vpop.eup %6807 }
 0x6f3   :  { %v6810_v21 = vpop.eup %6809  ;;  %v2783_v14 = vmul.f32 %v6808_v40, %v6806_v44 }
 0x6f5   :  { %v6812_v25 = vpop.eup %6811 }
 0x6f6   :  { %v2784_v47 = vmul.f32 %v6812_v25, %v6810_v21 }
 0x6f8   :  { %v8013_v42 = vpack.c.bf16 %v2784_v47, %v2783_v14 }
 0x6fa   :  { %3024 = vmatmul.mubr.bf16.vlgmr.msra.gmra.mrb[24].mxu0 %v8013_v42  ;;  %3067 = vmatmul.mubr.bf16.vlgmr.msra.gmra.mrb[24].mxu1 %v8013_v42 }
 0x6fb   :  { %3383 = vmatpush1.bf16.msra.mxu1 %v7806_v51  ;;  %3371 = vmatprep.mubr.bf16.mxu0 %v7349_v0  ;;  %v6521_v51 = vld [vmem:[#allocation11 + $0x4] ss:$16 sps:$4 sm:$0xff]  }
 0x6fc   :  { %3384 = vmatprep.subr.bf16.mxu1 %v7810_v53  ;;  %3414 = vmatprep.mubr.bf16.mxu1 %v7349_v0  ;;  %v6519_v53 = vld [vmem:[#allocation11] ss:$16 sps:$4 sm:$0xff]  }
 0x6fd   :  { %3339 = vmatprep.subr.bf16.mxu0 %v6521_v51 }
 0x6fe   :  { %3340 = vmatpush1.bf16.msra.mxu0 %v6519_v53 }
 0x6ff   :  { %3385 = vmatpush1.bf16.msra.mxu1 %v7812_v54  ;;  %v6524_v54 = vld [vmem:[#allocation11 + $0x24] ss:$16 sps:$4 sm:$0xff]  }
 0x700   :  { %3386 = vmatprep.subr.bf16.mxu1 %v7818_v56  ;;  %v6522_v56 = vld [vmem:[#allocation11 + $0x20] ss:$16 sps:$4 sm:$0xff]   ;;  %3341 = vmatprep.subr.bf16.mxu0 %v6524_v54 }
 0x702   :  { %3342 = vmatpush1.bf16.msra.mxu0 %v6522_v56 }
 0x703   :  { %3387 = vmatpush1.bf16.msra.mxu1 %v7822_v58  ;;  %3343 = vmatprep.subr.bf16.mxu0 %v7816_v55  ;;  %v6530_v58 = vld [vmem:[#allocation12 + $0xc] ss:$16 sps:$4 sm:$0xff]   ;;  %v6527_v55 = vld [vmem:[#allocation12 + $0x4] ss:$16 sps:$4 sm:$0xff]  }
 0x704   :  { %3388 = vmatprep.subr.bf16.mxu1 %v7830_v60 }
 0x706   :  { %3344 = vmatpush1.bf16.msra.mxu0 %v7820_v57 }
 0x707   :  { %3389 = vmatpush1.bf16.msra.mxu1 %v7834_v63  ;;  %3345 = vmatprep.subr.bf16.mxu0 %v7828_v59 }
 0x708   :  { %3390 = vmatprep.subr.bf16.mxu1 %v7842_v2 }
 0x70a   :  { %3346 = vmatpush1.bf16.msra.mxu0 %v7832_v62 }
 0x70b   :  { %3391 = vmatpush1.bf16.msra.mxu1 %v7846_v4  ;;  %3347 = vmatprep.subr.bf16.mxu0 %v7840_v1 }
 0x70c   :  { %3392 = vmatprep.subr.bf16.mxu1 %v7852_v22 }
 0x70e   :  { %3348 = vmatpush1.bf16.msra.mxu0 %v7844_v3 }
 0x70f   :  { %3393 = vmatpush1.bf16.msra.mxu1 %v7858_v43  ;;  %3349 = vmatprep.subr.bf16.mxu0 %v7850_v5 }
 0x710   :  { %3394 = vmatprep.subr.bf16.mxu1 %v7864_v35 }
 0x712   :  { %3350 = vmatpush1.bf16.msra.mxu0 %v7856_v37 }
 0x713   :  { %3395 = vmatpush1.bf16.msra.mxu1 %v7870_v7  ;;  %3351 = vmatprep.subr.bf16.mxu0 %v7862_v52 }
 0x714   :  { %3396 = vmatprep.subr.bf16.mxu1 %v7876_v11 }
 0x716   :  { %3352 = vmatpush1.bf16.msra.mxu0 %v7868_v6 }
 0x717   :  { %3397 = vmatpush1.bf16.msra.mxu1 %v7882_v18  ;;  %3353 = vmatprep.subr.bf16.mxu0 %v7874_v9 }
 0x718   :  { %3823 = vmatprep.subr.bf16.mxu1 %v6530_v58 }
 0x71a   :  { %3354 = vmatpush1.bf16.msra.mxu0 %v7880_v34 }
 0x71b   :  { %3710 = vmatprep.subr.bf16.mxu0 %v6527_v55 }
 0x7cd   :  { %v3025_v57 = vpop.f32.mrb[24].mxu0  ;;  %v3068_v59 = vpop.f32.mrb[24].mxu1 }
 0x7ce   :  { %v6120_v60 = vadd.f32 %v3025_v57, %v7650_v16  ;;  %v3027_v62 = vpop.f32.mrb[25].mxu0  ;;  %v3070_v63 = vpop.f32.mrb[25].mxu1  ;;  %v6152_v9 = vadd.f32 %v3068_v59, %v7668_v61 }
 0x7cf   :  { %v6121_v1 = vadd.f32 %v3027_v62, %v7654_v17  ;;  %v3029_v2 = vpop.f32.mrb[26].mxu0  ;;  %v3072_v3 = vpop.f32.mrb[26].mxu1  ;;  %v6153_v7 = vadd.f32 %v3070_v63, %v7663_v33  ;;  %v6525_v62 = vld [vmem:[#allocation12] ss:$16 sps:$4 sm:$0xff]   ;;  %v6528_v63 = vld [vmem:[#allocation12 + $0x8] ss:$16 sps:$4 sm:$0xff]  }
 0x7d0   :  { %v5852_v4 = vmul.f32 -1.442695, %v6120_v60  ;;  %v6122_v5 = vadd.f32 %v3029_v2, %v7650_v16  ;;  %v3031_v22 = vpop.f32.mrb[27].mxu0  ;;  %v3074_v37 = vpop.f32.mrb[27].mxu1  ;;  %v6154_v18 = vadd.f32 %v3072_v3, %v7668_v61  ;;  %v6533_v2 = vld [vmem:[#allocation12 + $0x24] ss:$16 sps:$4 sm:$0xff]  }
 0x7d1   :  { %v5854_v43 = vmul.f32 -1.442695, %v6121_v1  ;;  %v6123_v52 = vadd.f32 %v3031_v22, %v7654_v17  ;;  %v5856_v11 = vmul.f32 -1.442695, %v6153_v7  ;;  %v6155_v34 = vadd.f32 %v3074_v37, %v7663_v33  ;;  %v6531_v3 = vld [vmem:[#allocation12 + $0x20] ss:$16 sps:$4 sm:$0xff]  }
 0x7d2   :  { %6813 = vpow2.f32 %v5852_v4  ;;  %v5853_v35 = vmul.f32 -1.442695, %v6122_v5  ;;  %v6534_v4 = vld [vmem:[#allocation12 + $0x28] ss:$16 sps:$4 sm:$0xff]   ;;  %v6539_v5 = vld [vmem:[#allocation12 + $0x44] ss:$16 sps:$4 sm:$0xff]  }
 0x7d3   :  { %6815 = vpow2.f32 %v5854_v43  ;;  %v5855_v6 = vmul.f32 -1.442695, %v6123_v52  ;;  %v5857_v45 = vmul.f32 -1.442695, %v6155_v34  ;;  %v6542_v22 = vld [vmem:[#allocation12 + $0x4c] ss:$16 sps:$4 sm:$0xff]  }
 0x7d4   :  { %6817 = vpow2.f32 %v5853_v35  ;;  %v6537_v37 = vld [vmem:[#allocation12 + $0x40] ss:$16 sps:$4 sm:$0xff]   ;;  %v6540_v43 = vld [vmem:[#allocation12 + $0x48] ss:$16 sps:$4 sm:$0xff]   ;;  %v6545_v52 = vld [vmem:[#allocation12 + $0x64] ss:$16 sps:$4 sm:$0xff]  }
 0x7d5   :  { %6819 = vpow2.f32 %v5855_v6  ;;  %v6548_v35 = vld [vmem:[#allocation12 + $0x6c] ss:$16 sps:$4 sm:$0xff]   ;;  %v6543_v6 = vld [vmem:[#allocation12 + $0x60] ss:$16 sps:$4 sm:$0xff]   ;;  %v6546_v7 = vld [vmem:[#allocation12 + $0x68] ss:$16 sps:$4 sm:$0xff]  }
 0x7d6   :  { %6821 = vtanh.f32 %v6152_v9  ;;  %v6551_v9 = vld [vmem:[#allocation12 + $0x84] ss:$16 sps:$4 sm:$0xff]   ;;  %v6549_v34 = vld [vmem:[#allocation12 + $0x80] ss:$16 sps:$4 sm:$0xff]  }
 0x7d7   :  { %6823 = vpow2.f32 %v5856_v11  ;;  %v6554_v11 = vld [vmem:[#allocation12 + $0x8c] ss:$16 sps:$4 sm:$0xff]  }
 0x7d8   :  { %6825 = vtanh.f32 %v6154_v18  ;;  %v6552_v18 = vld [vmem:[#allocation12 + $0x88] ss:$16 sps:$4 sm:$0xff]  }
 0x7dc   :  { %v6814_v26 = vpop.eup %6813 }
 0x7dd   :  { %v6816_v41 = vpop.eup %6815  ;;  %v3091_v49 = vadd.f32 1.0, %v6814_v26  ;;  %v6557_v26 = vld [vmem:[#allocation12 + $0xa4] ss:$16 sps:$4 sm:$0xff]  }
 0x7de   :  { %v3103_v28 = vadd.f32 1.0, %v6816_v41  ;;  %v6818_v23 = vpop.eup %6817  ;;  %v6560_v41 = vld [vmem:[#allocation12 + $0xac] ss:$16 sps:$4 sm:$0xff]  }
 0x7df   :  { %6827 = vrcp.f32 %v3091_v49  ;;  %v3092_v36 = vadd.f32 1.0, %v6818_v23  ;;  %v6820_v19 = vpop.eup %6819  ;;  %v6555_v49 = vld [vmem:[#allocation12 + $0xa0] ss:$16 sps:$4 sm:$0xff]   ;;  %v6566_v23 = vld [vmem:[#allocation12 + $0xcc] ss:$16 sps:$4 sm:$0xff]  }
 0x7e0   :  { %6829 = vrcp.f32 %v3103_v28  ;;  %v3104_v15 = vadd.f32 1.0, %v6820_v19  ;;  %v6822_v20 = vpop.eup %6821  ;;  %v6563_v28 = vld [vmem:[#allocation12 + $0xc4] ss:$16 sps:$4 sm:$0xff]   ;;  %v6564_v19 = vld [vmem:[#allocation12 + $0xc8] ss:$16 sps:$4 sm:$0xff]  }
 0x7e1   :  { %6831 = vpow2.f32 %v5857_v45  ;;  %v6824_v27 = vpop.eup %6823  ;;  %v6558_v45 = vld [vmem:[#allocation12 + $0xa8] ss:$16 sps:$4 sm:$0xff]  }
 0x7e2   :  { %6833 = vrcp.f32 %v3092_v36  ;;  %v6826_v30 = vpop.eup %6825  ;;  %v3117_v25 = vadd.f32 1.0, %v6824_v27  ;;  %v6561_v36 = vld [vmem:[#allocation12 + $0xc0] ss:$16 sps:$4 sm:$0xff]  }
 0x7e3   :  { %6835 = vrcp.f32 %v3104_v15  ;;  %v6569_v15 = vld [vmem:[#allocation12 + $0xe4] ss:$16 sps:$4 sm:$0xff]   ;;  %v6567_v27 = vld [vmem:[#allocation12 + $0xe0] ss:$16 sps:$4 sm:$0xff]  }
 0x7e4   :  { %6837 = vrcp.f32 %v3117_v25  ;;  %v8129_v25 = vld [vmem:[#allocation14 + $0x48] ss:$16 sps:$4 sm:$0xff]  }
 0x7e9   :  { %v6828_v31 = vpop.eup %6827 }
 0x7ea   :  { %v6830_v38 = vpop.eup %6829  ;;  %v3125_v39 = vmul.f32 %v6828_v31, %v6822_v20  ;;  %v6572_v20 = vld [vmem:[#allocation12 + $0xec] ss:$16 sps:$4 sm:$0xff]   ;;  %v8068_v31 = vld [vmem:[#allocation14 + $0x4] ss:$16 sps:$4 sm:$0xff]  }
 0x7eb   :  { %v6832_v44 = vpop.eup %6831  ;;  %v3123_v40 = vmul.f32 %v6830_v38, %v8006_v8  ;;  %v8071_v38 = vld [vmem:[#allocation14] ss:$16 sps:$4 sm:$0xff]  }
 0x7ec   :  { %v6834_v21 = vpop.eup %6833  ;;  %v3118_v53 = vadd.f32 1.0, %v6832_v44  ;;  %v8121_v44 = vld [vmem:[#allocation14 + $0x40] ss:$16 sps:$4 sm:$0xff]  }
 0x7ed   :  { %v8055_v14 = vadd.f32 %v3125_v39, %v3123_v40  ;;  %v3126_v47 = vmul.f32 %v6834_v21, %v6826_v30  ;;  %v6836_v51 = vpop.eup %6835  ;;  %v6570_v30 = vld [vmem:[#allocation12 + $0xe8] ss:$16 sps:$4 sm:$0xff]   ;;  %v8123_v40 = vld [vmem:[#allocation14 + $0x4c] ss:$16 sps:$4 sm:$0xff]   ;;  %v8126_v21 = vld [vmem:[#allocation14 + $0x64] ss:$16 sps:$4 sm:$0xff]  }
 0x7ee   :  { %v3124_v54 = vmul.f32 %v6836_v51, %v8010_v46  ;;  %v6838_v58 = vpop.eup %6837  ;;  %v6536_v46 = vld [vmem:[#allocation12 + $0x2c] ss:$16 sps:$4 sm:$0xff]   ;;  %v8118_v39 = vld [vmem:[#allocation14 + $0x28] ss:$16 sps:$4 sm:$0xff]   ;;  %v8135_v51 = vld [vmem:[#allocation14 + $0x60] ss:$16 sps:$4 sm:$0xff]  }
 0x7ef   :  { %6839 = vtanh.f32 %v8055_v14 }
 0x7f0   :  { %v8059_v56 = vadd.f32 %v3126_v47, %v3124_v54  ;;  %6841 = vrcp.f32 %v3118_v53  ;;  %v8132_v47 = vld [vmem:[#allocation14 + $0x6c] ss:$16 sps:$4 sm:$0xff]   ;;  %v8138_v53 = vld [vmem:[#allocation14 + $0x84] ss:$16 sps:$4 sm:$0xff]   ;;  %v8141_v54 = vld [vmem:[#allocation14 + $0x68] ss:$16 sps:$4 sm:$0xff]  }
 0x7f2   :  { %6843 = vtanh.f32 %v8059_v56 }
 0x7f9   :  { %v6840_v55 = vpop.eup %6839 }
 0x7fa   :  { %v6842_v8 = vpop.eup %6841  ;;  %v3131_v59 = vmul.f32 %v6840_v55, %v6838_v58  ;;  %v8144_v58 = vld [vmem:[#allocation14 + $0x8c] ss:$16 sps:$4 sm:$0xff]   ;;  %v8147_v55 = vld [vmem:[#allocation14 + $0x80] ss:$16 sps:$4 sm:$0xff]  }
 0x7fc   :  { %v6844_v57 = vpop.eup %6843 }
 0x7fd   :  { %v3132_v60 = vmul.f32 %v6844_v57, %v6842_v8  ;;  %v8150_v8 = vld [vmem:[#allocation14 + $0xa4] ss:$16 sps:$4 sm:$0xff]   ;;  %v8153_v57 = vld [vmem:[#allocation14 + $0x88] ss:$16 sps:$4 sm:$0xff]  }
 0x7ff   :  { %v8062_v1 = vpack.c.bf16 %v3132_v60, %v3131_v59  ;;  %v8156_v59 = vld [vmem:[#allocation14 + $0xac] ss:$16 sps:$4 sm:$0xff]   ;;  %v8159_v60 = vld [vmem:[#allocation14 + $0xa0] ss:$16 sps:$4 sm:$0xff]  }
 0x801   :  { %3372 = vmatmul.mubr.bf16.vlgmr.msra.gmra.mrb[28].mxu0 %v8062_v1  ;;  %3415 = vmatmul.mubr.bf16.vlgmr.msra.gmra.mrb[28].mxu1 %v8062_v1 }
 0x802   :  { %3711 = vmatpush1.bf16.msra.mxu0 %v6525_v62  ;;  %3824 = vmatpush1.bf16.msra.mxu1 %v6528_v63  ;;  %v8162_v62 = vld [vmem:[#allocation14 + $0xc4] ss:$16 sps:$4 sm:$0xff]   ;;  %v8165_v63 = vld [vmem:[#allocation14 + $0xa8] ss:$16 sps:$4 sm:$0xff]  }
 0x803   :  { %3712 = vmatprep.subr.bf16.mxu0 %v6533_v2  ;;  %3825 = vmatprep.subr.bf16.mxu1 %v6536_v46  ;;  %v8173_v2 = vld [vmem:[#allocation14 + $0xe4] ss:$16 sps:$4 sm:$0xff]   ;;  %v8175_v46 = vld [vmem:[#allocation14 + $0xcc] ss:$16 sps:$4 sm:$0xff]  }
 0x804   :  { %3742 = vmatprep.mubr.bf16.mxu0 %v7349_v0  ;;  %3855 = vmatprep.mubr.bf16.mxu1 %v7349_v0 }
 0x806   :  { %3713 = vmatpush1.bf16.msra.mxu0 %v6531_v3  ;;  %3826 = vmatpush1.bf16.msra.mxu1 %v6534_v4  ;;  %v8177_v3 = vld [vmem:[#allocation14 + $0xc8] ss:$16 sps:$4 sm:$0xff]   ;;  %v8179_v4 = vld [vmem:[#allocation14 + $0xec] ss:$16 sps:$4 sm:$0xff]  }
 0x807   :  { %3714 = vmatprep.subr.bf16.mxu0 %v6539_v5  ;;  %3827 = vmatprep.subr.bf16.mxu1 %v6542_v22  ;;  %v8183_v5 = vld [vmem:[#allocation14 + $0xe0] ss:$16 sps:$4 sm:$0xff]   ;;  %v8187_v22 = vld [vmem:[#allocation14 + $0xe8] ss:$16 sps:$4 sm:$0xff]  }
 0x80a   :  { %3715 = vmatpush1.bf16.msra.mxu0 %v6537_v37  ;;  %3828 = vmatpush1.bf16.msra.mxu1 %v6540_v43 }
 0x80b   :  { %3716 = vmatprep.subr.bf16.mxu0 %v6545_v52  ;;  %3829 = vmatprep.subr.bf16.mxu1 %v6548_v35 }
 0x80e   :  { %3717 = vmatpush1.bf16.msra.mxu0 %v6543_v6  ;;  %3830 = vmatpush1.bf16.msra.mxu1 %v6546_v7 }
 0x80f   :  { %3718 = vmatprep.subr.bf16.mxu0 %v6551_v9  ;;  %3831 = vmatprep.subr.bf16.mxu1 %v6554_v11 }
 0x812   :  { %3719 = vmatpush1.bf16.msra.mxu0 %v6549_v34  ;;  %3832 = vmatpush1.bf16.msra.mxu1 %v6552_v18 }
 0x813   :  { %3720 = vmatprep.subr.bf16.mxu0 %v6557_v26  ;;  %3833 = vmatprep.subr.bf16.mxu1 %v6560_v41 }
 0x816   :  { %3721 = vmatpush1.bf16.msra.mxu0 %v6555_v49  ;;  %3834 = vmatpush1.bf16.msra.mxu1 %v6558_v45 }
 0x817   :  { %3722 = vmatprep.subr.bf16.mxu0 %v6563_v28  ;;  %3835 = vmatprep.subr.bf16.mxu1 %v6566_v23 }
 0x81a   :  { %3723 = vmatpush1.bf16.msra.mxu0 %v6561_v36  ;;  %3836 = vmatpush1.bf16.msra.mxu1 %v6564_v19 }
 0x81b   :  { %3724 = vmatprep.subr.bf16.mxu0 %v6569_v15  ;;  %3837 = vmatprep.subr.bf16.mxu1 %v6572_v20 }
 0x81e   :  { %3725 = vmatpush1.bf16.msra.mxu0 %v6567_v27  ;;  %3838 = vmatpush1.bf16.msra.mxu1 %v6570_v30 }
 0x81f   :  { %4207 = vmatprep.subr.bf16.mxu0 %v8068_v31 }
 0x821   :  { %3743 = vmatmul.mubr.bf16.vlgmr.msra.gmra.mrb[32].mxu0 %v7680_v29  ;;  %3856 = vmatmul.mubr.bf16.vlgmr.msra.gmra.mrb[32].mxu1 %v7680_v29  ;;  %v8102_v29 = vld [vmem:[#allocation14 + $0xc] ss:$16 sps:$4 sm:$0xff]  }
 0x822   :  { %3752 = vmatprep.mubr.bf16.mxu0 %v7349_v0  ;;  %3865 = vmatprep.mubr.bf16.mxu1 %v7349_v0 }
 0x823   :  { %4208 = vmatpush1.bf16.msra.mxu0 %v8071_v38  ;;  %4250 = vmatprep.subr.bf16.mxu1 %v8102_v29 }
 0x829   :  { %3753 = vmatmul.mubr.bf16.gmra.mrb[36].mxu0 %v7733_v32  ;;  %3866 = vmatmul.mubr.bf16.gmra.mrb[36].mxu1 %v7733_v32  ;;  %v8104_v32 = vld [vmem:[#allocation14 + $0x8] ss:$16 sps:$4 sm:$0xff]  }
 0x82a   :  { %3762 = vmatprep.mubr.bf16.mxu0 %v7349_v0  ;;  %3875 = vmatprep.mubr.bf16.mxu1 %v7349_v0 }
 0x82b   :  { %4251 = vmatpush1.bf16.msra.mxu1 %v8104_v32 }
 0x831   :  { %3763 = vmatmul.mubr.bf16.gmra.mrb[40].mxu0 %v7795_v50  ;;  %3876 = vmatmul.mubr.bf16.gmra.mrb[40].mxu1 %v7795_v50  ;;  %v8108_v50 = vld [vmem:[#allocation14 + $0x24] ss:$16 sps:$4 sm:$0xff]  }
 0x832   :  { %3772 = vmatprep.mubr.bf16.mxu0 %v7349_v0  ;;  %3885 = vmatprep.mubr.bf16.mxu1 %v7349_v0 }
 0x833   :  { %4209 = vmatprep.subr.bf16.mxu0 %v8108_v50 }
 0x839   :  { %3773 = vmatmul.mubr.bf16.gmra.mrb[44].mxu0 %v7906_v48  ;;  %3886 = vmatmul.mubr.bf16.gmra.mrb[44].mxu1 %v7906_v48  ;;  %v8110_v48 = vld [vmem:[#allocation14 + $0x2c] ss:$16 sps:$4 sm:$0xff]  }
 0x83a   :  { %3782 = vmatprep.mubr.bf16.mxu0 %v7349_v0  ;;  %3895 = vmatprep.mubr.bf16.mxu1 %v7349_v0 }
 0x83b   :  { %4252 = vmatprep.subr.bf16.mxu1 %v8110_v48 }
 0x83c   :  { %4253 = vmatpush1.bf16.msra.mxu1 %v8118_v39 }
 0x83d   :  { %4254 = vmatprep.subr.bf16.mxu1 %v8123_v40 }
 0x840   :  { %4255 = vmatpush1.bf16.msra.mxu1 %v8129_v25 }
 0x841   :  { %3783 = vmatmul.mubr.bf16.gmra.mrb[48].mxu0 %v7960_v24  ;;  %3896 = vmatmul.mubr.bf16.gmra.mrb[48].mxu1 %v7960_v24  ;;  %v8112_v24 = vld [vmem:[#allocation14 + $0x20] ss:$16 sps:$4 sm:$0xff]  }
 0x842   :  { %3792 = vmatprep.mubr.bf16.mxu0 %v7349_v0  ;;  %3905 = vmatprep.mubr.bf16.mxu1 %v7349_v0 }
 0x843   :  { %4210 = vmatpush1.bf16.msra.mxu0 %v8112_v24  ;;  %4256 = vmatprep.subr.bf16.mxu1 %v8132_v47 }
 0x844   :  { %4257 = vmatpush1.bf16.msra.mxu1 %v8141_v54 }
 0x845   :  { %4258 = vmatprep.subr.bf16.mxu1 %v8144_v58 }
 0x848   :  { %4259 = vmatpush1.bf16.msra.mxu1 %v8153_v57 }
 0x849   :  { %3793 = vmatmul.mubr.bf16.gmra.mrb[52].mxu0 %v8013_v42  ;;  %3906 = vmatmul.mubr.bf16.gmra.mrb[52].mxu1 %v8013_v42  ;;  %v8114_v42 = vld [vmem:[#allocation14 + $0x44] ss:$16 sps:$4 sm:$0xff]  }
 0x84a   :  { %3802 = vmatprep.mubr.bf16.mxu0 %v7349_v0  ;;  %3915 = vmatprep.mubr.bf16.mxu1 %v7349_v0 }
 0x84b   :  { %4211 = vmatprep.subr.bf16.mxu0 %v8114_v42  ;;  %4260 = vmatprep.subr.bf16.mxu1 %v8156_v59 }
 0x84c   :  { %4212 = vmatpush1.bf16.msra.mxu0 %v8121_v44  ;;  %4261 = vmatpush1.bf16.msra.mxu1 %v8165_v63 }
 0x84d   :  { %4213 = vmatprep.subr.bf16.mxu0 %v8126_v21  ;;  %4262 = vmatprep.subr.bf16.mxu1 %v8175_v46 }
 0x850   :  { %4214 = vmatpush1.bf16.msra.mxu0 %v8135_v51  ;;  %4263 = vmatpush1.bf16.msra.mxu1 %v8177_v3 }
 0x851   :  { %3803 = vmatmul.mubr.bf16.gmra.mrb[56].mxu0 %v8062_v1  ;;  %3916 = vmatmul.mubr.bf16.gmra.mrb[56].mxu1 %v8062_v1  ;;  %v8169_v1 = vld [vmem:[#allocation14 + $0xc0] ss:$16 sps:$4 sm:$0xff]  }
 0x852   :  { %3812 = vmatprep.mubr.bf16.mxu0 %v7349_v0  ;;  %3925 = vmatprep.mubr.bf16.mxu1 %v7349_v0 }
 0x853   :  { %4215 = vmatprep.subr.bf16.mxu0 %v8138_v53  ;;  %4264 = vmatprep.subr.bf16.mxu1 %v8179_v4 }
 0x854   :  { %4216 = vmatpush1.bf16.msra.mxu0 %v8147_v55  ;;  %4265 = vmatpush1.bf16.msra.mxu1 %v8187_v22 }
 0x855   :  { %4217 = vmatprep.subr.bf16.mxu0 %v8150_v8  ;;  %4401 = vmatprep.subr.bf16.mxu1 %v8102_v29 }
 0x858   :  { %4218 = vmatpush1.bf16.msra.mxu0 %v8159_v60 }
 0x859   :  { %4219 = vmatprep.subr.bf16.mxu0 %v8162_v62 }
 0x85c   :  { %4220 = vmatpush1.bf16.msra.mxu0 %v8169_v1 }
 0x85d   :  { %4221 = vmatprep.subr.bf16.mxu0 %v8173_v2 }
 0x860   :  { %4222 = vmatpush1.bf16.msra.mxu0 %v8183_v5 }
 0x861   :  { %4358 = vmatprep.subr.bf16.mxu0 %v8068_v31 }
 0x8d4   :  { %v3373_v37 = vpop.f32.mrb[28].mxu0  ;;  %v3416_v43 = vpop.f32.mrb[28].mxu1 }
 0x8d5   :  { %v6124_v52 = vadd.f32 %v3373_v37, %v7650_v16  ;;  %v3375_v35 = vpop.f32.mrb[29].mxu0  ;;  %v3418_v6 = vpop.f32.mrb[29].mxu1  ;;  %v6156_v19 = vadd.f32 %v3416_v43, %v7668_v61 }
 0x8d6   :  { %v6125_v7 = vadd.f32 %v3375_v35, %v7654_v17  ;;  %v3377_v9 = vpop.f32.mrb[30].mxu0  ;;  %v3420_v11 = vpop.f32.mrb[30].mxu1  ;;  %v6157_v36 = vadd.f32 %v3418_v6, %v7663_v33 }
 0x8d7   :  { %v5890_v34 = vmul.f32 -1.442695, %v6124_v52  ;;  %v6126_v18 = vadd.f32 %v3377_v9, %v7650_v16  ;;  %v3379_v26 = vpop.f32.mrb[31].mxu0  ;;  %v3422_v41 = vpop.f32.mrb[31].mxu1  ;;  %v6158_v16 = vadd.f32 %v3420_v11, %v7668_v61 }
 0x8d8   :  { %v5892_v49 = vmul.f32 -1.442695, %v6125_v7  ;;  %v6127_v45 = vadd.f32 %v3379_v26, %v7654_v17  ;;  %v5894_v15 = vmul.f32 -1.442695, %v6157_v36  ;;  %v6159_v20 = vadd.f32 %v3422_v41, %v7663_v33 }
 0x8d9   :  { %6845 = vpow2.f32 %v5890_v34  ;;  %v5891_v28 = vmul.f32 -1.442695, %v6126_v18 }
 0x8da   :  { %6847 = vpow2.f32 %v5892_v49  ;;  %v5893_v23 = vmul.f32 -1.442695, %v6127_v45  ;;  %v5895_v17 = vmul.f32 -1.442695, %v6159_v20 }
 0x8db   :  { %6849 = vpow2.f32 %v5891_v28 }
 0x8dc   :  { %6851 = vpow2.f32 %v5893_v23 }
 0x8dd   :  { %6853 = vtanh.f32 %v6156_v19 }
 0x8de   :  { %6855 = vpow2.f32 %v5894_v15 }
 0x8df   :  { %6857 = vtanh.f32 %v6158_v16 }
 0x8e3   :  { %v6846_v27 = vpop.eup %6845 }
 0x8e4   :  { %v6848_v30 = vpop.eup %6847  ;;  %v3439_v37 = vadd.f32 1.0, %v6846_v27 }
 0x8e5   :  { %v3451_v52 = vadd.f32 1.0, %v6848_v30  ;;  %v6850_v35 = vpop.eup %6849 }
 0x8e6   :  { %6859 = vrcp.f32 %v3439_v37  ;;  %v3440_v6 = vadd.f32 1.0, %v6850_v35  ;;  %v6852_v7 = vpop.eup %6851 }
 0x8e7   :  { %6861 = vrcp.f32 %v3451_v52  ;;  %v3452_v43 = vadd.f32 1.0, %v6852_v7  ;;  %v6854_v33 = vpop.eup %6853 }
 0x8e8   :  { %6863 = vpow2.f32 %v5895_v17  ;;  %v6856_v9 = vpop.eup %6855 }
 0x8e9   :  { %6865 = vrcp.f32 %v3440_v6  ;;  %v6858_v61 = vpop.eup %6857  ;;  %v3465_v26 = vadd.f32 1.0, %v6856_v9 }
 0x8ea   :  { %6867 = vrcp.f32 %v3452_v43 }
 0x8eb   :  { %6869 = vrcp.f32 %v3465_v26 }
 0x8f0   :  { %v6860_v11 = vpop.eup %6859 }
 0x8f1   :  { %v6862_v34 = vpop.eup %6861  ;;  %v3473_v18 = vmul.f32 %v6860_v11, %v6854_v33 }
 0x8f2   :  { %v6864_v41 = vpop.eup %6863  ;;  %v3471_v49 = vmul.f32 %v6862_v34, %v8055_v14 }
 0x8f3   :  { %v6866_v45 = vpop.eup %6865  ;;  %v3466_v19 = vadd.f32 1.0, %v6864_v41 }
 0x8f4   :  { %v3474_v28 = vmul.f32 %v6866_v45, %v6858_v61  ;;  %v3475_v23 = vadd.f32 %v3473_v18, %v3471_v49  ;;  %v6868_v36 = vpop.eup %6867 }
 0x8f5   :  { %v3472_v15 = vmul.f32 %v6868_v36, %v8059_v56  ;;  %v6870_v16 = vpop.eup %6869  ;;  %v8678_v56 = vsub.s32 1, %v7641_v12 }
 0x8f6   :  { %6871 = vtanh.f32 %v3475_v23 }
 0x8f7   :  { %v3476_v20 = vadd.f32 %v3474_v28, %v3472_v15  ;;  %6873 = vrcp.f32 %v3466_v19  ;;  %v8679_v28 = vsub.s32 3, %v7641_v12 }
 0x8f9   :  { %6875 = vtanh.f32 %v3476_v20  ;;  %v8680_v20 = vsub.s32 2, %v7641_v12 }
 0x900   :  { %v6872_v27 = vpop.eup %6871 }
 0x901   :  { %v3479_v30 = vmul.f32 %v6872_v27, %v6870_v16  ;;  %v6874_v37 = vpop.eup %6873 }
 0x903   :  { %v6876_v17 = vpop.eup %6875 }
 0x904   :  { %v3480_v52 = vmul.f32 %v6876_v17, %v6874_v37 }
 0x906   :  { %v3481_v35 = vpack.c.bf16 %v3480_v52, %v3479_v30 }
 0x908   :  { %3813 = vmatmul.mubr.bf16.gmra.mrb[60].mxu0 %v3481_v35  ;;  %3926 = vmatmul.mubr.bf16.gmra.mrb[60].mxu1 %v3481_v35 }
 0x909   :  { %4239 = vmatprep.mubr.bf16.mxu0 %v7349_v0  ;;  %4282 = vmatprep.mubr.bf16.mxu1 %v7349_v0 }
 0x910   :  { %4240 = vmatmul.mubr.bf16.vlgmr.msra.gmra.mrb[32].mxu0 %v7350_v10  ;;  %4283 = vmatmul.mubr.bf16.vlgmr.msra.gmra.mrb[32].mxu1 %v7350_v10  ;;  %v3528_v10 = vld [vmem:[%s8671_s6] sm:$0xf] }
 0x911   :  { %4359 = vmatpush1.bf16.msra.mxu0 %v8071_v38  ;;  %4402 = vmatpush1.bf16.msra.mxu1 %v8104_v32  ;;  %v8247_v14 = vrot.slane %v3528_v10, %v180_v13  ;;  %v8251_v6 = vrot.slane %v3528_v10, %v8678_v56  ;;  %v8258_v23 = vrot.slane %v3528_v10, %v8679_v28 }
 0x912   :  { %4360 = vmatprep.subr.bf16.mxu0 %v8108_v50  ;;  %4403 = vmatprep.subr.bf16.mxu1 %v8110_v48  ;;  %v8263_v16 = vrot.slane %v3528_v10, %v8680_v20 }
 0x913   :  { %4390 = vmatprep.mubr.bf16.mxu0 %v7349_v0  ;;  %4433 = vmatprep.mubr.bf16.mxu1 %v7349_v0 }
 0x915   :  { %4361 = vmatpush1.bf16.msra.mxu0 %v8112_v24  ;;  %4404 = vmatpush1.bf16.msra.mxu1 %v8118_v39 }
 0x916   :  { %4362 = vmatprep.subr.bf16.mxu0 %v8114_v42  ;;  %4405 = vmatprep.subr.bf16.mxu1 %v8123_v40 }
 0x919   :  { %4363 = vmatpush1.bf16.msra.mxu0 %v8121_v44  ;;  %4406 = vmatpush1.bf16.msra.mxu1 %v8129_v25 }
 0x91a   :  { %4364 = vmatprep.subr.bf16.mxu0 %v8126_v21  ;;  %4407 = vmatprep.subr.bf16.mxu1 %v8132_v47 }
 0x91d   :  { %4365 = vmatpush1.bf16.msra.mxu0 %v8135_v51  ;;  %4408 = vmatpush1.bf16.msra.mxu1 %v8141_v54 }
 0x91e   :  { %4366 = vmatprep.subr.bf16.mxu0 %v8138_v53  ;;  %4409 = vmatprep.subr.bf16.mxu1 %v8144_v58 }
 0x921   :  { %4367 = vmatpush1.bf16.msra.mxu0 %v8147_v55  ;;  %4410 = vmatpush1.bf16.msra.mxu1 %v8153_v57 }
 0x922   :  { %4368 = vmatprep.subr.bf16.mxu0 %v8150_v8  ;;  %4411 = vmatprep.subr.bf16.mxu1 %v8156_v59 }
 0x925   :  { %4369 = vmatpush1.bf16.msra.mxu0 %v8159_v60  ;;  %4412 = vmatpush1.bf16.msra.mxu1 %v8165_v63 }
 0x926   :  { %4370 = vmatprep.subr.bf16.mxu0 %v8162_v62  ;;  %4413 = vmatprep.subr.bf16.mxu1 %v8175_v46 }
 0x929   :  { %4371 = vmatpush1.bf16.msra.mxu0 %v8169_v1  ;;  %4414 = vmatpush1.bf16.msra.mxu1 %v8177_v3 }
 0x92a   :  { %4372 = vmatprep.subr.bf16.mxu0 %v8173_v2  ;;  %4415 = vmatprep.subr.bf16.mxu1 %v8179_v4 }
 0x92d   :  { %4373 = vmatpush1.bf16.msra.mxu0 %v8183_v5  ;;  %4416 = vmatpush1.bf16.msra.mxu1 %v8187_v22 }
 0x92e   :  { %4509 = vmatprep.subr.bf16.mxu0 %v8068_v31  ;;  %4552 = vmatprep.subr.bf16.mxu1 %v8102_v29 }
 0x9e3   :  { %v4241_v7 = vpop.f32.mrb[32].mxu0  ;;  %v4284_v43 = vpop.f32.mrb[32].mxu1 }
 0x9e4   :  { %v6160_v33 = vadd.f32 %v4241_v7, %v8247_v14  ;;  %v4243_v9 = vpop.f32.mrb[33].mxu0  ;;  %v4286_v61 = vpop.f32.mrb[33].mxu1  ;;  %v6192_v30 = vadd.f32 %v4284_v43, %v8263_v16 }
 0x9e5   :  { %v6161_v11 = vadd.f32 %v4243_v9, %v8251_v6  ;;  %v4245_v34 = vpop.f32.mrb[34].mxu0  ;;  %v4288_v18 = vpop.f32.mrb[34].mxu1  ;;  %v6193_v27 = vadd.f32 %v4286_v61, %v8258_v23 }
 0x9e6   :  { %v5960_v26 = vmul.f32 -1.442695, %v6160_v33  ;;  %v6162_v41 = vadd.f32 %v4245_v34, %v8247_v14  ;;  %v4247_v49 = vpop.f32.mrb[35].mxu0  ;;  %v4290_v13 = vpop.f32.mrb[35].mxu1  ;;  %v6194_v52 = vadd.f32 %v4288_v18, %v8263_v16 }
 0x9e7   :  { %v5962_v45 = vmul.f32 -1.442695, %v6161_v11  ;;  %v6163_v36 = vadd.f32 %v4247_v49, %v8251_v6  ;;  %v5964_v37 = vmul.f32 -1.442695, %v6193_v27  ;;  %v6195_v17 = vadd.f32 %v4290_v13, %v8258_v23 }
 0x9e8   :  { %6877 = vpow2.f32 %v5960_v26  ;;  %v5961_v19 = vmul.f32 -1.442695, %v6162_v41 }
 0x9e9   :  { %6879 = vpow2.f32 %v5962_v45  ;;  %v5963_v15 = vmul.f32 -1.442695, %v6163_v36  ;;  %v5965_v33 = vmul.f32 -1.442695, %v6195_v17 }
 0x9ea   :  { %6881 = vpow2.f32 %v5961_v19 }
 0x9eb   :  { %6883 = vpow2.f32 %v5963_v15 }
 0x9ec   :  { %6885 = vtanh.f32 %v6192_v30 }
 0x9ed   :  { %6887 = vpow2.f32 %v5964_v37 }
 0x9ee   :  { %6889 = vtanh.f32 %v6194_v52 }
 0x9f2   :  { %v6878_v35 = vpop.eup %6877 }
 0x9f3   :  { %v6880_v56 = vpop.eup %6879  ;;  %v4307_v7 = vadd.f32 1.0, %v6878_v35 }
 0x9f4   :  { %v4319_v12 = vadd.f32 1.0, %v6880_v56  ;;  %v6882_v10 = vpop.eup %6881 }
 0x9f5   :  { %6891 = vrcp.f32 %v4307_v7  ;;  %v4308_v9 = vadd.f32 1.0, %v6882_v10  ;;  %v6884_v61 = vpop.eup %6883 }
 0x9f6   :  { %6893 = vrcp.f32 %v4319_v12  ;;  %v4320_v43 = vadd.f32 1.0, %v6884_v61  ;;  %v6886_v11 = vpop.eup %6885 }
 0x9f7   :  { %6895 = vpow2.f32 %v5965_v33  ;;  %v6888_v34 = vpop.eup %6887 }
 0x9f8   :  { %6897 = vrcp.f32 %v4308_v9  ;;  %v6890_v18 = vpop.eup %6889  ;;  %v4333_v36 = vadd.f32 1.0, %v6888_v34 }
 0x9f9   :  { %6899 = vrcp.f32 %v4320_v43 }
 0x9fa   :  { %6901 = vrcp.f32 %v4333_v36 }
 0x9ff   :  { %v6892_v26 = vpop.eup %6891 }
 0xa00   :  { %v6894_v41 = vpop.eup %6893  ;;  %v4341_v49 = vmul.f32 %v6892_v26, %v6886_v11 }
 0xa01   :  { %v6896_v13 = vpop.eup %6895  ;;  %v4339_v45 = vmul.f32 0.0, %v6894_v41 }
 0xa02   :  { %v6898_v28 = vpop.eup %6897  ;;  %v4334_v27 = vadd.f32 1.0, %v6896_v13 }
 0xa03   :  { %v8269_v19 = vadd.f32 %v4341_v49, %v4339_v45  ;;  %v4342_v15 = vmul.f32 %v6898_v28, %v6890_v18  ;;  %v6900_v20 = vpop.eup %6899 }
 0xa04   :  { %v4340_v30 = vmul.f32 0.0, %v6900_v20  ;;  %v6902_v17 = vpop.eup %6901 }
 0xa05   :  { %6903 = vtanh.f32 %v8269_v19 }
 0xa06   :  { %v8272_v37 = vadd.f32 %v4342_v15, %v4340_v30  ;;  %6905 = vrcp.f32 %v4334_v27 }
 0xa08   :  { %6907 = vtanh.f32 %v8272_v37 }
 0xa0f   :  { %v6904_v52 = vpop.eup %6903 }
 0xa10   :  { %v6906_v35 = vpop.eup %6905  ;;  %v4347_v7 = vmul.f32 %v6904_v52, %v6902_v17 }
 0xa12   :  { %v6908_v56 = vpop.eup %6907 }
 0xa13   :  { %v4348_v33 = vmul.f32 %v6908_v56, %v6906_v35 }
 0xa15   :  { %v4357_v12 = vpack.c.bf16 %v4348_v33, %v4347_v7 }
 0xa17   :  { %4391 = vmatmul.mubr.bf16.vlgmr.msra.gmra.mrb[36].mxu0 %v4357_v12  ;;  %4434 = vmatmul.mubr.bf16.vlgmr.msra.gmra.mrb[36].mxu1 %v4357_v12 }
 0xa18   :  { %4510 = vmatpush1.bf16.msra.mxu0 %v8071_v38  ;;  %4553 = vmatpush1.bf16.msra.mxu1 %v8104_v32 }
 0xa19   :  { %4511 = vmatprep.subr.bf16.mxu0 %v8108_v50  ;;  %4554 = vmatprep.subr.bf16.mxu1 %v8110_v48 }
 0xa1a   :  { %4541 = vmatprep.mubr.bf16.mxu0 %v7349_v0  ;;  %4584 = vmatprep.mubr.bf16.mxu1 %v7349_v0 }
 0xa1c   :  { %4512 = vmatpush1.bf16.msra.mxu0 %v8112_v24  ;;  %4555 = vmatpush1.bf16.msra.mxu1 %v8118_v39 }
 0xa1d   :  { %4513 = vmatprep.subr.bf16.mxu0 %v8114_v42  ;;  %4556 = vmatprep.subr.bf16.mxu1 %v8123_v40 }
 0xa20   :  { %4514 = vmatpush1.bf16.msra.mxu0 %v8121_v44  ;;  %4557 = vmatpush1.bf16.msra.mxu1 %v8129_v25 }
 0xa21   :  { %4515 = vmatprep.subr.bf16.mxu0 %v8126_v21  ;;  %4558 = vmatprep.subr.bf16.mxu1 %v8132_v47 }
 0xa24   :  { %4516 = vmatpush1.bf16.msra.mxu0 %v8135_v51  ;;  %4559 = vmatpush1.bf16.msra.mxu1 %v8141_v54 }
 0xa25   :  { %4517 = vmatprep.subr.bf16.mxu0 %v8138_v53  ;;  %4560 = vmatprep.subr.bf16.mxu1 %v8144_v58 }
 0xa28   :  { %4518 = vmatpush1.bf16.msra.mxu0 %v8147_v55  ;;  %4561 = vmatpush1.bf16.msra.mxu1 %v8153_v57 }
 0xa29   :  { %4519 = vmatprep.subr.bf16.mxu0 %v8150_v8  ;;  %4562 = vmatprep.subr.bf16.mxu1 %v8156_v59 }
 0xa2c   :  { %4520 = vmatpush1.bf16.msra.mxu0 %v8159_v60  ;;  %4563 = vmatpush1.bf16.msra.mxu1 %v8165_v63 }
 0xa2d   :  { %4521 = vmatprep.subr.bf16.mxu0 %v8162_v62  ;;  %4564 = vmatprep.subr.bf16.mxu1 %v8175_v46 }
 0xa30   :  { %4522 = vmatpush1.bf16.msra.mxu0 %v8169_v1  ;;  %4565 = vmatpush1.bf16.msra.mxu1 %v8177_v3 }
 0xa31   :  { %4523 = vmatprep.subr.bf16.mxu0 %v8173_v2  ;;  %4566 = vmatprep.subr.bf16.mxu1 %v8179_v4 }
 0xa34   :  { %4524 = vmatpush1.bf16.msra.mxu0 %v8183_v5  ;;  %4567 = vmatpush1.bf16.msra.mxu1 %v8187_v22 }
 0xa35   :  { %4660 = vmatprep.subr.bf16.mxu0 %v8068_v31  ;;  %4703 = vmatprep.subr.bf16.mxu1 %v8102_v29 }
 0xaea   :  { %v4392_v10 = vpop.f32.mrb[36].mxu0  ;;  %v4435_v9 = vpop.f32.mrb[36].mxu1 }
 0xaeb   :  { %v6164_v61 = vadd.f32 %v4392_v10, %v8247_v14  ;;  %v4394_v43 = vpop.f32.mrb[37].mxu0  ;;  %v4437_v11 = vpop.f32.mrb[37].mxu1  ;;  %v6196_v30 = vadd.f32 %v4435_v9, %v8263_v16 }
 0xaec   :  { %v6165_v34 = vadd.f32 %v4394_v43, %v8251_v6  ;;  %v4396_v18 = vpop.f32.mrb[38].mxu0  ;;  %v4439_v26 = vpop.f32.mrb[38].mxu1  ;;  %v6197_v27 = vadd.f32 %v4437_v11, %v8258_v23 }
 0xaed   :  { %v5966_v41 = vmul.f32 -1.442695, %v6164_v61  ;;  %v6166_v49 = vadd.f32 %v4396_v18, %v8247_v14  ;;  %v4398_v13 = vpop.f32.mrb[39].mxu0  ;;  %v4441_v45 = vpop.f32.mrb[39].mxu1  ;;  %v6198_v35 = vadd.f32 %v4439_v26, %v8263_v16 }
 0xaee   :  { %v5968_v28 = vmul.f32 -1.442695, %v6165_v34  ;;  %v6167_v36 = vadd.f32 %v4398_v13, %v8251_v6  ;;  %v5970_v17 = vmul.f32 -1.442695, %v6197_v27  ;;  %v6199_v52 = vadd.f32 %v4441_v45, %v8258_v23 }
 0xaef   :  { %6909 = vpow2.f32 %v5966_v41  ;;  %v5967_v15 = vmul.f32 -1.442695, %v6166_v49 }
 0xaf0   :  { %6911 = vpow2.f32 %v5968_v28  ;;  %v5969_v20 = vmul.f32 -1.442695, %v6167_v36  ;;  %v5971_v12 = vmul.f32 -1.442695, %v6199_v52 }
 0xaf1   :  { %6913 = vpow2.f32 %v5967_v15 }
 0xaf2   :  { %6915 = vpow2.f32 %v5969_v20 }
 0xaf3   :  { %6917 = vtanh.f32 %v6196_v30 }
 0xaf4   :  { %6919 = vpow2.f32 %v5970_v17 }
 0xaf5   :  { %6921 = vtanh.f32 %v6198_v35 }
 0xaf9   :  { %v6910_v56 = vpop.eup %6909 }
 0xafa   :  { %v6912_v7 = vpop.eup %6911  ;;  %v4458_v33 = vadd.f32 1.0, %v6910_v56 }
 0xafb   :  { %v4470_v10 = vadd.f32 1.0, %v6912_v7  ;;  %v6914_v61 = vpop.eup %6913 }
 0xafc   :  { %6923 = vrcp.f32 %v4458_v33  ;;  %v4459_v43 = vadd.f32 1.0, %v6914_v61  ;;  %v6916_v11 = vpop.eup %6915 }
 0xafd   :  { %6925 = vrcp.f32 %v4470_v10  ;;  %v4471_v9 = vadd.f32 1.0, %v6916_v11  ;;  %v6918_v34 = vpop.eup %6917 }
 0xafe   :  { %6927 = vpow2.f32 %v5971_v12  ;;  %v6920_v18 = vpop.eup %6919 }
 0xaff   :  { %6929 = vrcp.f32 %v4459_v43  ;;  %v6922_v26 = vpop.eup %6921  ;;  %v4484_v15 = vadd.f32 1.0, %v6920_v18 }
 0xb00   :  { %6931 = vrcp.f32 %v4471_v9 }
 0xb01   :  { %6933 = vrcp.f32 %v4484_v15 }
 0xb06   :  { %v6924_v41 = vpop.eup %6923 }
 0xb07   :  { %v6926_v49 = vpop.eup %6925  ;;  %v4492_v13 = vmul.f32 %v6924_v41, %v6918_v34 }
 0xb08   :  { %v6928_v45 = vpop.eup %6927  ;;  %v4490_v28 = vmul.f32 %v6926_v49, %v8269_v19 }
 0xb09   :  { %v6930_v36 = vpop.eup %6929  ;;  %v4485_v17 = vadd.f32 1.0, %v6928_v45 }
 0xb0a   :  { %v8318_v20 = vadd.f32 %v4492_v13, %v4490_v28  ;;  %v4493_v27 = vmul.f32 %v6930_v36, %v6922_v26  ;;  %v6932_v30 = vpop.eup %6931 }
 0xb0b   :  { %v4491_v52 = vmul.f32 %v6932_v30, %v8272_v37  ;;  %v6934_v56 = vpop.eup %6933 }
 0xb0c   :  { %6935 = vtanh.f32 %v8318_v20 }
 0xb0d   :  { %v8322_v35 = vadd.f32 %v4493_v27, %v4491_v52  ;;  %6937 = vrcp.f32 %v4485_v17 }
 0xb0f   :  { %6939 = vtanh.f32 %v8322_v35 }
 0xb16   :  { %v6936_v7 = vpop.eup %6935 }
 0xb17   :  { %v6938_v19 = vpop.eup %6937  ;;  %v4498_v12 = vmul.f32 %v6936_v7, %v6934_v56 }
 0xb19   :  { %v6940_v33 = vpop.eup %6939 }
 0xb1a   :  { %v4499_v10 = vmul.f32 %v6940_v33, %v6938_v19 }
 0xb1c   :  { %v4508_v61 = vpack.c.bf16 %v4499_v10, %v4498_v12 }
 0xb1e   :  { %4542 = vmatmul.mubr.bf16.vlgmr.msra.gmra.mrb[40].mxu0 %v4508_v61  ;;  %4585 = vmatmul.mubr.bf16.vlgmr.msra.gmra.mrb[40].mxu1 %v4508_v61 }
 0xb1f   :  { %4661 = vmatpush1.bf16.msra.mxu0 %v8071_v38  ;;  %4704 = vmatpush1.bf16.msra.mxu1 %v8104_v32 }
 0xb20   :  { %4662 = vmatprep.subr.bf16.mxu0 %v8108_v50  ;;  %4705 = vmatprep.subr.bf16.mxu1 %v8110_v48 }
 0xb21   :  { %4692 = vmatprep.mubr.bf16.mxu0 %v7349_v0  ;;  %4735 = vmatprep.mubr.bf16.mxu1 %v7349_v0 }
 0xb23   :  { %4663 = vmatpush1.bf16.msra.mxu0 %v8112_v24  ;;  %4706 = vmatpush1.bf16.msra.mxu1 %v8118_v39 }
 0xb24   :  { %4664 = vmatprep.subr.bf16.mxu0 %v8114_v42  ;;  %4707 = vmatprep.subr.bf16.mxu1 %v8123_v40 }
 0xb27   :  { %4665 = vmatpush1.bf16.msra.mxu0 %v8121_v44  ;;  %4708 = vmatpush1.bf16.msra.mxu1 %v8129_v25 }
 0xb28   :  { %4666 = vmatprep.subr.bf16.mxu0 %v8126_v21  ;;  %4709 = vmatprep.subr.bf16.mxu1 %v8132_v47 }
 0xb2b   :  { %4667 = vmatpush1.bf16.msra.mxu0 %v8135_v51  ;;  %4710 = vmatpush1.bf16.msra.mxu1 %v8141_v54 }
 0xb2c   :  { %4668 = vmatprep.subr.bf16.mxu0 %v8138_v53  ;;  %4711 = vmatprep.subr.bf16.mxu1 %v8144_v58 }
 0xb2f   :  { %4669 = vmatpush1.bf16.msra.mxu0 %v8147_v55  ;;  %4712 = vmatpush1.bf16.msra.mxu1 %v8153_v57 }
 0xb30   :  { %4670 = vmatprep.subr.bf16.mxu0 %v8150_v8  ;;  %4713 = vmatprep.subr.bf16.mxu1 %v8156_v59 }
 0xb33   :  { %4671 = vmatpush1.bf16.msra.mxu0 %v8159_v60  ;;  %4714 = vmatpush1.bf16.msra.mxu1 %v8165_v63 }
 0xb34   :  { %4672 = vmatprep.subr.bf16.mxu0 %v8162_v62  ;;  %4715 = vmatprep.subr.bf16.mxu1 %v8175_v46 }
 0xb37   :  { %4673 = vmatpush1.bf16.msra.mxu0 %v8169_v1  ;;  %4716 = vmatpush1.bf16.msra.mxu1 %v8177_v3 }
 0xb38   :  { %4674 = vmatprep.subr.bf16.mxu0 %v8173_v2  ;;  %4717 = vmatprep.subr.bf16.mxu1 %v8179_v4 }
 0xb3b   :  { %4675 = vmatpush1.bf16.msra.mxu0 %v8183_v5  ;;  %4718 = vmatpush1.bf16.msra.mxu1 %v8187_v22 }
 0xb3c   :  { %4811 = vmatprep.subr.bf16.mxu0 %v8068_v31  ;;  %4854 = vmatprep.subr.bf16.mxu1 %v8102_v29 }
 0xbf1   :  { %v4543_v37 = vpop.f32.mrb[40].mxu0  ;;  %v4586_v43 = vpop.f32.mrb[40].mxu1 }
 0xbf2   :  { %v6168_v11 = vadd.f32 %v4543_v37, %v8247_v14  ;;  %v4545_v9 = vpop.f32.mrb[41].mxu0  ;;  %v4588_v34 = vpop.f32.mrb[41].mxu1  ;;  %v6200_v17 = vadd.f32 %v4586_v43, %v8263_v16 }
 0xbf3   :  { %v6169_v18 = vadd.f32 %v4545_v9, %v8251_v6  ;;  %v4547_v26 = vpop.f32.mrb[42].mxu0  ;;  %v4590_v41 = vpop.f32.mrb[42].mxu1  ;;  %v6201_v30 = vadd.f32 %v4588_v34, %v8258_v23 }
 0xbf4   :  { %v5972_v49 = vmul.f32 -1.442695, %v6168_v11  ;;  %v6170_v13 = vadd.f32 %v4547_v26, %v8247_v14  ;;  %v4549_v45 = vpop.f32.mrb[43].mxu0  ;;  %v4592_v28 = vpop.f32.mrb[43].mxu1  ;;  %v6202_v7 = vadd.f32 %v4590_v41, %v8263_v16 }
 0xbf5   :  { %v5974_v36 = vmul.f32 -1.442695, %v6169_v18  ;;  %v6171_v31 = vadd.f32 %v4549_v45, %v8251_v6  ;;  %v5976_v52 = vmul.f32 -1.442695, %v6201_v30  ;;  %v6203_v56 = vadd.f32 %v4592_v28, %v8258_v23 }
 0xbf6   :  { %6941 = vpow2.f32 %v5972_v49  ;;  %v5973_v15 = vmul.f32 -1.442695, %v6170_v13 }
 0xbf7   :  { %6943 = vpow2.f32 %v5974_v36  ;;  %v5975_v27 = vmul.f32 -1.442695, %v6171_v31  ;;  %v5977_v10 = vmul.f32 -1.442695, %v6203_v56 }
 0xbf8   :  { %6945 = vpow2.f32 %v5973_v15 }
 0xbf9   :  { %6947 = vpow2.f32 %v5975_v27 }
 0xbfa   :  { %6949 = vtanh.f32 %v6200_v17 }
 0xbfb   :  { %6951 = vpow2.f32 %v5976_v52 }
 0xbfc   :  { %6953 = vtanh.f32 %v6202_v7 }
 0xc00   :  { %v6942_v19 = vpop.eup %6941 }
 0xc01   :  { %v6944_v33 = vpop.eup %6943  ;;  %v4609_v12 = vadd.f32 1.0, %v6942_v19 }
 0xc02   :  { %v4621_v61 = vadd.f32 1.0, %v6944_v33  ;;  %v6946_v37 = vpop.eup %6945 }
 0xc03   :  { %6955 = vrcp.f32 %v4609_v12  ;;  %v4610_v11 = vadd.f32 1.0, %v6946_v37  ;;  %v6948_v9 = vpop.eup %6947 }
 0xc04   :  { %6957 = vrcp.f32 %v4621_v61  ;;  %v4622_v43 = vadd.f32 1.0, %v6948_v9  ;;  %v6950_v34 = vpop.eup %6949 }
 0xc05   :  { %6959 = vpow2.f32 %v5977_v10  ;;  %v6952_v18 = vpop.eup %6951 }
 0xc06   :  { %6961 = vrcp.f32 %v4610_v11  ;;  %v6954_v26 = vpop.eup %6953  ;;  %v4635_v31 = vadd.f32 1.0, %v6952_v18 }
 0xc07   :  { %6963 = vrcp.f32 %v4622_v43 }
 0xc08   :  { %6965 = vrcp.f32 %v4635_v31 }
 0xc0d   :  { %v6956_v41 = vpop.eup %6955 }
 0xc0e   :  { %v6958_v49 = vpop.eup %6957  ;;  %v4643_v13 = vmul.f32 %v6956_v41, %v6950_v34 }
 0xc0f   :  { %v6960_v45 = vpop.eup %6959  ;;  %v4641_v28 = vmul.f32 %v6958_v49, %v8318_v20 }
 0xc10   :  { %v6962_v36 = vpop.eup %6961  ;;  %v4636_v17 = vadd.f32 1.0, %v6960_v45 }
 0xc11   :  { %v8368_v15 = vadd.f32 %v4643_v13, %v4641_v28  ;;  %v4644_v27 = vmul.f32 %v6962_v36, %v6954_v26  ;;  %v6964_v30 = vpop.eup %6963 }
 0xc12   :  { %v4642_v52 = vmul.f32 %v6964_v30, %v8322_v35  ;;  %v6966_v7 = vpop.eup %6965 }
 0xc13   :  { %6967 = vtanh.f32 %v8368_v15 }
 0xc14   :  { %v8372_v56 = vadd.f32 %v4644_v27, %v4642_v52  ;;  %6969 = vrcp.f32 %v4636_v17 }
 0xc16   :  { %6971 = vtanh.f32 %v8372_v56 }
 0xc1d   :  { %v6968_v19 = vpop.eup %6967 }
 0xc1e   :  { %v6970_v20 = vpop.eup %6969  ;;  %v4649_v12 = vmul.f32 %v6968_v19, %v6966_v7 }
 0xc20   :  { %v6972_v33 = vpop.eup %6971 }
 0xc21   :  { %v4650_v10 = vmul.f32 %v6972_v33, %v6970_v20  ;;  %v8427_v33 = vld [vmem:[#allocation14] ss:$16 sps:$4 sm:$0xff]  }
 0xc23   :  { %v4659_v61 = vpack.c.bf16 %v4650_v10, %v4649_v12  ;;  %v8433_v12 = vld [vmem:[#allocation14 + $0x24] ss:$16 sps:$4 sm:$0xff]   ;;  %v8436_v10 = vld [vmem:[#allocation14 + $0x2c] ss:$16 sps:$4 sm:$0xff]  }
 0xc25   :  { %4693 = vmatmul.mubr.bf16.vlgmr.msra.gmra.mrb[44].mxu0 %v4659_v61  ;;  %4736 = vmatmul.mubr.bf16.vlgmr.msra.gmra.mrb[44].mxu1 %v4659_v61  ;;  %v8441_v61 = vld [vmem:[#allocation14 + $0x20] ss:$16 sps:$4 sm:$0xff]  }
 0xc26   :  { %4812 = vmatpush1.bf16.msra.mxu0 %v8071_v38  ;;  %4855 = vmatpush1.bf16.msra.mxu1 %v8104_v32  ;;  %v8407_v38 = vld [vmem:[#allocation14 + $0x4] ss:$16 sps:$4 sm:$0xff]  }
 0xc27   :  { %4813 = vmatprep.subr.bf16.mxu0 %v8108_v50  ;;  %4856 = vmatprep.subr.bf16.mxu1 %v8110_v48 }
 0xc28   :  { %4843 = vmatprep.mubr.bf16.mxu0 %v7349_v0  ;;  %4886 = vmatprep.mubr.bf16.mxu1 %v7349_v0 }
 0xc2a   :  { %4814 = vmatpush1.bf16.msra.mxu0 %v8112_v24  ;;  %4857 = vmatpush1.bf16.msra.mxu1 %v8118_v39 }
 0xc2b   :  { %4815 = vmatprep.subr.bf16.mxu0 %v8114_v42  ;;  %4858 = vmatprep.subr.bf16.mxu1 %v8123_v40 }
 0xc2e   :  { %4816 = vmatpush1.bf16.msra.mxu0 %v8121_v44  ;;  %4859 = vmatpush1.bf16.msra.mxu1 %v8129_v25 }
 0xc2f   :  { %4817 = vmatprep.subr.bf16.mxu0 %v8126_v21  ;;  %4860 = vmatprep.subr.bf16.mxu1 %v8132_v47 }
 0xc32   :  { %4818 = vmatpush1.bf16.msra.mxu0 %v8135_v51  ;;  %4861 = vmatpush1.bf16.msra.mxu1 %v8141_v54 }
 0xc33   :  { %4819 = vmatprep.subr.bf16.mxu0 %v8138_v53  ;;  %4862 = vmatprep.subr.bf16.mxu1 %v8144_v58 }
 0xc36   :  { %4820 = vmatpush1.bf16.msra.mxu0 %v8147_v55  ;;  %4863 = vmatpush1.bf16.msra.mxu1 %v8153_v57 }
 0xc37   :  { %4821 = vmatprep.subr.bf16.mxu0 %v8150_v8  ;;  %4864 = vmatprep.subr.bf16.mxu1 %v8156_v59 }
 0xc3a   :  { %4822 = vmatpush1.bf16.msra.mxu0 %v8159_v60  ;;  %4865 = vmatpush1.bf16.msra.mxu1 %v8165_v63 }
 0xc3b   :  { %4823 = vmatprep.subr.bf16.mxu0 %v8162_v62  ;;  %4866 = vmatprep.subr.bf16.mxu1 %v8175_v46 }
 0xc3e   :  { %4824 = vmatpush1.bf16.msra.mxu0 %v8169_v1  ;;  %4867 = vmatpush1.bf16.msra.mxu1 %v8177_v3 }
 0xc3f   :  { %4825 = vmatprep.subr.bf16.mxu0 %v8173_v2  ;;  %4868 = vmatprep.subr.bf16.mxu1 %v8179_v4 }
 0xc42   :  { %4826 = vmatpush1.bf16.msra.mxu0 %v8183_v5  ;;  %4869 = vmatpush1.bf16.msra.mxu1 %v8187_v22 }
 0xc43   :  { %4962 = vmatprep.subr.bf16.mxu0 %v8407_v38  ;;  %5005 = vmatprep.subr.bf16.mxu1 %v8102_v29 }
 0xcf8   :  { %v4694_v32 = vpop.f32.mrb[44].mxu0  ;;  %v4737_v50 = vpop.f32.mrb[44].mxu1 }
 0xcf9   :  { %v6172_v48 = vadd.f32 %v4694_v32, %v8247_v14  ;;  %v4696_v24 = vpop.f32.mrb[45].mxu0  ;;  %v4739_v42 = vpop.f32.mrb[45].mxu1  ;;  %v6204_v8 = vadd.f32 %v4737_v50, %v8263_v16  ;;  %v8444_v32 = vld [vmem:[#allocation14 + $0x28] ss:$16 sps:$4 sm:$0xff]   ;;  %v8447_v50 = vld [vmem:[#allocation14 + $0x44] ss:$16 sps:$4 sm:$0xff]  }
 0xcfa   :  { %v6173_v39 = vadd.f32 %v4696_v24, %v8251_v6  ;;  %v4698_v44 = vpop.f32.mrb[46].mxu0  ;;  %v4741_v40 = vpop.f32.mrb[46].mxu1  ;;  %v6205_v55 = vadd.f32 %v4739_v42, %v8258_v23  ;;  %v8453_v24 = vld [vmem:[#allocation14 + $0x40] ss:$16 sps:$4 sm:$0xff]   ;;  %v8456_v42 = vld [vmem:[#allocation14 + $0x48] ss:$16 sps:$4 sm:$0xff]  }
 0xcfb   :  { %v5978_v21 = vmul.f32 -1.442695, %v6172_v48  ;;  %v6174_v25 = vadd.f32 %v4698_v44, %v8247_v14  ;;  %v4700_v47 = vpop.f32.mrb[47].mxu0  ;;  %v4743_v51 = vpop.f32.mrb[47].mxu1  ;;  %v6206_v60 = vadd.f32 %v4741_v40, %v8263_v16  ;;  %v8450_v48 = vld [vmem:[#allocation14 + $0x4c] ss:$16 sps:$4 sm:$0xff]  }
 0xcfc   :  { %v5980_v53 = vmul.f32 -1.442695, %v6173_v39  ;;  %v6175_v54 = vadd.f32 %v4700_v47, %v8251_v6  ;;  %v5982_v57 = vmul.f32 -1.442695, %v6205_v55  ;;  %v6207_v59 = vadd.f32 %v4743_v51, %v8258_v23  ;;  %v8459_v39 = vld [vmem:[#allocation14 + $0x64] ss:$16 sps:$4 sm:$0xff]  }
 0xcfd   :  { %6973 = vpow2.f32 %v5978_v21  ;;  %v5979_v29 = vmul.f32 -1.442695, %v6174_v25  ;;  %v8462_v44 = vld [vmem:[#allocation14 + $0x6c] ss:$16 sps:$4 sm:$0xff]   ;;  %v8465_v40 = vld [vmem:[#allocation14 + $0x60] ss:$16 sps:$4 sm:$0xff]  }
 0xcfe   :  { %6975 = vpow2.f32 %v5980_v53  ;;  %v5981_v58 = vmul.f32 -1.442695, %v6175_v54  ;;  %v5983_v2 = vmul.f32 -1.442695, %v6207_v59  ;;  %v8468_v21 = vld [vmem:[#allocation14 + $0x68] ss:$16 sps:$4 sm:$0xff]  }
 0xcff   :  { %6977 = vpow2.f32 %v5979_v29  ;;  %v8471_v25 = vld [vmem:[#allocation14 + $0x84] ss:$16 sps:$4 sm:$0xff]   ;;  %v8474_v47 = vld [vmem:[#allocation14 + $0x8c] ss:$16 sps:$4 sm:$0xff]   ;;  %v8477_v51 = vld [vmem:[#allocation14 + $0x80] ss:$16 sps:$4 sm:$0xff]  }
 0xd00   :  { %6979 = vpow2.f32 %v5981_v58  ;;  %v8480_v53 = vld [vmem:[#allocation14 + $0x88] ss:$16 sps:$4 sm:$0xff]   ;;  %v8483_v54 = vld [vmem:[#allocation14 + $0xa4] ss:$16 sps:$4 sm:$0xff]   ;;  %v8486_v29 = vld [vmem:[#allocation14 + $0xac] ss:$16 sps:$4 sm:$0xff]  }
 0xd01   :  { %6981 = vtanh.f32 %v6204_v8  ;;  %v8489_v58 = vld [vmem:[#allocation14 + $0xa0] ss:$16 sps:$4 sm:$0xff]   ;;  %v8492_v55 = vld [vmem:[#allocation14 + $0xa8] ss:$16 sps:$4 sm:$0xff]   ;;  %v8495_v8 = vld [vmem:[#allocation14 + $0xc4] ss:$16 sps:$4 sm:$0xff]  }
 0xd02   :  { %6983 = vpow2.f32 %v5982_v57  ;;  %v8498_v57 = vld [vmem:[#allocation14 + $0xcc] ss:$16 sps:$4 sm:$0xff]   ;;  %v8501_v59 = vld [vmem:[#allocation14 + $0xc0] ss:$16 sps:$4 sm:$0xff]  }
 0xd03   :  { %6985 = vtanh.f32 %v6206_v60  ;;  %v8504_v60 = vld [vmem:[#allocation14 + $0xc8] ss:$16 sps:$4 sm:$0xff]  }
 0xd07   :  { %v6974_v62 = vpop.eup %6973 }
 0xd08   :  { %v6976_v63 = vpop.eup %6975  ;;  %v4760_v1 = vadd.f32 1.0, %v6974_v62  ;;  %v8507_v62 = vld [vmem:[#allocation14 + $0xe4] ss:$16 sps:$4 sm:$0xff]  }
 0xd09   :  { %v4772_v46 = vadd.f32 1.0, %v6976_v63  ;;  %v6978_v3 = vpop.eup %6977  ;;  %v8510_v63 = vld [vmem:[#allocation14 + $0xec] ss:$16 sps:$4 sm:$0xff]  }
 0xd0a   :  { %6987 = vrcp.f32 %v4760_v1  ;;  %v4761_v4 = vadd.f32 1.0, %v6978_v3  ;;  %v6980_v5 = vpop.eup %6979  ;;  %v8513_v1 = vld [vmem:[#allocation14 + $0xe0] ss:$16 sps:$4 sm:$0xff]  }
 0xd0b   :  { %6989 = vrcp.f32 %v4772_v46  ;;  %v4773_v22 = vadd.f32 1.0, %v6980_v5  ;;  %v6982_v35 = vpop.eup %6981  ;;  %v8520_v46 = vld [vmem:[#allocation14 + $0xc] ss:$16 sps:$4 sm:$0xff]  }
 0xd0c   :  { %6991 = vpow2.f32 %v5983_v2  ;;  %v6984_v37 = vpop.eup %6983  ;;  %v8516_v2 = vld [vmem:[#allocation14 + $0xe8] ss:$16 sps:$4 sm:$0xff]  }
 0xd0d   :  { %6993 = vrcp.f32 %v4761_v4  ;;  %v6986_v11 = vpop.eup %6985  ;;  %v4786_v49 = vadd.f32 1.0, %v6984_v37 }
 0xd0e   :  { %6995 = vrcp.f32 %v4773_v22 }
 0xd0f   :  { %6997 = vrcp.f32 %v4786_v49 }
 0xd14   :  { %v6988_v9 = vpop.eup %6987 }
 0xd15   :  { %v6990_v43 = vpop.eup %6989  ;;  %v4794_v34 = vmul.f32 %v6988_v9, %v6982_v35 }
 0xd16   :  { %v6992_v18 = vpop.eup %6991  ;;  %v4792_v26 = vmul.f32 %v6990_v43, %v8368_v15 }
 0xd17   :  { %v6994_v41 = vpop.eup %6993  ;;  %v4787_v36 = vadd.f32 1.0, %v6992_v18 }
 0xd18   :  { %v8420_v13 = vadd.f32 %v4794_v34, %v4792_v26  ;;  %v4795_v45 = vmul.f32 %v6994_v41, %v6986_v11  ;;  %v6996_v28 = vpop.eup %6995 }
 0xd19   :  { %v4793_v31 = vmul.f32 %v6996_v28, %v8372_v56  ;;  %v6998_v30 = vpop.eup %6997  ;;  %v8430_v56 = vld [vmem:[#allocation14 + $0x8] ss:$16 sps:$4 sm:$0xff]  }
 0xd1a   :  { %6999 = vtanh.f32 %v8420_v13 }
 0xd1b   :  { %v8424_v27 = vadd.f32 %v4795_v45, %v4793_v31  ;;  %7001 = vrcp.f32 %v4787_v36 }
 0xd1d   :  { %7003 = vtanh.f32 %v8424_v27 }
 0xd24   :  { %v7000_v17 = vpop.eup %6999 }
 0xd25   :  { %v7002_v15 = vpop.eup %7001  ;;  %v4800_v7 = vmul.f32 %v7000_v17, %v6998_v30 }
 0xd27   :  { %v7004_v52 = vpop.eup %7003 }
 0xd28   :  { %v4801_v19 = vmul.f32 %v7004_v52, %v7002_v15 }
 0xd2a   :  { %v4810_v20 = vpack.c.bf16 %v4801_v19, %v4800_v7 }
 0xd2c   :  { %4844 = vmatmul.mubr.bf16.vlgmr.msra.gmra.mrb[48].mxu0 %v4810_v20  ;;  %4887 = vmatmul.mubr.bf16.vlgmr.msra.gmra.mrb[48].mxu1 %v4810_v20 }
 0xd2d   :  { %4963 = vmatpush1.bf16.msra.mxu0 %v8427_v33  ;;  %5006 = vmatpush1.bf16.msra.mxu1 %v8430_v56 }
 0xd2e   :  { %4964 = vmatprep.subr.bf16.mxu0 %v8433_v12  ;;  %5007 = vmatprep.subr.bf16.mxu1 %v8436_v10 }
 0xd2f   :  { %4994 = vmatprep.mubr.bf16.mxu0 %v7349_v0  ;;  %5037 = vmatprep.mubr.bf16.mxu1 %v7349_v0 }
 0xd31   :  { %4965 = vmatpush1.bf16.msra.mxu0 %v8441_v61  ;;  %5008 = vmatpush1.bf16.msra.mxu1 %v8444_v32 }
 0xd32   :  { %4966 = vmatprep.subr.bf16.mxu0 %v8447_v50  ;;  %5009 = vmatprep.subr.bf16.mxu1 %v8450_v48 }
 0xd35   :  { %4967 = vmatpush1.bf16.msra.mxu0 %v8453_v24  ;;  %5010 = vmatpush1.bf16.msra.mxu1 %v8456_v42 }
 0xd36   :  { %4968 = vmatprep.subr.bf16.mxu0 %v8459_v39  ;;  %5011 = vmatprep.subr.bf16.mxu1 %v8462_v44 }
 0xd39   :  { %4969 = vmatpush1.bf16.msra.mxu0 %v8465_v40  ;;  %5012 = vmatpush1.bf16.msra.mxu1 %v8468_v21 }
 0xd3a   :  { %4970 = vmatprep.subr.bf16.mxu0 %v8471_v25  ;;  %5013 = vmatprep.subr.bf16.mxu1 %v8474_v47 }
 0xd3d   :  { %4971 = vmatpush1.bf16.msra.mxu0 %v8477_v51  ;;  %5014 = vmatpush1.bf16.msra.mxu1 %v8480_v53 }
 0xd3e   :  { %4972 = vmatprep.subr.bf16.mxu0 %v8483_v54  ;;  %5015 = vmatprep.subr.bf16.mxu1 %v8486_v29 }
 0xd41   :  { %4973 = vmatpush1.bf16.msra.mxu0 %v8489_v58  ;;  %5016 = vmatpush1.bf16.msra.mxu1 %v8492_v55 }
 0xd42   :  { %4974 = vmatprep.subr.bf16.mxu0 %v8495_v8  ;;  %5017 = vmatprep.subr.bf16.mxu1 %v8498_v57 }
 0xd45   :  { %4975 = vmatpush1.bf16.msra.mxu0 %v8501_v59  ;;  %5018 = vmatpush1.bf16.msra.mxu1 %v8504_v60 }
 0xd46   :  { %4976 = vmatprep.subr.bf16.mxu0 %v8507_v62  ;;  %5019 = vmatprep.subr.bf16.mxu1 %v8510_v63 }
 0xd49   :  { %4977 = vmatpush1.bf16.msra.mxu0 %v8513_v1  ;;  %5020 = vmatpush1.bf16.msra.mxu1 %v8516_v2 }
 0xd4a   :  { %5113 = vmatprep.subr.bf16.mxu0 %v8407_v38  ;;  %5156 = vmatprep.subr.bf16.mxu1 %v8520_v46 }
 0xdff   :  { %v4845_v3 = vpop.f32.mrb[48].mxu0  ;;  %v4888_v4 = vpop.f32.mrb[48].mxu1 }
 0xe00   :  { %v6176_v5 = vadd.f32 %v4845_v3, %v8247_v14  ;;  %v4847_v22 = vpop.f32.mrb[49].mxu0  ;;  %v4890_v35 = vpop.f32.mrb[49].mxu1  ;;  %v6208_v31 = vadd.f32 %v4888_v4, %v8263_v16 }
 0xe01   :  { %v6177_v37 = vadd.f32 %v4847_v22, %v8251_v6  ;;  %v4849_v11 = vpop.f32.mrb[50].mxu0  ;;  %v4892_v9 = vpop.f32.mrb[50].mxu1  ;;  %v6209_v36 = vadd.f32 %v4890_v35, %v8258_v23 }
 0xe02   :  { %v5984_v43 = vmul.f32 -1.442695, %v6176_v5  ;;  %v6178_v34 = vadd.f32 %v4849_v11, %v8247_v14  ;;  %v4851_v18 = vpop.f32.mrb[51].mxu0  ;;  %v4894_v26 = vpop.f32.mrb[51].mxu1  ;;  %v6210_v15 = vadd.f32 %v4892_v9, %v8263_v16 }
 0xe03   :  { %v5986_v41 = vmul.f32 -1.442695, %v6177_v37  ;;  %v6179_v49 = vadd.f32 %v4851_v18, %v8251_v6  ;;  %v5988_v30 = vmul.f32 -1.442695, %v6209_v36  ;;  %v6211_v17 = vadd.f32 %v4894_v26, %v8258_v23 }
 0xe04   :  { %7005 = vpow2.f32 %v5984_v43  ;;  %v5985_v45 = vmul.f32 -1.442695, %v6178_v34 }
 0xe05   :  { %7007 = vpow2.f32 %v5986_v41  ;;  %v5987_v28 = vmul.f32 -1.442695, %v6179_v49  ;;  %v5989_v20 = vmul.f32 -1.442695, %v6211_v17 }
 0xe06   :  { %7009 = vpow2.f32 %v5985_v45 }
 0xe07   :  { %7011 = vpow2.f32 %v5987_v28 }
 0xe08   :  { %7013 = vtanh.f32 %v6208_v31 }
 0xe09   :  { %7015 = vpow2.f32 %v5988_v30 }
 0xe0a   :  { %7017 = vtanh.f32 %v6210_v15 }
 0xe0e   :  { %v7006_v52 = vpop.eup %7005 }
 0xe0f   :  { %v7008_v7 = vpop.eup %7007  ;;  %v4911_v19 = vadd.f32 1.0, %v7006_v52 }
 0xe10   :  { %v4923_v3 = vadd.f32 1.0, %v7008_v7  ;;  %v7010_v5 = vpop.eup %7009 }
 0xe11   :  { %7019 = vrcp.f32 %v4911_v19  ;;  %v4912_v22 = vadd.f32 1.0, %v7010_v5  ;;  %v7012_v35 = vpop.eup %7011 }
 0xe12   :  { %7021 = vrcp.f32 %v4923_v3  ;;  %v4924_v4 = vadd.f32 1.0, %v7012_v35  ;;  %v7014_v37 = vpop.eup %7013 }
 0xe13   :  { %7023 = vpow2.f32 %v5989_v20  ;;  %v7016_v11 = vpop.eup %7015 }
 0xe14   :  { %7025 = vrcp.f32 %v4912_v22  ;;  %v7018_v9 = vpop.eup %7017  ;;  %v4937_v45 = vadd.f32 1.0, %v7016_v11 }
 0xe15   :  { %7027 = vrcp.f32 %v4924_v4 }
 0xe16   :  { %7029 = vrcp.f32 %v4937_v45 }
 0xe1b   :  { %v7020_v43 = vpop.eup %7019 }
 0xe1c   :  { %v7022_v34 = vpop.eup %7021  ;;  %v4945_v18 = vmul.f32 %v7020_v43, %v7014_v37 }
 0xe1d   :  { %v7024_v26 = vpop.eup %7023  ;;  %v4943_v41 = vmul.f32 %v7022_v34, %v8420_v13 }
 0xe1e   :  { %v7026_v49 = vpop.eup %7025  ;;  %v4938_v30 = vadd.f32 1.0, %v7024_v26 }
 0xe1f   :  { %v8532_v28 = vadd.f32 %v4945_v18, %v4943_v41  ;;  %v4946_v36 = vmul.f32 %v7026_v49, %v7018_v9  ;;  %v7028_v31 = vpop.eup %7027 }
 0xe20   :  { %v4944_v17 = vmul.f32 %v7028_v31, %v8424_v27  ;;  %v7030_v52 = vpop.eup %7029 }
 0xe21   :  { %7031 = vtanh.f32 %v8532_v28 }
 0xe22   :  { %v8536_v15 = vadd.f32 %v4946_v36, %v4944_v17  ;;  %7033 = vrcp.f32 %v4938_v30 }
 0xe24   :  { %7035 = vtanh.f32 %v8536_v15 }
 0xe2b   :  { %v7032_v7 = vpop.eup %7031 }
 0xe2c   :  { %v7034_v13 = vpop.eup %7033  ;;  %v4951_v20 = vmul.f32 %v7032_v7, %v7030_v52 }
 0xe2e   :  { %v7036_v19 = vpop.eup %7035 }
 0xe2f   :  { %v4952_v3 = vmul.f32 %v7036_v19, %v7034_v13 }
 0xe31   :  { %v4961_v5 = vpack.c.bf16 %v4952_v3, %v4951_v20 }
 0xe33   :  { %4995 = vmatmul.mubr.bf16.vlgmr.msra.gmra.mrb[52].mxu0 %v4961_v5  ;;  %5038 = vmatmul.mubr.bf16.vlgmr.msra.gmra.mrb[52].mxu1 %v4961_v5 }
 0xe34   :  { %5114 = vmatpush1.bf16.msra.mxu0 %v8427_v33  ;;  %5157 = vmatpush1.bf16.msra.mxu1 %v8430_v56 }
 0xe35   :  { %5115 = vmatprep.subr.bf16.mxu0 %v8433_v12  ;;  %5158 = vmatprep.subr.bf16.mxu1 %v8436_v10 }
 0xe36   :  { %5145 = vmatprep.mubr.bf16.mxu0 %v7349_v0  ;;  %5188 = vmatprep.mubr.bf16.mxu1 %v7349_v0 }
 0xe38   :  { %5116 = vmatpush1.bf16.msra.mxu0 %v8441_v61  ;;  %5159 = vmatpush1.bf16.msra.mxu1 %v8444_v32 }
 0xe39   :  { %5117 = vmatprep.subr.bf16.mxu0 %v8447_v50  ;;  %5160 = vmatprep.subr.bf16.mxu1 %v8450_v48 }
 0xe3c   :  { %5118 = vmatpush1.bf16.msra.mxu0 %v8453_v24  ;;  %5161 = vmatpush1.bf16.msra.mxu1 %v8456_v42 }
 0xe3d   :  { %5119 = vmatprep.subr.bf16.mxu0 %v8459_v39  ;;  %5162 = vmatprep.subr.bf16.mxu1 %v8462_v44 }
 0xe40   :  { %5120 = vmatpush1.bf16.msra.mxu0 %v8465_v40  ;;  %5163 = vmatpush1.bf16.msra.mxu1 %v8468_v21 }
 0xe41   :  { %5121 = vmatprep.subr.bf16.mxu0 %v8471_v25  ;;  %5164 = vmatprep.subr.bf16.mxu1 %v8474_v47 }
 0xe44   :  { %5122 = vmatpush1.bf16.msra.mxu0 %v8477_v51  ;;  %5165 = vmatpush1.bf16.msra.mxu1 %v8480_v53 }
 0xe45   :  { %5123 = vmatprep.subr.bf16.mxu0 %v8483_v54  ;;  %5166 = vmatprep.subr.bf16.mxu1 %v8486_v29 }
 0xe48   :  { %5124 = vmatpush1.bf16.msra.mxu0 %v8489_v58  ;;  %5167 = vmatpush1.bf16.msra.mxu1 %v8492_v55 }
 0xe49   :  { %5125 = vmatprep.subr.bf16.mxu0 %v8495_v8  ;;  %5168 = vmatprep.subr.bf16.mxu1 %v8498_v57 }
 0xe4c   :  { %5126 = vmatpush1.bf16.msra.mxu0 %v8501_v59  ;;  %5169 = vmatpush1.bf16.msra.mxu1 %v8504_v60 }
 0xe4d   :  { %5127 = vmatprep.subr.bf16.mxu0 %v8507_v62  ;;  %5170 = vmatprep.subr.bf16.mxu1 %v8510_v63 }
 0xe50   :  { %5128 = vmatpush1.bf16.msra.mxu0 %v8513_v1  ;;  %5171 = vmatpush1.bf16.msra.mxu1 %v8516_v2 }
 0xe51   :  { %5264 = vmatprep.subr.bf16.mxu0 %v8407_v38  ;;  %5307 = vmatprep.subr.bf16.mxu1 %v8520_v46 }
 0xf06   :  { %v4996_v27 = vpop.f32.mrb[52].mxu0  ;;  %v5039_v22 = vpop.f32.mrb[52].mxu1 }
 0xf07   :  { %v6180_v35 = vadd.f32 %v4996_v27, %v8247_v14  ;;  %v4998_v4 = vpop.f32.mrb[53].mxu0  ;;  %v5041_v37 = vpop.f32.mrb[53].mxu1  ;;  %v6212_v31 = vadd.f32 %v5039_v22, %v8263_v16 }
 0xf08   :  { %v6181_v11 = vadd.f32 %v4998_v4, %v8251_v6  ;;  %v5000_v9 = vpop.f32.mrb[54].mxu0  ;;  %v5043_v43 = vpop.f32.mrb[54].mxu1  ;;  %v6213_v36 = vadd.f32 %v5041_v37, %v8258_v23 }
 0xf09   :  { %v5990_v34 = vmul.f32 -1.442695, %v6180_v35  ;;  %v6182_v18 = vadd.f32 %v5000_v9, %v8247_v14  ;;  %v5002_v26 = vpop.f32.mrb[55].mxu0  ;;  %v5045_v41 = vpop.f32.mrb[55].mxu1  ;;  %v6214_v52 = vadd.f32 %v5043_v43, %v8263_v16 }
 0xf0a   :  { %v5992_v49 = vmul.f32 -1.442695, %v6181_v11  ;;  %v6183_v38 = vadd.f32 %v5002_v26, %v8251_v6  ;;  %v5994_v30 = vmul.f32 -1.442695, %v6213_v36  ;;  %v6215_v17 = vadd.f32 %v5045_v41, %v8258_v23 }
 0xf0b   :  { %7037 = vpow2.f32 %v5990_v34  ;;  %v5991_v46 = vmul.f32 -1.442695, %v6182_v18 }
 0xf0c   :  { %7039 = vpow2.f32 %v5992_v49  ;;  %v5993_v45 = vmul.f32 -1.442695, %v6183_v38  ;;  %v5995_v20 = vmul.f32 -1.442695, %v6215_v17 }
 0xf0d   :  { %7041 = vpow2.f32 %v5991_v46 }
 0xf0e   :  { %7043 = vpow2.f32 %v5993_v45 }
 0xf0f   :  { %7045 = vtanh.f32 %v6212_v31 }
 0xf10   :  { %7047 = vpow2.f32 %v5994_v30 }
 0xf11   :  { %7049 = vtanh.f32 %v6214_v52 }
 0xf15   :  { %v7038_v7 = vpop.eup %7037 }
 0xf16   :  { %v7040_v13 = vpop.eup %7039  ;;  %v5062_v19 = vadd.f32 1.0, %v7038_v7 }
 0xf17   :  { %v5074_v3 = vadd.f32 1.0, %v7040_v13  ;;  %v7042_v5 = vpop.eup %7041 }
 0xf18   :  { %7051 = vrcp.f32 %v5062_v19  ;;  %v5063_v27 = vadd.f32 1.0, %v7042_v5  ;;  %v7044_v35 = vpop.eup %7043 }
 0xf19   :  { %7053 = vrcp.f32 %v5074_v3  ;;  %v5075_v22 = vadd.f32 1.0, %v7044_v35  ;;  %v7046_v4 = vpop.eup %7045 }
 0xf1a   :  { %7055 = vpow2.f32 %v5995_v20  ;;  %v7048_v37 = vpop.eup %7047 }
 0xf1b   :  { %7057 = vrcp.f32 %v5063_v27  ;;  %v7050_v11 = vpop.eup %7049  ;;  %v5088_v49 = vadd.f32 1.0, %v7048_v37 }
 0xf1c   :  { %7059 = vrcp.f32 %v5075_v22 }
 0xf1d   :  { %7061 = vrcp.f32 %v5088_v49 }
 0xf22   :  { %v7052_v9 = vpop.eup %7051 }
 0xf23   :  { %v7054_v43 = vpop.eup %7053  ;;  %v5096_v34 = vmul.f32 %v7052_v9, %v7046_v4 }
 0xf24   :  { %v7056_v18 = vpop.eup %7055  ;;  %v5094_v26 = vmul.f32 %v7054_v43, %v8532_v28 }
 0xf25   :  { %v7058_v41 = vpop.eup %7057  ;;  %v5089_v36 = vadd.f32 1.0, %v7056_v18 }
 0xf26   :  { %v8582_v38 = vadd.f32 %v5096_v34, %v5094_v26  ;;  %v5097_v46 = vmul.f32 %v7058_v41, %v7050_v11  ;;  %v7060_v45 = vpop.eup %7059 }
 0xf27   :  { %v5095_v31 = vmul.f32 %v7060_v45, %v8536_v15  ;;  %v7062_v17 = vpop.eup %7061 }
 0xf28   :  { %7063 = vtanh.f32 %v8582_v38 }
 0xf29   :  { %v8586_v30 = vadd.f32 %v5097_v46, %v5095_v31  ;;  %7065 = vrcp.f32 %v5089_v36 }
 0xf2b   :  { %7067 = vtanh.f32 %v8586_v30 }
 0xf32   :  { %v7064_v52 = vpop.eup %7063 }
 0xf33   :  { %v7066_v28 = vpop.eup %7065  ;;  %v5102_v13 = vmul.f32 %v7064_v52, %v7062_v17  ;;  %v5413_v52 = vld [vmem:[#allocation15] sm:$0xff] }
 0xf35   :  { %v7068_v7 = vpop.eup %7067 }
 0xf36   :  { %v5103_v19 = vmul.f32 %v7068_v7, %v7066_v28  ;;  %v5414_v28 = vld [vmem:[#allocation15 + $0x8] sm:$0xff]  ;;  %v5415_v7 = vld [vmem:[#allocation15 + $0x10] sm:$0xff] }
 0xf38   :  { %v5112_v20 = vpack.c.bf16 %v5103_v19, %v5102_v13  ;;  %v5416_v13 = vld [vmem:[#allocation15 + $0x18] sm:$0xff] }
 0xf39   :  { %v6068_v19 = vpack.c.bf16 %v5416_v13, %v5415_v7 }
 0xf3a   :  { %5146 = vmatmul.mubr.bf16.vlgmr.msra.gmra.mrb[56].mxu0 %v5112_v20  ;;  %5189 = vmatmul.mubr.bf16.vlgmr.msra.gmra.mrb[56].mxu1 %v5112_v20  ;;  %v5417_v20 = vld [vmem:[#allocation15 + $0x20] sm:$0xff] }
 0xf3b   :  { %5265 = vmatpush1.bf16.msra.mxu0 %v8427_v33  ;;  %5308 = vmatpush1.bf16.msra.mxu1 %v8430_v56 }
 0xf3c   :  { %5266 = vmatprep.subr.bf16.mxu0 %v8433_v12  ;;  %5309 = vmatprep.subr.bf16.mxu1 %v8436_v10 }
 0xf3d   :  { %5296 = vmatprep.mubr.bf16.mxu0 %v7349_v0  ;;  %5339 = vmatprep.mubr.bf16.mxu1 %v7349_v0 }
 0xf3f   :  { %5267 = vmatpush1.bf16.msra.mxu0 %v8441_v61  ;;  %5310 = vmatpush1.bf16.msra.mxu1 %v8444_v32 }
 0xf40   :  { %5268 = vmatprep.subr.bf16.mxu0 %v8447_v50  ;;  %5311 = vmatprep.subr.bf16.mxu1 %v8450_v48 }
 0xf43   :  { %5269 = vmatpush1.bf16.msra.mxu0 %v8453_v24  ;;  %5312 = vmatpush1.bf16.msra.mxu1 %v8456_v42 }
 0xf44   :  { %5270 = vmatprep.subr.bf16.mxu0 %v8459_v39  ;;  %5313 = vmatprep.subr.bf16.mxu1 %v8462_v44 }
 0xf47   :  { %5271 = vmatpush1.bf16.msra.mxu0 %v8465_v40  ;;  %5314 = vmatpush1.bf16.msra.mxu1 %v8468_v21 }
 0xf48   :  { %5272 = vmatprep.subr.bf16.mxu0 %v8471_v25  ;;  %5315 = vmatprep.subr.bf16.mxu1 %v8474_v47 }
 0xf4b   :  { %5273 = vmatpush1.bf16.msra.mxu0 %v8477_v51  ;;  %5316 = vmatpush1.bf16.msra.mxu1 %v8480_v53 }
 0xf4c   :  { %5274 = vmatprep.subr.bf16.mxu0 %v8483_v54  ;;  %5317 = vmatprep.subr.bf16.mxu1 %v8486_v29 }
 0xf4f   :  { %5275 = vmatpush1.bf16.msra.mxu0 %v8489_v58  ;;  %5318 = vmatpush1.bf16.msra.mxu1 %v8492_v55 }
 0xf50   :  { %5276 = vmatprep.subr.bf16.mxu0 %v8495_v8  ;;  %5319 = vmatprep.subr.bf16.mxu1 %v8498_v57 }
 0xf53   :  { %5277 = vmatpush1.bf16.msra.mxu0 %v8501_v59  ;;  %5320 = vmatpush1.bf16.msra.mxu1 %v8504_v60 }
 0xf54   :  { %5278 = vmatprep.subr.bf16.mxu0 %v8507_v62  ;;  %5321 = vmatprep.subr.bf16.mxu1 %v8510_v63 }
 0xf57   :  { %5279 = vmatpush1.bf16.msra.mxu0 %v8513_v1  ;;  %5322 = vmatpush1.bf16.msra.mxu1 %v8516_v2 }
0x100d   :  { %v5147_v0 = vpop.f32.mrb[56].mxu0  ;;  %v5190_v33 = vpop.f32.mrb[56].mxu1 }
0x100e   :  { %v6184_v56 = vadd.f32 %v5147_v0, %v8247_v14  ;;  %v5149_v12 = vpop.f32.mrb[57].mxu0  ;;  %v5192_v10 = vpop.f32.mrb[57].mxu1  ;;  %v6216_v51 = vadd.f32 %v5190_v33, %v8263_v16  ;;  %v5418_v0 = vld [vmem:[#allocation15 + $0x28] sm:$0xff] }
0x100f   :  { %v6185_v61 = vadd.f32 %v5149_v12, %v8251_v6  ;;  %v5151_v32 = vpop.f32.mrb[58].mxu0  ;;  %v5194_v50 = vpop.f32.mrb[58].mxu1  ;;  %v6217_v47 = vadd.f32 %v5192_v10, %v8258_v23  ;;  %v6072_v33 = vpack.c.bf16 %v5418_v0, %v5417_v20  ;;  %v5420_v12 = vld [vmem:[#allocation15 + $0x38] sm:$0xff] }
0x1010   :  { %v5996_v48 = vmul.f32 -1.442695, %v6184_v56  ;;  %v6186_v24 = vadd.f32 %v5151_v32, %v8247_v14  ;;  %v5153_v42 = vpop.f32.mrb[59].mxu0  ;;  %v5196_v39 = vpop.f32.mrb[59].mxu1  ;;  %v6218_v29 = vadd.f32 %v5194_v50, %v8263_v16  ;;  %v5419_v56 = vld [vmem:[#allocation15 + $0x30] sm:$0xff]  ;;  %v5422_v32 = vld [vmem:[#allocation15 + $0x48] sm:$0xff] }
0x1011   :  { %v5998_v44 = vmul.f32 -1.442695, %v6185_v61  ;;  %v6187_v40 = vadd.f32 %v5153_v42, %v8251_v6  ;;  %v6000_v53 = vmul.f32 -1.442695, %v6217_v47  ;;  %v6219_v54 = vadd.f32 %v5196_v39, %v8258_v23  ;;  %v5421_v61 = vld [vmem:[#allocation15 + $0x40] sm:$0xff] }
0x1012   :  { %7069 = vpow2.f32 %v5996_v48  ;;  %v5997_v21 = vmul.f32 -1.442695, %v6186_v24  ;;  %v6076_v10 = vpack.c.bf16 %v5420_v12, %v5419_v56  ;;  %v6080_v50 = vpack.c.bf16 %v5422_v32, %v5421_v61  ;;  %v5423_v48 = vld [vmem:[#allocation15 + $0x50] sm:$0xff]  ;;  %v5424_v24 = vld [vmem:[#allocation15 + $0x58] sm:$0xff]  ;;  %v5425_v42 = vld [vmem:[#allocation15 + $0x60] sm:$0xff] }
0x1013   :  { %7071 = vpow2.f32 %v5998_v44  ;;  %v5999_v25 = vmul.f32 -1.442695, %v6187_v40  ;;  %v6001_v57 = vmul.f32 -1.442695, %v6219_v54  ;;  %v6084_v39 = vpack.c.bf16 %v5424_v24, %v5423_v48  ;;  %v5426_v44 = vld [vmem:[#allocation15 + $0x68] sm:$0xff] }
0x1014   :  { %7073 = vpow2.f32 %v5997_v21  ;;  %v6088_v40 = vpack.c.bf16 %v5426_v44, %v5425_v42  ;;  %v5427_v21 = vld [vmem:[#allocation15 + $0x70] sm:$0xff] }
0x1015   :  { %7075 = vpow2.f32 %v5999_v25  ;;  %v5428_v25 = vld [vmem:[#allocation15 + $0x78] sm:$0xff] }
0x1016   :  { %7077 = vtanh.f32 %v6216_v51  ;;  %v6092_v47 = vpack.c.bf16 %v5428_v25, %v5427_v21 }
0x1017   :  { %7079 = vpow2.f32 %v6000_v53 }
0x1018   :  { %7081 = vtanh.f32 %v6218_v29 }
0x101c   :  { %v7070_v58 = vpop.eup %7069 }
0x101d   :  { %v7072_v55 = vpop.eup %7071  ;;  %v5213_v8 = vadd.f32 1.0, %v7070_v58 }
0x101e   :  { %v5225_v59 = vadd.f32 1.0, %v7072_v55  ;;  %v7074_v60 = vpop.eup %7073 }
0x101f   :  { %7083 = vrcp.f32 %v5213_v8  ;;  %v5214_v62 = vadd.f32 1.0, %v7074_v60  ;;  %v7076_v63 = vpop.eup %7075 }
0x1020   :  { %7085 = vrcp.f32 %v5225_v59  ;;  %v5226_v1 = vadd.f32 1.0, %v7076_v63  ;;  %v7078_v2 = vpop.eup %7077 }
0x1021   :  { %7087 = vpow2.f32 %v6001_v57  ;;  %v7080_v15 = vpop.eup %7079 }
0x1022   :  { %7089 = vrcp.f32 %v5214_v62  ;;  %v7082_v3 = vpop.eup %7081  ;;  %v5239_v11 = vadd.f32 1.0, %v7080_v15 }
0x1023   :  { %7091 = vrcp.f32 %v5226_v1 }
0x1024   :  { %7093 = vrcp.f32 %v5239_v11 }
0x1029   :  { %v7084_v5 = vpop.eup %7083 }
0x102a   :  { %v7086_v27 = vpop.eup %7085  ;;  %v5247_v35 = vmul.f32 %v7084_v5, %v7078_v2 }
0x102b   :  { %v7088_v22 = vpop.eup %7087  ;;  %v5245_v4 = vmul.f32 %v7086_v27, %v8582_v38 }
0x102c   :  { %v7090_v37 = vpop.eup %7089  ;;  %v5240_v18 = vadd.f32 1.0, %v7088_v22 }
0x102d   :  { %v8630_v9 = vadd.f32 %v5247_v35, %v5245_v4  ;;  %v5248_v43 = vmul.f32 %v7090_v37, %v7082_v3  ;;  %v7092_v34 = vpop.eup %7091 }
0x102e   :  { %v5246_v26 = vmul.f32 %v7092_v34, %v8586_v30  ;;  %v7094_v49 = vpop.eup %7093  ;;  %v6064_v30 = vpack.c.bf16 %v5414_v28, %v5413_v52 }
0x102f   :  { %7095 = vtanh.f32 %v8630_v9 }
0x1030   :  { %v8634_v41 = vadd.f32 %v5248_v43, %v5246_v26  ;;  %7097 = vrcp.f32 %v5240_v18  ;;  %6065 = vmatprep.subr.bf16.mxu0 %v6064_v30 }
0x1032   :  { %7099 = vtanh.f32 %v8634_v41 }
0x1039   :  { %v7096_v46 = vpop.eup %7095 }
0x103a   :  { %v7098_v38 = vpop.eup %7097  ;;  %v5253_v36 = vmul.f32 %v7096_v46, %v7094_v49 }
0x103c   :  { %v7100_v45 = vpop.eup %7099 }
0x103d   :  { %v5254_v31 = vmul.f32 %v7100_v45, %v7098_v38 }
0x103f   :  { %v5263_v17 = vpack.c.bf16 %v5254_v31, %v5253_v36 }
0x1041   :  { %5297 = vmatmul.mubr.bf16.vlgmr.msra.gmra.mrb[60].mxu0 %v5263_v17  ;;  %5340 = vmatmul.mubr.bf16.vlgmr.msra.gmra.mrb[60].mxu1 %v5263_v17 }
0x1042   :  { %6067 = vmatpush3.bf16.msra.mxu0 %v6064_v30 }
0x1043   :  { %6069 = vmatprep.subr.bf16.mxu0 %v6068_v19 }
0x1046   :  { %6071 = vmatpush3.bf16.msra.mxu0 %v6068_v19 }
0x1047   :  { %6073 = vmatprep.subr.bf16.mxu0 %v6072_v33 }
0x104a   :  { %6075 = vmatpush3.bf16.msra.mxu0 %v6072_v33 }
0x104b   :  { %6077 = vmatprep.subr.bf16.mxu0 %v6076_v10 }
0x104e   :  { %6079 = vmatpush3.bf16.msra.mxu0 %v6076_v10 }
0x104f   :  { %6081 = vmatprep.subr.bf16.mxu0 %v6080_v50 }
0x1052   :  { %6083 = vmatpush3.bf16.msra.mxu0 %v6080_v50 }
0x1053   :  { %6085 = vmatprep.subr.bf16.mxu0 %v6084_v39 }
0x1056   :  { %6087 = vmatpush3.bf16.msra.mxu0 %v6084_v39 }
0x1057   :  { %6089 = vmatprep.subr.bf16.mxu0 %v6088_v40 }
0x105a   :  { %6091 = vmatpush3.bf16.msra.mxu0 %v6088_v40 }
0x105b   :  { %6093 = vmatprep.subr.bf16.mxu0 %v6092_v47 }
0x105e   :  { %6095 = vmatpush3.bf16.msra.mxu0 %v6092_v47 }
0x1114   :  { %v5298_v51 = vpop.f32.mrb[60].mxu0  ;;  %v5341_v53 = vpop.f32.mrb[60].mxu1 }
0x1115   :  { %v6188_v54 = vadd.f32 %v5298_v51, %v8247_v14  ;;  %v5300_v29 = vpop.f32.mrb[61].mxu0  ;;  %v5343_v58 = vpop.f32.mrb[61].mxu1  ;;  %v6220_v27 = vadd.f32 %v5341_v53, %v8263_v16 }
0x1116   :  { %v6189_v55 = vadd.f32 %v5300_v29, %v8251_v6  ;;  %v5302_v8 = vpop.f32.mrb[62].mxu0  ;;  %v5345_v57 = vpop.f32.mrb[62].mxu1  ;;  %v6221_v5 = vadd.f32 %v5343_v58, %v8258_v23 }
0x1117   :  { %v6002_v59 = vmul.f32 -1.442695, %v6188_v54  ;;  %v6190_v60 = vadd.f32 %v5302_v8, %v8247_v14  ;;  %v5304_v62 = vpop.f32.mrb[63].mxu0  ;;  %v5347_v63 = vpop.f32.mrb[63].mxu1  ;;  %v6222_v14 = vadd.f32 %v5345_v57, %v8263_v16 }
0x1118   :  { %v6004_v1 = vmul.f32 -1.442695, %v6189_v55  ;;  %v6191_v2 = vadd.f32 %v5304_v62, %v8251_v6  ;;  %v6006_v35 = vmul.f32 -1.442695, %v6221_v5  ;;  %v6223_v22 = vadd.f32 %v5347_v63, %v8258_v23 }
0x1119   :  { %7101 = vpow2.f32 %v6002_v59  ;;  %v6003_v15 = vmul.f32 -1.442695, %v6190_v60 }
0x111a   :  { %7103 = vpow2.f32 %v6004_v1  ;;  %v6005_v3 = vmul.f32 -1.442695, %v6191_v2  ;;  %v6007_v6 = vmul.f32 -1.442695, %v6223_v22 }
0x111b   :  { %7105 = vpow2.f32 %v6003_v15 }
0x111c   :  { %7107 = vpow2.f32 %v6005_v3 }
0x111d   :  { %7109 = vtanh.f32 %v6220_v27 }
0x111e   :  { %7111 = vpow2.f32 %v6006_v35 }
0x111f   :  { %7113 = vtanh.f32 %v6222_v14 }
0x1123   :  { %v7102_v4 = vpop.eup %7101 }
0x1124   :  { %v7104_v37 = vpop.eup %7103  ;;  %v5364_v11 = vadd.f32 1.0, %v7102_v4 }
0x1125   :  { %v5376_v43 = vadd.f32 1.0, %v7104_v37  ;;  %v7106_v34 = vpop.eup %7105 }
0x1126   :  { %7115 = vrcp.f32 %v5364_v11  ;;  %v5365_v18 = vadd.f32 1.0, %v7106_v34  ;;  %v7108_v26 = vpop.eup %7107 }
0x1127   :  { %7117 = vrcp.f32 %v5376_v43  ;;  %v5377_v49 = vadd.f32 1.0, %v7108_v26  ;;  %v7110_v23 = vpop.eup %7109 }
0x1128   :  { %7119 = vpow2.f32 %v6007_v6  ;;  %v7112_v46 = vpop.eup %7111 }
0x1129   :  { %7121 = vrcp.f32 %v5365_v18  ;;  %v7114_v16 = vpop.eup %7113  ;;  %v5390_v31 = vadd.f32 1.0, %v7112_v46 }
0x112a   :  { %7123 = vrcp.f32 %v5377_v49 }
0x112b   :  { %7125 = vrcp.f32 %v5390_v31 }
0x1130   :  { %v7116_v38 = vpop.eup %7115 }
0x1131   :  { %v7118_v45 = vpop.eup %7117  ;;  %v5398_v36 = vmul.f32 %v7116_v38, %v7110_v23 }
0x1132   :  { %v7120_v17 = vpop.eup %7119  ;;  %v5396_v52 = vmul.f32 %v7118_v45, %v8630_v9  ;;  %v6008_v9 = vld [vmem:[%s8673_s8] ss:$0 sm:$0xff]  ;;  %s7305_s8 = scalar_lea.vmem %s5531_s23, 256 }
0x1133   :  { %v7122_v28 = vpop.eup %7121  ;;  %v5391_v19 = vadd.f32 1.0, %v7120_v17  ;;  %p7306_p6 = scmp.ne.s32.totalorder %s5531_s23, %s7305_s8  ;;  %p7311_p8 = scmp.lt.s32.totalorder %s7305_s8, %s7305_s8 }
0x1134   :  { %v5399_v30 = vmul.f32 %v7122_v28, %v7114_v16  ;;  %v5400_v7 = vadd.f32 %v5398_v36, %v5396_v52  ;;  %v7124_v13 = vpop.eup %7123 }
0x1135   :  { %v5397_v20 = vmul.f32 %v7124_v13, %v8634_v41  ;;  %v7126_v33 = vpop.eup %7125  ;;  %p7312_p9 = por %p7311_p8, %p7310_p7 }
0x1136   :  { %7127 = vtanh.f32 %v5400_v7 }
0x1137   :  { %v5401_v0 = vadd.f32 %v5399_v30, %v5397_v20  ;;  %7129 = vrcp.f32 %v5391_v19  ;;  %p7313_p10 = pnand %p7312_p9, %p7306_p6 }
0x1139   :  { %7131 = vtanh.f32 %v5401_v0 }
0x1140   :  { %v7128_v56 = vpop.eup %7127 }
0x1141   :  { %v5404_v12 = vmul.f32 %v7128_v56, %v7126_v33  ;;  %v7130_v10 = vpop.eup %7129 }
0x1143   :  { %6061 = vmatprep.mubr.f32.mxu0 %v5404_v12  ;;  %v7132_v61 = vpop.eup %7131 }
0x1144   :  { %v5405_v32 = vmul.f32 %v7132_v61, %v7130_v10 }
0x1146   :  { %6062 = vmatmul.mubr.f32.vlgmr.msra.gmra.mrb[64].mxu0 %v5405_v32 }
0x1219   :  { %v6063_v50 = vpop.f32.mrb[64].mxu0 }
0x121a   :  { %v5508_v48 = vadd.f32 %v6063_v50, %v6008_v9  ;;  %v5502_v24 = vpop.f32.mrb[65].mxu0 }
0x121b   :  { %v5503_v41 = vadd.f32 %v6008_v9, %v5502_v24 }
0x121c   :  { %v6010_v42 = vmul.f32 -1.442695, %v5508_v48 }
0x121d   :  { %v6009_v39 = vmul.f32 -1.442695, %v5503_v41 }
0x121e   :  { %7133 = vpow2.f32 %v6010_v42 }
0x121f   :  { %7135 = vpow2.f32 %v6009_v39 }
0x1228   :  { %v7134_v44 = vpop.eup %7133 }
0x1229   :  { %v7136_v40 = vpop.eup %7135  ;;  %v5518_v21 = vadd.f32 1.0, %v7134_v44 }
0x122a   :  { %v5517_v25 = vadd.f32 1.0, %v7136_v40 }
0x122b   :  { %7137 = vrcp.f32 %v5518_v21 }
0x122c   :  { %7139 = vrcp.f32 %v5517_v25 }
0x1235   :  { %v7138_v47 = vpop.eup %7137 }
0x1236   :  { %v7140_v51 = vpop.eup %7139  ;;  %5524 = vst [vmem:[#allocation17 + $0x8] sm:$0xff] %v7138_v47 }
0x1237   :  { %5523 = vst [vmem:[#allocation17] sm:$0xff] %v7140_v51 }
0x1238   :  { %7316 = shalt.err (!%p7313_p10)
}
0x1239   :  { %s7317_s24 = scalar_lea.hbm %s8674_s9, 256 }
0x123a   :  { %p7318_p11 = scmp.ne.s32.totalorder %s8674_s9, %s7317_s24  ;;  %p7321_p12 = scmp.lt.u32.totalorder %s7317_s24, %s8674_s9 }
0x123c   :  { %p7323_p13 = pnand %p7321_p12, %p7318_p11 }
0x123e   :  { %7326 = shalt.err (!%p7323_p13)
}
0x123f   :  { %5536 = dma.vmem_to_hbm [thread:$0]  %s5531_s23, 256, %s8674_s9, [#allocation8], %s7347_s5, %s7347_s5, %s7348_s19  }
0x1240   :  { %7335 = dma.done.wait [#allocation8], 256  }
0x1241   :  { %7336 = vsyncadd [#allocation8], 4294967040 }
0x1242   :  { %5540 = vsyncpa [#allocation7], 1 }
0x1243   :  { %5541 = vsyncpa [#allocation10], 1 }
0x1244   :  { %5542 = vsyncpa [#allocation13], 1 }
0x1245   :  { %5543 = vsyncpa [#allocation16], 1 }
0x1246   :  { %5544 = vsyncpa [#allocation8], 1 }

</bundles_post_ra>
